<compile_context>
chip_gen: v5e
topology: v5e:2x2
jax: 0.10.0
libtpu: 0.0.40
codegen_flags: <defaults>
</compile_context>

<pallas_src>
import functools

import numpy as np

import jax
import jax.numpy as jnp
from jax.experimental import pallas as pl
from jax.experimental.pallas import tpu as pltpu


# ----------------------------------------------------------------------------
# Config mirroring MelSpectrogramConfig / Generator hyper-params (small toy)
# ----------------------------------------------------------------------------
N_MELS = 8
HOP_LENGTH = 4          # stored by the module but unused in forward

HIDDEN_CHANNELS = 16
UPSAMPLE_KERNEL_SIZES = [4, 4]              # stride = k//2 = 2, padding = k//4 = 1
RESIDUAL_KERNEL_SIZES = [3, 5]
RESIDUAL_DILATIONS = [[1, 1], [3, 1]]
SLOPE = 0.1

CH_ALIGN = 8                                # sublane alignment for channels
W_ROWS = 16                                 # max padded channel count (weight buf rows)
WBLOCK = 128                                # one lane tile per conv (weights + bias col)
LANE = 128

TOTAL_STRIDE = 1
for _ku in UPSAMPLE_KERNEL_SIZES:
    TOTAL_STRIDE *= _ku // 2


def _round_up(n, m):
    return ((n + m - 1) // m) * m


# ----------------------------------------------------------------------------
# Parameter construction (deterministic, synthetic, PyTorch layouts)
# ----------------------------------------------------------------------------
def _init_conv(key, c_out, c_in, k, scale=0.1):
    kw, kb = jax.random.split(key)
    w = scale * jax.random.normal(kw, (c_out, c_in, k), jnp.float32)
    b = scale * jax.random.normal(kb, (c_out,), jnp.float32)
    return w, b


def init_generator_params(key):
    params = {}
    key, k_exp = jax.random.split(key)
    params["expand_w"], params["expand_b"] = _init_conv(
        k_exp, HIDDEN_CHANNELS, N_MELS, 7)

    params["upsamples"] = []
    params["res_blocks"] = []
    for i, ku in enumerate(UPSAMPLE_KERNEL_SIZES):
        c_in = HIDDEN_CHANNELS // (2 ** i)
        c_out = HIDDEN_CHANNELS // (2 ** (i + 1))
        key, k_up = jax.random.split(key)
        kw, kb = jax.random.split(k_up)
        # ConvTranspose1d weight layout: (C_in, C_out, K)
        w = 0.1 * jax.random.normal(kw, (c_in, c_out, ku), jnp.float32)
        b = 0.1 * jax.random.normal(kb, (c_out,), jnp.float32)
        params["upsamples"].append(
            {"w": w, "b": b, "stride": ku // 2, "padding": ku // 4})

        layer_blocks = []
        for kr in RESIDUAL_KERNEL_SIZES:
            block = []
            for dr in RESIDUAL_DILATIONS:
                group = []
                for dil in dr:
                    key, k_c = jax.random.split(key)
                    wc, bc = _init_conv(k_c, c_out, c_out, kr)
                    group.append({"w": wc, "b": bc, "dilation": dil,
                                  "padding": (kr - 1) * dil // 2})
                block.append(group)
            layer_blocks.append(block)
        params["res_blocks"].append(layer_blocks)

    key, k_col = jax.random.split(key)
    c_last = HIDDEN_CHANNELS // (2 ** len(UPSAMPLE_KERNEL_SIZES))
    params["collapse_w"], params["collapse_b"] = _init_conv(k_col, 1, c_last, 7)
    return params


# ----------------------------------------------------------------------------
# One-time weight packing: every conv -> one 128-lane block of ONE buffer
# ----------------------------------------------------------------------------
def prepare_params(params):
    """Pack every conv's (C_out_p, K*C_in_p) matrix + bias column into ONE
    (W_ROWS, n_convs*WBLOCK) f32 buffer (single DMA into the kernel).

    Channel dims are zero-padded to multiples of CH_ALIGN so every MXU operand
    is tile aligned.  Padding is mathematically inert: zero weights + zero
    biases keep padded activation channels exactly zero everywhere."""
    blocks = []

    def pack(w2d, bias_vec):
        rows, cols = w2d.shape
        assert rows <= W_ROWS and cols + 1 <= WBLOCK
        blk = jnp.zeros((W_ROWS, WBLOCK), jnp.float32)
        blk = blk.at[:rows, :cols].set(w2d)
        blk = blk.at[:rows, cols].set(bias_vec)
        blocks.append(blk)

    def pack_conv(w_ock, b):
        c_out, c_in, k = w_ock.shape
        c_out_p = _round_up(c_out, CH_ALIGN)
        c_in_p = _round_up(c_in, CH_ALIGN)
        w_p = jnp.zeros((c_out_p, c_in_p, k), jnp.float32)
        w_p = w_p.at[:c_out, :c_in, :].set(w_ock)
        # (C_out_p, K*C_in_p), tap-major columns: col[t*C_in_p + ci] = w[:, ci, t]
        w2d = jnp.transpose(w_p, (0, 2, 1)).reshape(c_out_p, k * c_in_p)
        b_p = jnp.zeros((c_out_p,), jnp.float32).at[:c_out].set(b)
        pack(w2d, b_p)

    pack_conv(params["expand_w"], params["expand_b"])

    for up, layer_blocks in zip(params["upsamples"], params["res_blocks"]):
        w = up["w"]                      # ConvTranspose1d layout (C_in, C_out, K)
        c_in, c_out, k = w.shape
        # TODO(synk): polyphase prep is specialized to kernel=4/stride=2/pad=1
        # (the configured sizes); other sizes need the generic zero-stuff path.
        assert k == 4 and up["stride"] == 2 and up["padding"] == 1
        c_in_p = _round_up(c_in, CH_ALIGN)
        c_out_p = _round_up(c_out, CH_ALIGN)
        w_p = jnp.zeros((c_in_p, c_out_p, k), jnp.float32)
        w_p = w_p.at[:c_in, :c_out, :].set(w)
        taps = [w_p[:, :, t].T for t in range(4)]        # each (C_out_p, C_in_p)
        zero = jnp.zeros_like(taps[0])
        # Fused polyphase LHS (exact PyTorch ConvTranspose1d semantics):
        #   even[t] = W1 x[t] + W3 x[t-1]   (output position 2t)
        #   odd[t]  = W2 x[t] + W0 x[t+1]   (output position 2t+1)
        fused = jnp.concatenate(
            [jnp.concatenate([taps[1], taps[3], zero], axis=1),
             jnp.concatenate([taps[2], zero, taps[0]], axis=1)], axis=0)
        b_p = jnp.zeros((2 * c_out_p,), jnp.float32).at[:c_out].set(up["b"])
        pack(fused, b_p)

        for block in layer_blocks:           # per residual kernel size
            for group in block:              # per dilation group
                for conv_p in group:         # per dilation
                    pack_conv(conv_p["w"], conv_p["b"])

    pack_conv(params["collapse_w"], params["collapse_b"])
    return jnp.concatenate(blocks, axis=1)       # (W_ROWS, n_convs*WBLOCK)


def _build_sel_constants(batch, t_in):
    """0/1 lane-interleave matrices per upsample stage, packed into one buffer:
    per stage [sel_e | sel_o] with sel_e[j, 2j]=1, sel_o[j, 2j+1]=1.  Built with
    numpy at trace time => compile-time constants (no in-kernel iota work).
    TODO(synk): O(L^2); replace with an O(L) interleave before scaling T."""
    lens = [batch * t_in * (2 ** i) for i in range(len(UPSAMPLE_KERNEL_SIZES))]
    rows = max(lens)
    cols = sum(4 * l for l in lens)
    buf = np.zeros((rows, cols), np.float32)
    off = 0
    for l in lens:
        idx = np.arange(l)
        buf[idx, off + 2 * idx] = 1.0                  # sel_e
        buf[idx, off + 2 * l + 2 * idx + 1] = 1.0      # sel_o
        off += 4 * l
    return jnp.asarray(buf)


def _cost_estimate(batch, t_in, packed_weights, sel, out_cols):
    bl = batch * t_in
    hid_p = _round_up(HIDDEN_CHANNELS, CH_ALIGN)
    n_mels_p = _round_up(N_MELS, CH_ALIGN)
    flops = 2 * hid_p * 7 * n_mels_p * bl                        # expand
    seg = bl
    c_in_p = hid_p
    for stage in range(len(UPSAMPLE_KERNEL_SIZES)):
        c_out_p = _round_up(HIDDEN_CHANNELS // (2 ** (stage + 1)), CH_ALIGN)
        flops += 2 * (2 * c_out_p) * (3 * c_in_p) * seg          # fused polyphase
        flops += 2 * 2 * c_out_p * seg * (2 * seg)               # lane interleave
        seg *= 2
        for kr in RESIDUAL_KERNEL_SIZES:
            for dr in RESIDUAL_DILATIONS:
                flops += len(dr) * 2 * c_out_p * kr * c_out_p * seg
        c_in_p = c_out_p
    flops += 2 * CH_ALIGN * 7 * c_in_p * seg                     # collapse
    bytes_accessed = 4 * (n_mels_p * bl + packed_weights.size + sel.size
                          + CH_ALIGN * out_cols)
    return pl.CostEstimate(flops=flops, transcendentals=CH_ALIGN * seg,
                           bytes_accessed=bytes_accessed)


# ----------------------------------------------------------------------------
# The fused Pallas kernel: full Generator forward, all batches in one step
# ----------------------------------------------------------------------------
def _fused_generator_kernel(spec_ref, wbuf_ref, sel_ref, out_ref, *,
                            slope, batch, t_in):
    f32 = jnp.float32
    B = batch
    blk = [0]        # next 128-lane weight block (static Python counter)
    sel_off = [0]    # next column offset into the interleave-constant buffer

    def leaky(v):
        return jnp.where(v >= 0, v, slope * v)

    def take_conv(c_out_p, c_in_p, k):
        o = blk[0] * WBLOCK
        blk[0] += 1
        w = wbuf_ref[0:c_out_p, o:o + k * c_in_p]
        b = wbuf_ref[0:c_out_p, o + k * c_in_p:o + k * c_in_p + 1]
        return w, b

    def take_upsample(c_out_p, c_in_p):
        o = blk[0] * WBLOCK
        blk[0] += 1
        fc = 3 * c_in_p
        w = wbuf_ref[0:2 * c_out_p, o:o + fc]
        b = wbuf_ref[0:c_out_p, o + fc:o + fc + 1]
        return w, b

    def take_sel(total_l):
        o = sel_off[0]
        sel_off[0] += 4 * total_l
        sel_e = sel_ref[0:total_l, o:o + 2 * total_l]
        sel_o = sel_ref[0:total_l, o + 2 * total_l:o + 4 * total_l]
        return sel_e, sel_o

    def conv_same(v, w2d, bcol, k, d, seg_len):
        # stride-1 "same" dilated conv over the batch-in-lanes layout (C, B*L)
        # as ONE MXU matmul; per-batch zero halos are built in VMEM so the
        # receptive field never crosses a batch boundary.
        c = v.shape[0]
        p = (k - 1) * d // 2
        if p > 0:
            z = jnp.zeros((c, p), f32)
            segs = []
            for bb in range(B):
                segs += [z, v[:, bb * seg_len:(bb + 1) * seg_len], z]
            vp = jnp.concatenate(segs, axis=1)
            stride = seg_len + 2 * p
        else:
            vp, stride = v, seg_len
        taps = []
        for t in range(k):
            if B > 1:
                taps.append(jnp.concatenate(
                    [vp[:, bb * stride + t * d: bb * stride + t * d + seg_len]
                     for bb in range(B)], axis=1))
            else:
                taps.append(vp[:, t * d: t * d + seg_len])
        cols = jnp.concatenate(taps, axis=0)             # (K*C, B*L)
        return jnp.dot(w2d, cols, preferred_element_type=f32) + bcol

    def upsample2x(v, w_fused, bcol, sel_e, sel_o, seg_len):
        # Polyphase ConvTranspose1d (K=4, stride=2, pad=1) as ONE fused MXU
        # matmul; even/odd lanes interleaved with precomputed 0/1 matrices.
        c = v.shape[0]
        z1 = jnp.zeros((c, 1), f32)
        prevs, nexts = [], []
        for bb in range(B):
            s = v[:, bb * seg_len:(bb + 1) * seg_len]
            prevs += [z1, s[:, :seg_len - 1]]
            nexts += [s[:, 1:], z1]
        rhs = jnp.concatenate(
            [v, jnp.concatenate(prevs, axis=1), jnp.concatenate(nexts, axis=1)],
            axis=0)                                              # (3*C_in, B*L)
        eo = jnp.dot(w_fused, rhs, preferred_element_type=f32)   # (2*C_out, B*L)
        c_out_p = eo.shape[0] // 2
        ev = eo[0:c_out_p, :]
        od = eo[c_out_p:2 * c_out_p, :]
        return (jnp.dot(ev, sel_e, preferred_element_type=f32)
                + jnp.dot(od, sel_o, preferred_element_type=f32) + bcol)

    # ---- expand ----
    n_mels_p = spec_ref.shape[0]
    hid_p = _round_up(HIDDEN_CHANNELS, CH_ALIGN)
    x = spec_ref[...].astype(f32)                         # (N_MELS_p, B*T)
    seg = t_in
    w, b = take_conv(hid_p, n_mels_p, 7)
    x = conv_same(x, w, b, 7, 1, seg)                     # (C_hidden_p, B*T)

    # ---- upsample stages with residual blocks ----
    for stage in range(len(UPSAMPLE_KERNEL_SIZES)):
        c_in_p = _round_up(HIDDEN_CHANNELS // (2 ** stage), CH_ALIGN)
        c_out_p = _round_up(HIDDEN_CHANNELS // (2 ** (stage + 1)), CH_ALIGN)
        x = leaky(x)
        wf, bu = take_upsample(c_out_p, c_in_p)
        sel_e, sel_o = take_sel(B * seg)
        x = upsample2x(x, wf, bu, sel_e, sel_o, seg)      # (C_out_p, 2*B*L)
        seg = 2 * seg
        x_sum = None
        for kr in RESIDUAL_KERNEL_SIZES:
            y = x
            for dr in RESIDUAL_DILATIONS:
                residual = y
                for dil in dr:
                    w, b = take_conv(c_out_p, c_out_p, kr)
                    y = conv_same(leaky(y), w, b, kr, dil, seg)
                y = residual + y
            x_sum = y if x_sum is None else x_sum + y
        x = x_sum * (1.0 / len(RESIDUAL_KERNEL_SIZES))

    # ---- collapse + tanh, written as a lane/sublane-dense slab ----
    x = leaky(x)
    c_last_p = _round_up(HIDDEN_CHANNELS // (2 ** len(UPSAMPLE_KERNEL_SIZES)),
                         CH_ALIGN)
    w, b = take_conv(_round_up(1, CH_ALIGN), c_last_p, 7)  # C_out=1, zero-padded rows
    x = conv_same(x, w, b, 7, 1, seg)                      # (8, B*L_out); rows 1..7 == 0
    y = jnp.tanh(x)
    pad = out_ref.shape[1] - y.shape[1]
    if pad > 0:
        y = jnp.concatenate([y, jnp.zeros((y.shape[0], pad), f32)], axis=1)
    out_ref[...] = y.astype(out_ref.dtype)


# ----------------------------------------------------------------------------
# Jitted forward (mirrors Generator.forward)
# ----------------------------------------------------------------------------
@jax.jit
def generator_forward(packed_weights, spec, spec_length):
    b, n_mels, t = spec.shape
    n_mels_p = _round_up(n_mels, CH_ALIGN)
    l_out = t * TOTAL_STRIDE
    out_cols = _round_up(b * l_out, LANE)

    # Fold batch into lanes: (N_MELS_p, B*T), batch-contiguous columns.
    spec2d = jnp.transpose(spec, (1, 0, 2)).reshape(n_mels, b * t)
    if n_mels_p != n_mels:
        spec2d = jnp.concatenate(
            [spec2d, jnp.zeros((n_mels_p - n_mels, b * t), spec2d.dtype)], axis=0)

    sel = _build_sel_constants(b, t)          # compile-time constant

    kernel = functools.partial(_fused_generator_kernel,
                               slope=SLOPE, batch=b, t_in=t)

    out2d = pl.pallas_call(
        kernel,
        out_shape=jax.ShapeDtypeStruct((CH_ALIGN, out_cols), spec.dtype),
        grid=(1,),
        in_specs=[pl.BlockSpec((n_mels_p, b * t), lambda i: (0, 0)),
                  pl.BlockSpec(packed_weights.shape, lambda i: (0, 0)),
                  pl.BlockSpec(sel.shape, lambda i: (0, 0))],
        out_specs=pl.BlockSpec((CH_ALIGN, out_cols), lambda i: (0, 0)),
        compiler_params=pltpu.CompilerParams(
            dimension_semantics=("arbitrary",),
            vmem_limit_bytes=32 * 1024 * 1024),
        cost_estimate=_cost_estimate(b, t, packed_weights, sel, out_cols),
    )(spec2d, packed_weights, sel)

    output = out2d[0, :b * l_out].reshape(b, l_out)
    # Same as reference: lengths are only rescaled, outputs are not masked.
    output_length = spec_length * TOTAL_STRIDE
    return {"output": output, "output_length": output_length}


# ----------------------------------------------------------------------------
# Main
# ----------------------------------------------------------------------------
if __name__ == "__main__":
    key = jax.random.PRNGKey(0)
    k_param, k_spec = jax.random.split(key)

    params = init_generator_params(k_param)
    packed_weights = prepare_params(params)    # one-time weight packing

    B, T = 2, 12
    spec = jax.random.normal(k_spec, (B, N_MELS, T), jnp.float32)
    spec_length = jnp.array([T, T - 2], dtype=jnp.int32)

    out = generator_forward(packed_weights, spec, spec_length)
    jax.block_until_ready(out["output"])
    jax.block_until_ready(out["output_length"])

    assert out["output"].shape == (B, T * TOTAL_STRIDE), out["output"].shape
    assert out["output_length"].shape == (B,)
    assert bool(jnp.all(jnp.abs(out["output"]) <= 1.0))   # tanh range check

    print("KERNEL_OK")
</pallas_src>

<mosaic_0001>
module attributes {stable_mosaic.version = 11 : i64} {
  func.func @_fused_generator_kernel(%arg0: i32, %arg1: memref<8x24xf32, #tpu.memory_space<vmem>>, %arg2: memref<16x2560xf32, #tpu.memory_space<vmem>>, %arg3: memref<48x288xf32, #tpu.memory_space<vmem>>, %arg4: memref<8x128xf32, #tpu.memory_space<vmem>>) attributes {dimension_semantics = [#tpu.dimension_semantics<arbitrary>], iteration_bounds = array<i64: 1>, scalar_prefetch = 0 : i64, scratch_operands = 0 : i64, tpu.core_type = #tpu.core_type<tc>, window_params = [{pipeline_mode = #tpu.pipeline_mode<synchronous>, transform_indices = @transform_0, window_bounds = array<i64: 8, 24>}, {pipeline_mode = #tpu.pipeline_mode<synchronous>, transform_indices = @transform_1, window_bounds = array<i64: 16, 2560>}, {pipeline_mode = #tpu.pipeline_mode<synchronous>, transform_indices = @transform_2, window_bounds = array<i64: 48, 288>}, {pipeline_mode = #tpu.pipeline_mode<synchronous>, transform_indices = @transform_3, window_bounds = array<i64: 8, 128>}]} {
    %c0 = arith.constant 0 : index
    %c0_0 = arith.constant 0 : index
    %0 = vector.load %arg1[%c0, %c0_0] : memref<8x24xf32, #tpu.memory_space<vmem>>, vector<8x24xf32>
    %c0_1 = arith.constant 0 : index
    %c0_2 = arith.constant 0 : index
    %1 = vector.load %arg2[%c0_1, %c0_2] : memref<16x2560xf32, #tpu.memory_space<vmem>>, vector<16x56xf32>
    %c0_3 = arith.constant 0 : index
    %c56 = arith.constant 56 : index
    %2 = vector.load %arg2[%c0_3, %c56] : memref<16x2560xf32, #tpu.memory_space<vmem>>, vector<16x1xf32>
    %cst = arith.constant 0.000000e+00 : f32
    %3 = vector.broadcast %cst : f32 to vector<8x3xf32>
    %4 = vector.extract_strided_slice %0 {offsets = [0, 0], sizes = [8, 12], strides = [1, 1]} : vector<8x24xf32> to vector<8x12xf32>
    %5 = vector.extract_strided_slice %0 {offsets = [0, 12], sizes = [8, 12], strides = [1, 1]} : vector<8x24xf32> to vector<8x12xf32>
    %6 = tpu.concatenate %3, %4, %3, %3, %5, %3 in 1 : vector<8x3xf32>, vector<8x12xf32>, vector<8x3xf32>, vector<8x3xf32>, vector<8x12xf32>, vector<8x3xf32> -> vector<8x36xf32>
    %7 = vector.extract_strided_slice %6 {offsets = [0, 0], sizes = [8, 12], strides = [1, 1]} : vector<8x36xf32> to vector<8x12xf32>
    %8 = vector.extract_strided_slice %6 {offsets = [0, 18], sizes = [8, 12], strides = [1, 1]} : vector<8x36xf32> to vector<8x12xf32>
    %9 = tpu.concatenate %7, %8 in 1 : vector<8x12xf32>, vector<8x12xf32> -> vector<8x24xf32>
    %10 = vector.extract_strided_slice %6 {offsets = [0, 1], sizes = [8, 12], strides = [1, 1]} : vector<8x36xf32> to vector<8x12xf32>
    %11 = vector.extract_strided_slice %6 {offsets = [0, 19], sizes = [8, 12], strides = [1, 1]} : vector<8x36xf32> to vector<8x12xf32>
    %12 = tpu.concatenate %10, %11 in 1 : vector<8x12xf32>, vector<8x12xf32> -> vector<8x24xf32>
    %13 = vector.extract_strided_slice %6 {offsets = [0, 2], sizes = [8, 12], strides = [1, 1]} : vector<8x36xf32> to vector<8x12xf32>
    %14 = vector.extract_strided_slice %6 {offsets = [0, 20], sizes = [8, 12], strides = [1, 1]} : vector<8x36xf32> to vector<8x12xf32>
    %15 = tpu.concatenate %13, %14 in 1 : vector<8x12xf32>, vector<8x12xf32> -> vector<8x24xf32>
    %16 = vector.extract_strided_slice %6 {offsets = [0, 3], sizes = [8, 12], strides = [1, 1]} : vector<8x36xf32> to vector<8x12xf32>
    %17 = vector.extract_strided_slice %6 {offsets = [0, 21], sizes = [8, 12], strides = [1, 1]} : vector<8x36xf32> to vector<8x12xf32>
    %18 = tpu.concatenate %16, %17 in 1 : vector<8x12xf32>, vector<8x12xf32> -> vector<8x24xf32>
    %19 = vector.extract_strided_slice %6 {offsets = [0, 4], sizes = [8, 12], strides = [1, 1]} : vector<8x36xf32> to vector<8x12xf32>
    %20 = vector.extract_strided_slice %6 {offsets = [0, 22], sizes = [8, 12], strides = [1, 1]} : vector<8x36xf32> to vector<8x12xf32>
    %21 = tpu.concatenate %19, %20 in 1 : vector<8x12xf32>, vector<8x12xf32> -> vector<8x24xf32>
    %22 = vector.extract_strided_slice %6 {offsets = [0, 5], sizes = [8, 12], strides = [1, 1]} : vector<8x36xf32> to vector<8x12xf32>
    %23 = vector.extract_strided_slice %6 {offsets = [0, 23], sizes = [8, 12], strides = [1, 1]} : vector<8x36xf32> to vector<8x12xf32>
    %24 = tpu.concatenate %22, %23 in 1 : vector<8x12xf32>, vector<8x12xf32> -> vector<8x24xf32>
    %25 = vector.extract_strided_slice %6 {offsets = [0, 6], sizes = [8, 12], strides = [1, 1]} : vector<8x36xf32> to vector<8x12xf32>
    %26 = vector.extract_strided_slice %6 {offsets = [0, 24], sizes = [8, 12], strides = [1, 1]} : vector<8x36xf32> to vector<8x12xf32>
    %27 = tpu.concatenate %25, %26 in 1 : vector<8x12xf32>, vector<8x12xf32> -> vector<8x24xf32>
    %28 = tpu.concatenate %9, %12, %15, %18, %21, %24, %27 in 0 : vector<8x24xf32>, vector<8x24xf32>, vector<8x24xf32>, vector<8x24xf32>, vector<8x24xf32>, vector<8x24xf32>, vector<8x24xf32> -> vector<56x24xf32>
    %cst_4 = arith.constant dense<0.000000e+00> : vector<16x24xf32>
    %29 = tpu.matmul %1, %28, %cst_4 {dimension_numbers = #tpu.dot_dimension_numbers<[1], [0], [0], [1], [0, 0, 1, 1], [], []>} : vector<16x56xf32>, vector<56x24xf32>, vector<16x24xf32> -> vector<16x24xf32>
    %30 = vector.broadcast %2 : vector<16x1xf32> to vector<16x24xf32>
    %31 = arith.addf %29, %30 : vector<16x24xf32>
    %cst_5 = arith.constant 0.000000e+00 : f32
    %32 = vector.broadcast %cst_5 : f32 to vector<16x24xf32>
    %33 = arith.cmpf oge, %31, %32 : vector<16x24xf32>
    %cst_6 = arith.constant 1.000000e-01 : f32
    %34 = vector.broadcast %cst_6 : f32 to vector<16x24xf32>
    %35 = arith.mulf %34, %31 : vector<16x24xf32>
    %36 = arith.select %33, %31, %35 : vector<16x24xi1>, vector<16x24xf32>
    %c0_7 = arith.constant 0 : index
    %c128 = arith.constant 128 : index
    %37 = vector.load %arg2[%c0_7, %c128] : memref<16x2560xf32, #tpu.memory_space<vmem>>, vector<16x48xf32>
    %c0_8 = arith.constant 0 : index
    %c176 = arith.constant 176 : index
    %38 = vector.load %arg2[%c0_8, %c176] : memref<16x2560xf32, #tpu.memory_space<vmem>>, vector<8x1xf32>
    %c0_9 = arith.constant 0 : index
    %c0_10 = arith.constant 0 : index
    %39 = vector.load %arg3[%c0_9, %c0_10] : memref<48x288xf32, #tpu.memory_space<vmem>>, vector<24x48xf32>
    %c0_11 = arith.constant 0 : index
    %c48 = arith.constant 48 : index
    %40 = vector.load %arg3[%c0_11, %c48] : memref<48x288xf32, #tpu.memory_space<vmem>>, vector<24x48xf32>
    %cst_12 = arith.constant 0.000000e+00 : f32
    %41 = vector.broadcast %cst_12 : f32 to vector<16x1xf32>
    %42 = vector.extract_strided_slice %36 {offsets = [0, 0], sizes = [16, 12], strides = [1, 1]} : vector<16x24xf32> to vector<16x12xf32>
    %43 = vector.extract_strided_slice %42 {offsets = [0, 0], sizes = [16, 11], strides = [1, 1]} : vector<16x12xf32> to vector<16x11xf32>
    %44 = vector.extract_strided_slice %42 {offsets = [0, 1], sizes = [16, 11], strides = [1, 1]} : vector<16x12xf32> to vector<16x11xf32>
    %45 = vector.extract_strided_slice %36 {offsets = [0, 12], sizes = [16, 12], strides = [1, 1]} : vector<16x24xf32> to vector<16x12xf32>
    %46 = vector.extract_strided_slice %45 {offsets = [0, 0], sizes = [16, 11], strides = [1, 1]} : vector<16x12xf32> to vector<16x11xf32>
    %47 = vector.extract_strided_slice %45 {offsets = [0, 1], sizes = [16, 11], strides = [1, 1]} : vector<16x12xf32> to vector<16x11xf32>
    %48 = tpu.concatenate %41, %43, %41, %46 in 1 : vector<16x1xf32>, vector<16x11xf32>, vector<16x1xf32>, vector<16x11xf32> -> vector<16x24xf32>
    %49 = tpu.concatenate %44, %41, %47, %41 in 1 : vector<16x11xf32>, vector<16x1xf32>, vector<16x11xf32>, vector<16x1xf32> -> vector<16x24xf32>
    %50 = tpu.concatenate %36, %48, %49 in 0 : vector<16x24xf32>, vector<16x24xf32>, vector<16x24xf32> -> vector<48x24xf32>
    %cst_13 = arith.constant dense<0.000000e+00> : vector<16x24xf32>
    %51 = tpu.matmul %37, %50, %cst_13 {dimension_numbers = #tpu.dot_dimension_numbers<[1], [0], [0], [1], [0, 0, 1, 1], [], []>} : vector<16x48xf32>, vector<48x24xf32>, vector<16x24xf32> -> vector<16x24xf32>
    %52 = vector.extract_strided_slice %51 {offsets = [0, 0], sizes = [8, 24], strides = [1, 1]} : vector<16x24xf32> to vector<8x24xf32>
    %53 = vector.extract_strided_slice %51 {offsets = [8, 0], sizes = [8, 24], strides = [1, 1]} : vector<16x24xf32> to vector<8x24xf32>
    %cst_14 = arith.constant dense<0.000000e+00> : vector<8x48xf32>
    %54 = tpu.matmul %52, %39, %cst_14 {dimension_numbers = #tpu.dot_dimension_numbers<[1], [0], [0], [1], [0, 0, 1, 1], [], []>} : vector<8x24xf32>, vector<24x48xf32>, vector<8x48xf32> -> vector<8x48xf32>
    %cst_15 = arith.constant dense<0.000000e+00> : vector<8x48xf32>
    %55 = tpu.matmul %53, %40, %cst_15 {dimension_numbers = #tpu.dot_dimension_numbers<[1], [0], [0], [1], [0, 0, 1, 1], [], []>} : vector<8x24xf32>, vector<24x48xf32>, vector<8x48xf32> -> vector<8x48xf32>
    %56 = arith.addf %54, %55 : vector<8x48xf32>
    %57 = vector.broadcast %38 : vector<8x1xf32> to vector<8x48xf32>
    %58 = arith.addf %56, %57 : vector<8x48xf32>
    %c0_16 = arith.constant 0 : index
    %c256 = arith.constant 256 : index
    %59 = vector.load %arg2[%c0_16, %c256] : memref<16x2560xf32, #tpu.memory_space<vmem>>, vector<8x24xf32>
    %c0_17 = arith.constant 0 : index
    %c280 = arith.constant 280 : index
    %60 = vector.load %arg2[%c0_17, %c280] : memref<16x2560xf32, #tpu.memory_space<vmem>>, vector<8x1xf32>
    %cst_18 = arith.constant 0.000000e+00 : f32
    %61 = vector.broadcast %cst_18 : f32 to vector<8x48xf32>
    %62 = arith.cmpf oge, %58, %61 : vector<8x48xf32>
    %cst_19 = arith.constant 1.000000e-01 : f32
    %63 = vector.broadcast %cst_19 : f32 to vector<8x48xf32>
    %64 = arith.mulf %63, %58 : vector<8x48xf32>
    %65 = arith.select %62, %58, %64 : vector<8x48xi1>, vector<8x48xf32>
    %cst_20 = arith.constant 0.000000e+00 : f32
    %66 = vector.broadcast %cst_20 : f32 to vector<8x1xf32>
    %67 = vector.extract_strided_slice %65 {offsets = [0, 0], sizes = [8, 24], strides = [1, 1]} : vector<8x48xf32> to vector<8x24xf32>
    %68 = vector.extract_strided_slice %65 {offsets = [0, 24], sizes = [8, 24], strides = [1, 1]} : vector<8x48xf32> to vector<8x24xf32>
    %69 = tpu.concatenate %66, %67, %66, %66, %68, %66 in 1 : vector<8x1xf32>, vector<8x24xf32>, vector<8x1xf32>, vector<8x1xf32>, vector<8x24xf32>, vector<8x1xf32> -> vector<8x52xf32>
    %70 = vector.extract_strided_slice %69 {offsets = [0, 0], sizes = [8, 24], strides = [1, 1]} : vector<8x52xf32> to vector<8x24xf32>
    %71 = vector.extract_strided_slice %69 {offsets = [0, 26], sizes = [8, 24], strides = [1, 1]} : vector<8x52xf32> to vector<8x24xf32>
    %72 = tpu.concatenate %70, %71 in 1 : vector<8x24xf32>, vector<8x24xf32> -> vector<8x48xf32>
    %73 = vector.extract_strided_slice %69 {offsets = [0, 1], sizes = [8, 24], strides = [1, 1]} : vector<8x52xf32> to vector<8x24xf32>
    %74 = vector.extract_strided_slice %69 {offsets = [0, 27], sizes = [8, 24], strides = [1, 1]} : vector<8x52xf32> to vector<8x24xf32>
    %75 = tpu.concatenate %73, %74 in 1 : vector<8x24xf32>, vector<8x24xf32> -> vector<8x48xf32>
    %76 = vector.extract_strided_slice %69 {offsets = [0, 2], sizes = [8, 24], strides = [1, 1]} : vector<8x52xf32> to vector<8x24xf32>
    %77 = vector.extract_strided_slice %69 {offsets = [0, 28], sizes = [8, 24], strides = [1, 1]} : vector<8x52xf32> to vector<8x24xf32>
    %78 = tpu.concatenate %76, %77 in 1 : vector<8x24xf32>, vector<8x24xf32> -> vector<8x48xf32>
    %79 = tpu.concatenate %72, %75, %78 in 0 : vector<8x48xf32>, vector<8x48xf32>, vector<8x48xf32> -> vector<24x48xf32>
    %cst_21 = arith.constant dense<0.000000e+00> : vector<8x48xf32>
    %80 = tpu.matmul %59, %79, %cst_21 {dimension_numbers = #tpu.dot_dimension_numbers<[1], [0], [0], [1], [0, 0, 1, 1], [], []>} : vector<8x24xf32>, vector<24x48xf32>, vector<8x48xf32> -> vector<8x48xf32>
    %81 = vector.broadcast %60 : vector<8x1xf32> to vector<8x48xf32>
    %82 = arith.addf %80, %81 : vector<8x48xf32>
    %c0_22 = arith.constant 0 : index
    %c384 = arith.constant 384 : index
    %83 = vector.load %arg2[%c0_22, %c384] : memref<16x2560xf32, #tpu.memory_space<vmem>>, vector<8x24xf32>
    %c0_23 = arith.constant 0 : index
    %c408 = arith.constant 408 : index
    %84 = vector.load %arg2[%c0_23, %c408] : memref<16x2560xf32, #tpu.memory_space<vmem>>, vector<8x1xf32>
    %cst_24 = arith.constant 0.000000e+00 : f32
    %85 = vector.broadcast %cst_24 : f32 to vector<8x48xf32>
    %86 = arith.cmpf oge, %82, %85 : vector<8x48xf32>
    %cst_25 = arith.constant 1.000000e-01 : f32
    %87 = vector.broadcast %cst_25 : f32 to vector<8x48xf32>
    %88 = arith.mulf %87, %82 : vector<8x48xf32>
    %89 = arith.select %86, %82, %88 : vector<8x48xi1>, vector<8x48xf32>
    %cst_26 = arith.constant 0.000000e+00 : f32
    %90 = vector.broadcast %cst_26 : f32 to vector<8x1xf32>
    %91 = vector.extract_strided_slice %89 {offsets = [0, 0], sizes = [8, 24], strides = [1, 1]} : vector<8x48xf32> to vector<8x24xf32>
    %92 = vector.extract_strided_slice %89 {offsets = [0, 24], sizes = [8, 24], strides = [1, 1]} : vector<8x48xf32> to vector<8x24xf32>
    %93 = tpu.concatenate %90, %91, %90, %90, %92, %90 in 1 : vector<8x1xf32>, vector<8x24xf32>, vector<8x1xf32>, vector<8x1xf32>, vector<8x24xf32>, vector<8x1xf32> -> vector<8x52xf32>
    %94 = vector.extract_strided_slice %93 {offsets = [0, 0], sizes = [8, 24], strides = [1, 1]} : vector<8x52xf32> to vector<8x24xf32>
    %95 = vector.extract_strided_slice %93 {offsets = [0, 26], sizes = [8, 24], strides = [1, 1]} : vector<8x52xf32> to vector<8x24xf32>
    %96 = tpu.concatenate %94, %95 in 1 : vector<8x24xf32>, vector<8x24xf32> -> vector<8x48xf32>
    %97 = vector.extract_strided_slice %93 {offsets = [0, 1], sizes = [8, 24], strides = [1, 1]} : vector<8x52xf32> to vector<8x24xf32>
    %98 = vector.extract_strided_slice %93 {offsets = [0, 27], sizes = [8, 24], strides = [1, 1]} : vector<8x52xf32> to vector<8x24xf32>
    %99 = tpu.concatenate %97, %98 in 1 : vector<8x24xf32>, vector<8x24xf32> -> vector<8x48xf32>
    %100 = vector.extract_strided_slice %93 {offsets = [0, 2], sizes = [8, 24], strides = [1, 1]} : vector<8x52xf32> to vector<8x24xf32>
    %101 = vector.extract_strided_slice %93 {offsets = [0, 28], sizes = [8, 24], strides = [1, 1]} : vector<8x52xf32> to vector<8x24xf32>
    %102 = tpu.concatenate %100, %101 in 1 : vector<8x24xf32>, vector<8x24xf32> -> vector<8x48xf32>
    %103 = tpu.concatenate %96, %99, %102 in 0 : vector<8x48xf32>, vector<8x48xf32>, vector<8x48xf32> -> vector<24x48xf32>
    %cst_27 = arith.constant dense<0.000000e+00> : vector<8x48xf32>
    %104 = tpu.matmul %83, %103, %cst_27 {dimension_numbers = #tpu.dot_dimension_numbers<[1], [0], [0], [1], [0, 0, 1, 1], [], []>} : vector<8x24xf32>, vector<24x48xf32>, vector<8x48xf32> -> vector<8x48xf32>
    %105 = vector.broadcast %84 : vector<8x1xf32> to vector<8x48xf32>
    %106 = arith.addf %104, %105 : vector<8x48xf32>
    %107 = arith.addf %58, %106 : vector<8x48xf32>
    %c0_28 = arith.constant 0 : index
    %c512 = arith.constant 512 : index
    %108 = vector.load %arg2[%c0_28, %c512] : memref<16x2560xf32, #tpu.memory_space<vmem>>, vector<8x24xf32>
    %c0_29 = arith.constant 0 : index
    %c536 = arith.constant 536 : index
    %109 = vector.load %arg2[%c0_29, %c536] : memref<16x2560xf32, #tpu.memory_space<vmem>>, vector<8x1xf32>
    %cst_30 = arith.constant 0.000000e+00 : f32
    %110 = vector.broadcast %cst_30 : f32 to vector<8x48xf32>
    %111 = arith.cmpf oge, %107, %110 : vector<8x48xf32>
    %cst_31 = arith.constant 1.000000e-01 : f32
    %112 = vector.broadcast %cst_31 : f32 to vector<8x48xf32>
    %113 = arith.mulf %112, %107 : vector<8x48xf32>
    %114 = arith.select %111, %107, %113 : vector<8x48xi1>, vector<8x48xf32>
    %cst_32 = arith.constant 0.000000e+00 : f32
    %115 = vector.broadcast %cst_32 : f32 to vector<8x3xf32>
    %116 = vector.extract_strided_slice %114 {offsets = [0, 0], sizes = [8, 24], strides = [1, 1]} : vector<8x48xf32> to vector<8x24xf32>
    %117 = vector.extract_strided_slice %114 {offsets = [0, 24], sizes = [8, 24], strides = [1, 1]} : vector<8x48xf32> to vector<8x24xf32>
    %118 = tpu.concatenate %115, %116, %115, %115, %117, %115 in 1 : vector<8x3xf32>, vector<8x24xf32>, vector<8x3xf32>, vector<8x3xf32>, vector<8x24xf32>, vector<8x3xf32> -> vector<8x60xf32>
    %119 = vector.extract_strided_slice %118 {offsets = [0, 0], sizes = [8, 24], strides = [1, 1]} : vector<8x60xf32> to vector<8x24xf32>
    %120 = vector.extract_strided_slice %118 {offsets = [0, 30], sizes = [8, 24], strides = [1, 1]} : vector<8x60xf32> to vector<8x24xf32>
    %121 = tpu.concatenate %119, %120 in 1 : vector<8x24xf32>, vector<8x24xf32> -> vector<8x48xf32>
    %122 = vector.extract_strided_slice %118 {offsets = [0, 3], sizes = [8, 24], strides = [1, 1]} : vector<8x60xf32> to vector<8x24xf32>
    %123 = vector.extract_strided_slice %118 {offsets = [0, 33], sizes = [8, 24], strides = [1, 1]} : vector<8x60xf32> to vector<8x24xf32>
    %124 = tpu.concatenate %122, %123 in 1 : vector<8x24xf32>, vector<8x24xf32> -> vector<8x48xf32>
    %125 = vector.extract_strided_slice %118 {offsets = [0, 6], sizes = [8, 24], strides = [1, 1]} : vector<8x60xf32> to vector<8x24xf32>
    %126 = vector.extract_strided_slice %118 {offsets = [0, 36], sizes = [8, 24], strides = [1, 1]} : vector<8x60xf32> to vector<8x24xf32>
    %127 = tpu.concatenate %125, %126 in 1 : vector<8x24xf32>, vector<8x24xf32> -> vector<8x48xf32>
    %128 = tpu.concatenate %121, %124, %127 in 0 : vector<8x48xf32>, vector<8x48xf32>, vector<8x48xf32> -> vector<24x48xf32>
    %cst_33 = arith.constant dense<0.000000e+00> : vector<8x48xf32>
    %129 = tpu.matmul %108, %128, %cst_33 {dimension_numbers = #tpu.dot_dimension_numbers<[1], [0], [0], [1], [0, 0, 1, 1], [], []>} : vector<8x24xf32>, vector<24x48xf32>, vector<8x48xf32> -> vector<8x48xf32>
    %130 = vector.broadcast %109 : vector<8x1xf32> to vector<8x48xf32>
    %131 = arith.addf %129, %130 : vector<8x48xf32>
    %c0_34 = arith.constant 0 : index
    %c640 = arith.constant 640 : index
    %132 = vector.load %arg2[%c0_34, %c640] : memref<16x2560xf32, #tpu.memory_space<vmem>>, vector<8x24xf32>
    %c0_35 = arith.constant 0 : index
    %c664 = arith.constant 664 : index
    %133 = vector.load %arg2[%c0_35, %c664] : memref<16x2560xf32, #tpu.memory_space<vmem>>, vector<8x1xf32>
    %cst_36 = arith.constant 0.000000e+00 : f32
    %134 = vector.broadcast %cst_36 : f32 to vector<8x48xf32>
    %135 = arith.cmpf oge, %131, %134 : vector<8x48xf32>
    %cst_37 = arith.constant 1.000000e-01 : f32
    %136 = vector.broadcast %cst_37 : f32 to vector<8x48xf32>
    %137 = arith.mulf %136, %131 : vector<8x48xf32>
    %138 = arith.select %135, %131, %137 : vector<8x48xi1>, vector<8x48xf32>
    %cst_38 = arith.constant 0.000000e+00 : f32
    %139 = vector.broadcast %cst_38 : f32 to vector<8x1xf32>
    %140 = vector.extract_strided_slice %138 {offsets = [0, 0], sizes = [8, 24], strides = [1, 1]} : vector<8x48xf32> to vector<8x24xf32>
    %141 = vector.extract_strided_slice %138 {offsets = [0, 24], sizes = [8, 24], strides = [1, 1]} : vector<8x48xf32> to vector<8x24xf32>
    %142 = tpu.concatenate %139, %140, %139, %139, %141, %139 in 1 : vector<8x1xf32>, vector<8x24xf32>, vector<8x1xf32>, vector<8x1xf32>, vector<8x24xf32>, vector<8x1xf32> -> vector<8x52xf32>
    %143 = vector.extract_strided_slice %142 {offsets = [0, 0], sizes = [8, 24], strides = [1, 1]} : vector<8x52xf32> to vector<8x24xf32>
    %144 = vector.extract_strided_slice %142 {offsets = [0, 26], sizes = [8, 24], strides = [1, 1]} : vector<8x52xf32> to vector<8x24xf32>
    %145 = tpu.concatenate %143, %144 in 1 : vector<8x24xf32>, vector<8x24xf32> -> vector<8x48xf32>
    %146 = vector.extract_strided_slice %142 {offsets = [0, 1], sizes = [8, 24], strides = [1, 1]} : vector<8x52xf32> to vector<8x24xf32>
    %147 = vector.extract_strided_slice %142 {offsets = [0, 27], sizes = [8, 24], strides = [1, 1]} : vector<8x52xf32> to vector<8x24xf32>
    %148 = tpu.concatenate %146, %147 in 1 : vector<8x24xf32>, vector<8x24xf32> -> vector<8x48xf32>
    %149 = vector.extract_strided_slice %142 {offsets = [0, 2], sizes = [8, 24], strides = [1, 1]} : vector<8x52xf32> to vector<8x24xf32>
    %150 = vector.extract_strided_slice %142 {offsets = [0, 28], sizes = [8, 24], strides = [1, 1]} : vector<8x52xf32> to vector<8x24xf32>
    %151 = tpu.concatenate %149, %150 in 1 : vector<8x24xf32>, vector<8x24xf32> -> vector<8x48xf32>
    %152 = tpu.concatenate %145, %148, %151 in 0 : vector<8x48xf32>, vector<8x48xf32>, vector<8x48xf32> -> vector<24x48xf32>
    %cst_39 = arith.constant dense<0.000000e+00> : vector<8x48xf32>
    %153 = tpu.matmul %132, %152, %cst_39 {dimension_numbers = #tpu.dot_dimension_numbers<[1], [0], [0], [1], [0, 0, 1, 1], [], []>} : vector<8x24xf32>, vector<24x48xf32>, vector<8x48xf32> -> vector<8x48xf32>
    %154 = vector.broadcast %133 : vector<8x1xf32> to vector<8x48xf32>
    %155 = arith.addf %153, %154 : vector<8x48xf32>
    %156 = arith.addf %107, %155 : vector<8x48xf32>
    %c0_40 = arith.constant 0 : index
    %c768 = arith.constant 768 : index
    %157 = vector.load %arg2[%c0_40, %c768] : memref<16x2560xf32, #tpu.memory_space<vmem>>, vector<8x40xf32>
    %c0_41 = arith.constant 0 : index
    %c808 = arith.constant 808 : index
    %158 = vector.load %arg2[%c0_41, %c808] : memref<16x2560xf32, #tpu.memory_space<vmem>>, vector<8x1xf32>
    %cst_42 = arith.constant 0.000000e+00 : f32
    %159 = vector.broadcast %cst_42 : f32 to vector<8x48xf32>
    %160 = arith.cmpf oge, %58, %159 : vector<8x48xf32>
    %cst_43 = arith.constant 1.000000e-01 : f32
    %161 = vector.broadcast %cst_43 : f32 to vector<8x48xf32>
    %162 = arith.mulf %161, %58 : vector<8x48xf32>
    %163 = arith.select %160, %58, %162 : vector<8x48xi1>, vector<8x48xf32>
    %cst_44 = arith.constant 0.000000e+00 : f32
    %164 = vector.broadcast %cst_44 : f32 to vector<8x2xf32>
    %165 = vector.extract_strided_slice %163 {offsets = [0, 0], sizes = [8, 24], strides = [1, 1]} : vector<8x48xf32> to vector<8x24xf32>
    %166 = vector.extract_strided_slice %163 {offsets = [0, 24], sizes = [8, 24], strides = [1, 1]} : vector<8x48xf32> to vector<8x24xf32>
    %167 = tpu.concatenate %164, %165, %164, %164, %166, %164 in 1 : vector<8x2xf32>, vector<8x24xf32>, vector<8x2xf32>, vector<8x2xf32>, vector<8x24xf32>, vector<8x2xf32> -> vector<8x56xf32>
    %168 = vector.extract_strided_slice %167 {offsets = [0, 0], sizes = [8, 24], strides = [1, 1]} : vector<8x56xf32> to vector<8x24xf32>
    %169 = vector.extract_strided_slice %167 {offsets = [0, 28], sizes = [8, 24], strides = [1, 1]} : vector<8x56xf32> to vector<8x24xf32>
    %170 = tpu.concatenate %168, %169 in 1 : vector<8x24xf32>, vector<8x24xf32> -> vector<8x48xf32>
    %171 = vector.extract_strided_slice %167 {offsets = [0, 1], sizes = [8, 24], strides = [1, 1]} : vector<8x56xf32> to vector<8x24xf32>
    %172 = vector.extract_strided_slice %167 {offsets = [0, 29], sizes = [8, 24], strides = [1, 1]} : vector<8x56xf32> to vector<8x24xf32>
    %173 = tpu.concatenate %171, %172 in 1 : vector<8x24xf32>, vector<8x24xf32> -> vector<8x48xf32>
    %174 = vector.extract_strided_slice %167 {offsets = [0, 2], sizes = [8, 24], strides = [1, 1]} : vector<8x56xf32> to vector<8x24xf32>
    %175 = vector.extract_strided_slice %167 {offsets = [0, 30], sizes = [8, 24], strides = [1, 1]} : vector<8x56xf32> to vector<8x24xf32>
    %176 = tpu.concatenate %174, %175 in 1 : vector<8x24xf32>, vector<8x24xf32> -> vector<8x48xf32>
    %177 = vector.extract_strided_slice %167 {offsets = [0, 3], sizes = [8, 24], strides = [1, 1]} : vector<8x56xf32> to vector<8x24xf32>
    %178 = vector.extract_strided_slice %167 {offsets = [0, 31], sizes = [8, 24], strides = [1, 1]} : vector<8x56xf32> to vector<8x24xf32>
    %179 = tpu.concatenate %177, %178 in 1 : vector<8x24xf32>, vector<8x24xf32> -> vector<8x48xf32>
    %180 = vector.extract_strided_slice %167 {offsets = [0, 4], sizes = [8, 24], strides = [1, 1]} : vector<8x56xf32> to vector<8x24xf32>
    %181 = vector.extract_strided_slice %167 {offsets = [0, 32], sizes = [8, 24], strides = [1, 1]} : vector<8x56xf32> to vector<8x24xf32>
    %182 = tpu.concatenate %180, %181 in 1 : vector<8x24xf32>, vector<8x24xf32> -> vector<8x48xf32>
    %183 = tpu.concatenate %170, %173, %176, %179, %182 in 0 : vector<8x48xf32>, vector<8x48xf32>, vector<8x48xf32>, vector<8x48xf32>, vector<8x48xf32> -> vector<40x48xf32>
    %cst_45 = arith.constant dense<0.000000e+00> : vector<8x48xf32>
    %184 = tpu.matmul %157, %183, %cst_45 {dimension_numbers = #tpu.dot_dimension_numbers<[1], [0], [0], [1], [0, 0, 1, 1], [], []>} : vector<8x40xf32>, vector<40x48xf32>, vector<8x48xf32> -> vector<8x48xf32>
    %185 = vector.broadcast %158 : vector<8x1xf32> to vector<8x48xf32>
    %186 = arith.addf %184, %185 : vector<8x48xf32>
    %c0_46 = arith.constant 0 : index
    %c896 = arith.constant 896 : index
    %187 = vector.load %arg2[%c0_46, %c896] : memref<16x2560xf32, #tpu.memory_space<vmem>>, vector<8x40xf32>
    %c0_47 = arith.constant 0 : index
    %c936 = arith.constant 936 : index
    %188 = vector.load %arg2[%c0_47, %c936] : memref<16x2560xf32, #tpu.memory_space<vmem>>, vector<8x1xf32>
    %cst_48 = arith.constant 0.000000e+00 : f32
    %189 = vector.broadcast %cst_48 : f32 to vector<8x48xf32>
    %190 = arith.cmpf oge, %186, %189 : vector<8x48xf32>
    %cst_49 = arith.constant 1.000000e-01 : f32
    %191 = vector.broadcast %cst_49 : f32 to vector<8x48xf32>
    %192 = arith.mulf %191, %186 : vector<8x48xf32>
    %193 = arith.select %190, %186, %192 : vector<8x48xi1>, vector<8x48xf32>
    %cst_50 = arith.constant 0.000000e+00 : f32
    %194 = vector.broadcast %cst_50 : f32 to vector<8x2xf32>
    %195 = vector.extract_strided_slice %193 {offsets = [0, 0], sizes = [8, 24], strides = [1, 1]} : vector<8x48xf32> to vector<8x24xf32>
    %196 = vector.extract_strided_slice %193 {offsets = [0, 24], sizes = [8, 24], strides = [1, 1]} : vector<8x48xf32> to vector<8x24xf32>
    %197 = tpu.concatenate %194, %195, %194, %194, %196, %194 in 1 : vector<8x2xf32>, vector<8x24xf32>, vector<8x2xf32>, vector<8x2xf32>, vector<8x24xf32>, vector<8x2xf32> -> vector<8x56xf32>
    %198 = vector.extract_strided_slice %197 {offsets = [0, 0], sizes = [8, 24], strides = [1, 1]} : vector<8x56xf32> to vector<8x24xf32>
    %199 = vector.extract_strided_slice %197 {offsets = [0, 28], sizes = [8, 24], strides = [1, 1]} : vector<8x56xf32> to vector<8x24xf32>
    %200 = tpu.concatenate %198, %199 in 1 : vector<8x24xf32>, vector<8x24xf32> -> vector<8x48xf32>
    %201 = vector.extract_strided_slice %197 {offsets = [0, 1], sizes = [8, 24], strides = [1, 1]} : vector<8x56xf32> to vector<8x24xf32>
    %202 = vector.extract_strided_slice %197 {offsets = [0, 29], sizes = [8, 24], strides = [1, 1]} : vector<8x56xf32> to vector<8x24xf32>
    %203 = tpu.concatenate %201, %202 in 1 : vector<8x24xf32>, vector<8x24xf32> -> vector<8x48xf32>
    %204 = vector.extract_strided_slice %197 {offsets = [0, 2], sizes = [8, 24], strides = [1, 1]} : vector<8x56xf32> to vector<8x24xf32>
    %205 = vector.extract_strided_slice %197 {offsets = [0, 30], sizes = [8, 24], strides = [1, 1]} : vector<8x56xf32> to vector<8x24xf32>
    %206 = tpu.concatenate %204, %205 in 1 : vector<8x24xf32>, vector<8x24xf32> -> vector<8x48xf32>
    %207 = vector.extract_strided_slice %197 {offsets = [0, 3], sizes = [8, 24], strides = [1, 1]} : vector<8x56xf32> to vector<8x24xf32>
    %208 = vector.extract_strided_slice %197 {offsets = [0, 31], sizes = [8, 24], strides = [1, 1]} : vector<8x56xf32> to vector<8x24xf32>
    %209 = tpu.concatenate %207, %208 in 1 : vector<8x24xf32>, vector<8x24xf32> -> vector<8x48xf32>
    %210 = vector.extract_strided_slice %197 {offsets = [0, 4], sizes = [8, 24], strides = [1, 1]} : vector<8x56xf32> to vector<8x24xf32>
    %211 = vector.extract_strided_slice %197 {offsets = [0, 32], sizes = [8, 24], strides = [1, 1]} : vector<8x56xf32> to vector<8x24xf32>
    %212 = tpu.concatenate %210, %211 in 1 : vector<8x24xf32>, vector<8x24xf32> -> vector<8x48xf32>
    %213 = tpu.concatenate %200, %203, %206, %209, %212 in 0 : vector<8x48xf32>, vector<8x48xf32>, vector<8x48xf32>, vector<8x48xf32>, vector<8x48xf32> -> vector<40x48xf32>
    %cst_51 = arith.constant dense<0.000000e+00> : vector<8x48xf32>
    %214 = tpu.matmul %187, %213, %cst_51 {dimension_numbers = #tpu.dot_dimension_numbers<[1], [0], [0], [1], [0, 0, 1, 1], [], []>} : vector<8x40xf32>, vector<40x48xf32>, vector<8x48xf32> -> vector<8x48xf32>
    %215 = vector.broadcast %188 : vector<8x1xf32> to vector<8x48xf32>
    %216 = arith.addf %214, %215 : vector<8x48xf32>
    %217 = arith.addf %58, %216 : vector<8x48xf32>
    %c0_52 = arith.constant 0 : index
    %c1024 = arith.constant 1024 : index
    %218 = vector.load %arg2[%c0_52, %c1024] : memref<16x2560xf32, #tpu.memory_space<vmem>>, vector<8x40xf32>
    %c0_53 = arith.constant 0 : index
    %c1064 = arith.constant 1064 : index
    %219 = vector.load %arg2[%c0_53, %c1064] : memref<16x2560xf32, #tpu.memory_space<vmem>>, vector<8x1xf32>
    %cst_54 = arith.constant 0.000000e+00 : f32
    %220 = vector.broadcast %cst_54 : f32 to vector<8x48xf32>
    %221 = arith.cmpf oge, %217, %220 : vector<8x48xf32>
    %cst_55 = arith.constant 1.000000e-01 : f32
    %222 = vector.broadcast %cst_55 : f32 to vector<8x48xf32>
    %223 = arith.mulf %222, %217 : vector<8x48xf32>
    %224 = arith.select %221, %217, %223 : vector<8x48xi1>, vector<8x48xf32>
    %cst_56 = arith.constant 0.000000e+00 : f32
    %225 = vector.broadcast %cst_56 : f32 to vector<8x6xf32>
    %226 = vector.extract_strided_slice %224 {offsets = [0, 0], sizes = [8, 24], strides = [1, 1]} : vector<8x48xf32> to vector<8x24xf32>
    %227 = vector.extract_strided_slice %224 {offsets = [0, 24], sizes = [8, 24], strides = [1, 1]} : vector<8x48xf32> to vector<8x24xf32>
    %228 = tpu.concatenate %225, %226, %225, %225, %227, %225 in 1 : vector<8x6xf32>, vector<8x24xf32>, vector<8x6xf32>, vector<8x6xf32>, vector<8x24xf32>, vector<8x6xf32> -> vector<8x72xf32>
    %229 = vector.extract_strided_slice %228 {offsets = [0, 0], sizes = [8, 24], strides = [1, 1]} : vector<8x72xf32> to vector<8x24xf32>
    %230 = vector.extract_strided_slice %228 {offsets = [0, 36], sizes = [8, 24], strides = [1, 1]} : vector<8x72xf32> to vector<8x24xf32>
    %231 = tpu.concatenate %229, %230 in 1 : vector<8x24xf32>, vector<8x24xf32> -> vector<8x48xf32>
    %232 = vector.extract_strided_slice %228 {offsets = [0, 3], sizes = [8, 24], strides = [1, 1]} : vector<8x72xf32> to vector<8x24xf32>
    %233 = vector.extract_strided_slice %228 {offsets = [0, 39], sizes = [8, 24], strides = [1, 1]} : vector<8x72xf32> to vector<8x24xf32>
    %234 = tpu.concatenate %232, %233 in 1 : vector<8x24xf32>, vector<8x24xf32> -> vector<8x48xf32>
    %235 = vector.extract_strided_slice %228 {offsets = [0, 6], sizes = [8, 24], strides = [1, 1]} : vector<8x72xf32> to vector<8x24xf32>
    %236 = vector.extract_strided_slice %228 {offsets = [0, 42], sizes = [8, 24], strides = [1, 1]} : vector<8x72xf32> to vector<8x24xf32>
    %237 = tpu.concatenate %235, %236 in 1 : vector<8x24xf32>, vector<8x24xf32> -> vector<8x48xf32>
    %238 = vector.extract_strided_slice %228 {offsets = [0, 9], sizes = [8, 24], strides = [1, 1]} : vector<8x72xf32> to vector<8x24xf32>
    %239 = vector.extract_strided_slice %228 {offsets = [0, 45], sizes = [8, 24], strides = [1, 1]} : vector<8x72xf32> to vector<8x24xf32>
    %240 = tpu.concatenate %238, %239 in 1 : vector<8x24xf32>, vector<8x24xf32> -> vector<8x48xf32>
    %241 = vector.extract_strided_slice %228 {offsets = [0, 12], sizes = [8, 24], strides = [1, 1]} : vector<8x72xf32> to vector<8x24xf32>
    %242 = vector.extract_strided_slice %228 {offsets = [0, 48], sizes = [8, 24], strides = [1, 1]} : vector<8x72xf32> to vector<8x24xf32>
    %243 = tpu.concatenate %241, %242 in 1 : vector<8x24xf32>, vector<8x24xf32> -> vector<8x48xf32>
    %244 = tpu.concatenate %231, %234, %237, %240, %243 in 0 : vector<8x48xf32>, vector<8x48xf32>, vector<8x48xf32>, vector<8x48xf32>, vector<8x48xf32> -> vector<40x48xf32>
    %cst_57 = arith.constant dense<0.000000e+00> : vector<8x48xf32>
    %245 = tpu.matmul %218, %244, %cst_57 {dimension_numbers = #tpu.dot_dimension_numbers<[1], [0], [0], [1], [0, 0, 1, 1], [], []>} : vector<8x40xf32>, vector<40x48xf32>, vector<8x48xf32> -> vector<8x48xf32>
    %246 = vector.broadcast %219 : vector<8x1xf32> to vector<8x48xf32>
    %247 = arith.addf %245, %246 : vector<8x48xf32>
    %c0_58 = arith.constant 0 : index
    %c1152 = arith.constant 1152 : index
    %248 = vector.load %arg2[%c0_58, %c1152] : memref<16x2560xf32, #tpu.memory_space<vmem>>, vector<8x40xf32>
    %c0_59 = arith.constant 0 : index
    %c1192 = arith.constant 1192 : index
    %249 = vector.load %arg2[%c0_59, %c1192] : memref<16x2560xf32, #tpu.memory_space<vmem>>, vector<8x1xf32>
    %cst_60 = arith.constant 0.000000e+00 : f32
    %250 = vector.broadcast %cst_60 : f32 to vector<8x48xf32>
    %251 = arith.cmpf oge, %247, %250 : vector<8x48xf32>
    %cst_61 = arith.constant 1.000000e-01 : f32
    %252 = vector.broadcast %cst_61 : f32 to vector<8x48xf32>
    %253 = arith.mulf %252, %247 : vector<8x48xf32>
    %254 = arith.select %251, %247, %253 : vector<8x48xi1>, vector<8x48xf32>
    %cst_62 = arith.constant 0.000000e+00 : f32
    %255 = vector.broadcast %cst_62 : f32 to vector<8x2xf32>
    %256 = vector.extract_strided_slice %254 {offsets = [0, 0], sizes = [8, 24], strides = [1, 1]} : vector<8x48xf32> to vector<8x24xf32>
    %257 = vector.extract_strided_slice %254 {offsets = [0, 24], sizes = [8, 24], strides = [1, 1]} : vector<8x48xf32> to vector<8x24xf32>
    %258 = tpu.concatenate %255, %256, %255, %255, %257, %255 in 1 : vector<8x2xf32>, vector<8x24xf32>, vector<8x2xf32>, vector<8x2xf32>, vector<8x24xf32>, vector<8x2xf32> -> vector<8x56xf32>
    %259 = vector.extract_strided_slice %258 {offsets = [0, 0], sizes = [8, 24], strides = [1, 1]} : vector<8x56xf32> to vector<8x24xf32>
    %260 = vector.extract_strided_slice %258 {offsets = [0, 28], sizes = [8, 24], strides = [1, 1]} : vector<8x56xf32> to vector<8x24xf32>
    %261 = tpu.concatenate %259, %260 in 1 : vector<8x24xf32>, vector<8x24xf32> -> vector<8x48xf32>
    %262 = vector.extract_strided_slice %258 {offsets = [0, 1], sizes = [8, 24], strides = [1, 1]} : vector<8x56xf32> to vector<8x24xf32>
    %263 = vector.extract_strided_slice %258 {offsets = [0, 29], sizes = [8, 24], strides = [1, 1]} : vector<8x56xf32> to vector<8x24xf32>
    %264 = tpu.concatenate %262, %263 in 1 : vector<8x24xf32>, vector<8x24xf32> -> vector<8x48xf32>
    %265 = vector.extract_strided_slice %258 {offsets = [0, 2], sizes = [8, 24], strides = [1, 1]} : vector<8x56xf32> to vector<8x24xf32>
    %266 = vector.extract_strided_slice %258 {offsets = [0, 30], sizes = [8, 24], strides = [1, 1]} : vector<8x56xf32> to vector<8x24xf32>
    %267 = tpu.concatenate %265, %266 in 1 : vector<8x24xf32>, vector<8x24xf32> -> vector<8x48xf32>
    %268 = vector.extract_strided_slice %258 {offsets = [0, 3], sizes = [8, 24], strides = [1, 1]} : vector<8x56xf32> to vector<8x24xf32>
    %269 = vector.extract_strided_slice %258 {offsets = [0, 31], sizes = [8, 24], strides = [1, 1]} : vector<8x56xf32> to vector<8x24xf32>
    %270 = tpu.concatenate %268, %269 in 1 : vector<8x24xf32>, vector<8x24xf32> -> vector<8x48xf32>
    %271 = vector.extract_strided_slice %258 {offsets = [0, 4], sizes = [8, 24], strides = [1, 1]} : vector<8x56xf32> to vector<8x24xf32>
    %272 = vector.extract_strided_slice %258 {offsets = [0, 32], sizes = [8, 24], strides = [1, 1]} : vector<8x56xf32> to vector<8x24xf32>
    %273 = tpu.concatenate %271, %272 in 1 : vector<8x24xf32>, vector<8x24xf32> -> vector<8x48xf32>
    %274 = tpu.concatenate %261, %264, %267, %270, %273 in 0 : vector<8x48xf32>, vector<8x48xf32>, vector<8x48xf32>, vector<8x48xf32>, vector<8x48xf32> -> vector<40x48xf32>
    %cst_63 = arith.constant dense<0.000000e+00> : vector<8x48xf32>
    %275 = tpu.matmul %248, %274, %cst_63 {dimension_numbers = #tpu.dot_dimension_numbers<[1], [0], [0], [1], [0, 0, 1, 1], [], []>} : vector<8x40xf32>, vector<40x48xf32>, vector<8x48xf32> -> vector<8x48xf32>
    %276 = vector.broadcast %249 : vector<8x1xf32> to vector<8x48xf32>
    %277 = arith.addf %275, %276 : vector<8x48xf32>
    %278 = arith.addf %217, %277 : vector<8x48xf32>
    %279 = arith.addf %156, %278 : vector<8x48xf32>
    %cst_64 = arith.constant 5.000000e-01 : f32
    %280 = vector.broadcast %cst_64 : f32 to vector<8x48xf32>
    %281 = arith.mulf %279, %280 : vector<8x48xf32>
    %cst_65 = arith.constant 0.000000e+00 : f32
    %282 = vector.broadcast %cst_65 : f32 to vector<8x48xf32>
    %283 = arith.cmpf oge, %281, %282 : vector<8x48xf32>
    %cst_66 = arith.constant 1.000000e-01 : f32
    %284 = vector.broadcast %cst_66 : f32 to vector<8x48xf32>
    %285 = arith.mulf %284, %281 : vector<8x48xf32>
    %286 = arith.select %283, %281, %285 : vector<8x48xi1>, vector<8x48xf32>
    %c0_67 = arith.constant 0 : index
    %c1280 = arith.constant 1280 : index
    %287 = vector.load %arg2[%c0_67, %c1280] : memref<16x2560xf32, #tpu.memory_space<vmem>>, vector<16x24xf32>
    %c0_68 = arith.constant 0 : index
    %c1304 = arith.constant 1304 : index
    %288 = vector.load %arg2[%c0_68, %c1304] : memref<16x2560xf32, #tpu.memory_space<vmem>>, vector<8x1xf32>
    %c0_69 = arith.constant 0 : index
    %c96 = arith.constant 96 : index
    %289 = vector.load %arg3[%c0_69, %c96] : memref<48x288xf32, #tpu.memory_space<vmem>>, vector<48x96xf32>
    %c0_70 = arith.constant 0 : index
    %c192 = arith.constant 192 : index
    %290 = vector.load %arg3[%c0_70, %c192] : memref<48x288xf32, #tpu.memory_space<vmem>>, vector<48x96xf32>
    %cst_71 = arith.constant 0.000000e+00 : f32
    %291 = vector.broadcast %cst_71 : f32 to vector<8x1xf32>
    %292 = vector.extract_strided_slice %286 {offsets = [0, 0], sizes = [8, 24], strides = [1, 1]} : vector<8x48xf32> to vector<8x24xf32>
    %293 = vector.extract_strided_slice %292 {offsets = [0, 0], sizes = [8, 23], strides = [1, 1]} : vector<8x24xf32> to vector<8x23xf32>
    %294 = vector.extract_strided_slice %292 {offsets = [0, 1], sizes = [8, 23], strides = [1, 1]} : vector<8x24xf32> to vector<8x23xf32>
    %295 = vector.extract_strided_slice %286 {offsets = [0, 24], sizes = [8, 24], strides = [1, 1]} : vector<8x48xf32> to vector<8x24xf32>
    %296 = vector.extract_strided_slice %295 {offsets = [0, 0], sizes = [8, 23], strides = [1, 1]} : vector<8x24xf32> to vector<8x23xf32>
    %297 = vector.extract_strided_slice %295 {offsets = [0, 1], sizes = [8, 23], strides = [1, 1]} : vector<8x24xf32> to vector<8x23xf32>
    %298 = tpu.concatenate %291, %293, %291, %296 in 1 : vector<8x1xf32>, vector<8x23xf32>, vector<8x1xf32>, vector<8x23xf32> -> vector<8x48xf32>
    %299 = tpu.concatenate %294, %291, %297, %291 in 1 : vector<8x23xf32>, vector<8x1xf32>, vector<8x23xf32>, vector<8x1xf32> -> vector<8x48xf32>
    %300 = tpu.concatenate %286, %298, %299 in 0 : vector<8x48xf32>, vector<8x48xf32>, vector<8x48xf32> -> vector<24x48xf32>
    %cst_72 = arith.constant dense<0.000000e+00> : vector<16x48xf32>
    %301 = tpu.matmul %287, %300, %cst_72 {dimension_numbers = #tpu.dot_dimension_numbers<[1], [0], [0], [1], [0, 0, 1, 1], [], []>} : vector<16x24xf32>, vector<24x48xf32>, vector<16x48xf32> -> vector<16x48xf32>
    %302 = vector.extract_strided_slice %301 {offsets = [0, 0], sizes = [8, 48], strides = [1, 1]} : vector<16x48xf32> to vector<8x48xf32>
    %303 = vector.extract_strided_slice %301 {offsets = [8, 0], sizes = [8, 48], strides = [1, 1]} : vector<16x48xf32> to vector<8x48xf32>
    %cst_73 = arith.constant dense<0.000000e+00> : vector<8x96xf32>
    %304 = tpu.matmul %302, %289, %cst_73 {dimension_numbers = #tpu.dot_dimension_numbers<[1], [0], [0], [1], [0, 0, 1, 1], [], []>} : vector<8x48xf32>, vector<48x96xf32>, vector<8x96xf32> -> vector<8x96xf32>
    %cst_74 = arith.constant dense<0.000000e+00> : vector<8x96xf32>
    %305 = tpu.matmul %303, %290, %cst_74 {dimension_numbers = #tpu.dot_dimension_numbers<[1], [0], [0], [1], [0, 0, 1, 1], [], []>} : vector<8x48xf32>, vector<48x96xf32>, vector<8x96xf32> -> vector<8x96xf32>
    %306 = arith.addf %304, %305 : vector<8x96xf32>
    %307 = vector.broadcast %288 : vector<8x1xf32> to vector<8x96xf32>
    %308 = arith.addf %306, %307 : vector<8x96xf32>
    %c0_75 = arith.constant 0 : index
    %c1408 = arith.constant 1408 : index
    %309 = vector.load %arg2[%c0_75, %c1408] : memref<16x2560xf32, #tpu.memory_space<vmem>>, vector<8x24xf32>
    %c0_76 = arith.constant 0 : index
    %c1432 = arith.constant 1432 : index
    %310 = vector.load %arg2[%c0_76, %c1432] : memref<16x2560xf32, #tpu.memory_space<vmem>>, vector<8x1xf32>
    %cst_77 = arith.constant 0.000000e+00 : f32
    %311 = vector.broadcast %cst_77 : f32 to vector<8x96xf32>
    %312 = arith.cmpf oge, %308, %311 : vector<8x96xf32>
    %cst_78 = arith.constant 1.000000e-01 : f32
    %313 = vector.broadcast %cst_78 : f32 to vector<8x96xf32>
    %314 = arith.mulf %313, %308 : vector<8x96xf32>
    %315 = arith.select %312, %308, %314 : vector<8x96xi1>, vector<8x96xf32>
    %cst_79 = arith.constant 0.000000e+00 : f32
    %316 = vector.broadcast %cst_79 : f32 to vector<8x1xf32>
    %317 = vector.extract_strided_slice %315 {offsets = [0, 0], sizes = [8, 48], strides = [1, 1]} : vector<8x96xf32> to vector<8x48xf32>
    %318 = vector.extract_strided_slice %315 {offsets = [0, 48], sizes = [8, 48], strides = [1, 1]} : vector<8x96xf32> to vector<8x48xf32>
    %319 = tpu.concatenate %316, %317, %316, %316, %318, %316 in 1 : vector<8x1xf32>, vector<8x48xf32>, vector<8x1xf32>, vector<8x1xf32>, vector<8x48xf32>, vector<8x1xf32> -> vector<8x100xf32>
    %320 = vector.extract_strided_slice %319 {offsets = [0, 0], sizes = [8, 48], strides = [1, 1]} : vector<8x100xf32> to vector<8x48xf32>
    %321 = vector.extract_strided_slice %319 {offsets = [0, 50], sizes = [8, 48], strides = [1, 1]} : vector<8x100xf32> to vector<8x48xf32>
    %322 = tpu.concatenate %320, %321 in 1 : vector<8x48xf32>, vector<8x48xf32> -> vector<8x96xf32>
    %323 = vector.extract_strided_slice %319 {offsets = [0, 1], sizes = [8, 48], strides = [1, 1]} : vector<8x100xf32> to vector<8x48xf32>
    %324 = vector.extract_strided_slice %319 {offsets = [0, 51], sizes = [8, 48], strides = [1, 1]} : vector<8x100xf32> to vector<8x48xf32>
    %325 = tpu.concatenate %323, %324 in 1 : vector<8x48xf32>, vector<8x48xf32> -> vector<8x96xf32>
    %326 = vector.extract_strided_slice %319 {offsets = [0, 2], sizes = [8, 48], strides = [1, 1]} : vector<8x100xf32> to vector<8x48xf32>
    %327 = vector.extract_strided_slice %319 {offsets = [0, 52], sizes = [8, 48], strides = [1, 1]} : vector<8x100xf32> to vector<8x48xf32>
    %328 = tpu.concatenate %326, %327 in 1 : vector<8x48xf32>, vector<8x48xf32> -> vector<8x96xf32>
    %329 = tpu.concatenate %322, %325, %328 in 0 : vector<8x96xf32>, vector<8x96xf32>, vector<8x96xf32> -> vector<24x96xf32>
    %cst_80 = arith.constant dense<0.000000e+00> : vector<8x96xf32>
    %330 = tpu.matmul %309, %329, %cst_80 {dimension_numbers = #tpu.dot_dimension_numbers<[1], [0], [0], [1], [0, 0, 1, 1], [], []>} : vector<8x24xf32>, vector<24x96xf32>, vector<8x96xf32> -> vector<8x96xf32>
    %331 = vector.broadcast %310 : vector<8x1xf32> to vector<8x96xf32>
    %332 = arith.addf %330, %331 : vector<8x96xf32>
    %c0_81 = arith.constant 0 : index
    %c1536 = arith.constant 1536 : index
    %333 = vector.load %arg2[%c0_81, %c1536] : memref<16x2560xf32, #tpu.memory_space<vmem>>, vector<8x24xf32>
    %c0_82 = arith.constant 0 : index
    %c1560 = arith.constant 1560 : index
    %334 = vector.load %arg2[%c0_82, %c1560] : memref<16x2560xf32, #tpu.memory_space<vmem>>, vector<8x1xf32>
    %cst_83 = arith.constant 0.000000e+00 : f32
    %335 = vector.broadcast %cst_83 : f32 to vector<8x96xf32>
    %336 = arith.cmpf oge, %332, %335 : vector<8x96xf32>
    %cst_84 = arith.constant 1.000000e-01 : f32
    %337 = vector.broadcast %cst_84 : f32 to vector<8x96xf32>
    %338 = arith.mulf %337, %332 : vector<8x96xf32>
    %339 = arith.select %336, %332, %338 : vector<8x96xi1>, vector<8x96xf32>
    %cst_85 = arith.constant 0.000000e+00 : f32
    %340 = vector.broadcast %cst_85 : f32 to vector<8x1xf32>
    %341 = vector.extract_strided_slice %339 {offsets = [0, 0], sizes = [8, 48], strides = [1, 1]} : vector<8x96xf32> to vector<8x48xf32>
    %342 = vector.extract_strided_slice %339 {offsets = [0, 48], sizes = [8, 48], strides = [1, 1]} : vector<8x96xf32> to vector<8x48xf32>
    %343 = tpu.concatenate %340, %341, %340, %340, %342, %340 in 1 : vector<8x1xf32>, vector<8x48xf32>, vector<8x1xf32>, vector<8x1xf32>, vector<8x48xf32>, vector<8x1xf32> -> vector<8x100xf32>
    %344 = vector.extract_strided_slice %343 {offsets = [0, 0], sizes = [8, 48], strides = [1, 1]} : vector<8x100xf32> to vector<8x48xf32>
    %345 = vector.extract_strided_slice %343 {offsets = [0, 50], sizes = [8, 48], strides = [1, 1]} : vector<8x100xf32> to vector<8x48xf32>
    %346 = tpu.concatenate %344, %345 in 1 : vector<8x48xf32>, vector<8x48xf32> -> vector<8x96xf32>
    %347 = vector.extract_strided_slice %343 {offsets = [0, 1], sizes = [8, 48], strides = [1, 1]} : vector<8x100xf32> to vector<8x48xf32>
    %348 = vector.extract_strided_slice %343 {offsets = [0, 51], sizes = [8, 48], strides = [1, 1]} : vector<8x100xf32> to vector<8x48xf32>
    %349 = tpu.concatenate %347, %348 in 1 : vector<8x48xf32>, vector<8x48xf32> -> vector<8x96xf32>
    %350 = vector.extract_strided_slice %343 {offsets = [0, 2], sizes = [8, 48], strides = [1, 1]} : vector<8x100xf32> to vector<8x48xf32>
    %351 = vector.extract_strided_slice %343 {offsets = [0, 52], sizes = [8, 48], strides = [1, 1]} : vector<8x100xf32> to vector<8x48xf32>
    %352 = tpu.concatenate %350, %351 in 1 : vector<8x48xf32>, vector<8x48xf32> -> vector<8x96xf32>
    %353 = tpu.concatenate %346, %349, %352 in 0 : vector<8x96xf32>, vector<8x96xf32>, vector<8x96xf32> -> vector<24x96xf32>
    %cst_86 = arith.constant dense<0.000000e+00> : vector<8x96xf32>
    %354 = tpu.matmul %333, %353, %cst_86 {dimension_numbers = #tpu.dot_dimension_numbers<[1], [0], [0], [1], [0, 0, 1, 1], [], []>} : vector<8x24xf32>, vector<24x96xf32>, vector<8x96xf32> -> vector<8x96xf32>
    %355 = vector.broadcast %334 : vector<8x1xf32> to vector<8x96xf32>
    %356 = arith.addf %354, %355 : vector<8x96xf32>
    %357 = arith.addf %308, %356 : vector<8x96xf32>
    %c0_87 = arith.constant 0 : index
    %c1664 = arith.constant 1664 : index
    %358 = vector.load %arg2[%c0_87, %c1664] : memref<16x2560xf32, #tpu.memory_space<vmem>>, vector<8x24xf32>
    %c0_88 = arith.constant 0 : index
    %c1688 = arith.constant 1688 : index
    %359 = vector.load %arg2[%c0_88, %c1688] : memref<16x2560xf32, #tpu.memory_space<vmem>>, vector<8x1xf32>
    %cst_89 = arith.constant 0.000000e+00 : f32
    %360 = vector.broadcast %cst_89 : f32 to vector<8x96xf32>
    %361 = arith.cmpf oge, %357, %360 : vector<8x96xf32>
    %cst_90 = arith.constant 1.000000e-01 : f32
    %362 = vector.broadcast %cst_90 : f32 to vector<8x96xf32>
    %363 = arith.mulf %362, %357 : vector<8x96xf32>
    %364 = arith.select %361, %357, %363 : vector<8x96xi1>, vector<8x96xf32>
    %cst_91 = arith.constant 0.000000e+00 : f32
    %365 = vector.broadcast %cst_91 : f32 to vector<8x3xf32>
    %366 = vector.extract_strided_slice %364 {offsets = [0, 0], sizes = [8, 48], strides = [1, 1]} : vector<8x96xf32> to vector<8x48xf32>
    %367 = vector.extract_strided_slice %364 {offsets = [0, 48], sizes = [8, 48], strides = [1, 1]} : vector<8x96xf32> to vector<8x48xf32>
    %368 = tpu.concatenate %365, %366, %365, %365, %367, %365 in 1 : vector<8x3xf32>, vector<8x48xf32>, vector<8x3xf32>, vector<8x3xf32>, vector<8x48xf32>, vector<8x3xf32> -> vector<8x108xf32>
    %369 = vector.extract_strided_slice %368 {offsets = [0, 0], sizes = [8, 48], strides = [1, 1]} : vector<8x108xf32> to vector<8x48xf32>
    %370 = vector.extract_strided_slice %368 {offsets = [0, 54], sizes = [8, 48], strides = [1, 1]} : vector<8x108xf32> to vector<8x48xf32>
    %371 = tpu.concatenate %369, %370 in 1 : vector<8x48xf32>, vector<8x48xf32> -> vector<8x96xf32>
    %372 = vector.extract_strided_slice %368 {offsets = [0, 3], sizes = [8, 48], strides = [1, 1]} : vector<8x108xf32> to vector<8x48xf32>
    %373 = vector.extract_strided_slice %368 {offsets = [0, 57], sizes = [8, 48], strides = [1, 1]} : vector<8x108xf32> to vector<8x48xf32>
    %374 = tpu.concatenate %372, %373 in 1 : vector<8x48xf32>, vector<8x48xf32> -> vector<8x96xf32>
    %375 = vector.extract_strided_slice %368 {offsets = [0, 6], sizes = [8, 48], strides = [1, 1]} : vector<8x108xf32> to vector<8x48xf32>
    %376 = vector.extract_strided_slice %368 {offsets = [0, 60], sizes = [8, 48], strides = [1, 1]} : vector<8x108xf32> to vector<8x48xf32>
    %377 = tpu.concatenate %375, %376 in 1 : vector<8x48xf32>, vector<8x48xf32> -> vector<8x96xf32>
    %378 = tpu.concatenate %371, %374, %377 in 0 : vector<8x96xf32>, vector<8x96xf32>, vector<8x96xf32> -> vector<24x96xf32>
    %cst_92 = arith.constant dense<0.000000e+00> : vector<8x96xf32>
    %379 = tpu.matmul %358, %378, %cst_92 {dimension_numbers = #tpu.dot_dimension_numbers<[1], [0], [0], [1], [0, 0, 1, 1], [], []>} : vector<8x24xf32>, vector<24x96xf32>, vector<8x96xf32> -> vector<8x96xf32>
    %380 = vector.broadcast %359 : vector<8x1xf32> to vector<8x96xf32>
    %381 = arith.addf %379, %380 : vector<8x96xf32>
    %c0_93 = arith.constant 0 : index
    %c1792 = arith.constant 1792 : index
    %382 = vector.load %arg2[%c0_93, %c1792] : memref<16x2560xf32, #tpu.memory_space<vmem>>, vector<8x24xf32>
    %c0_94 = arith.constant 0 : index
    %c1816 = arith.constant 1816 : index
    %383 = vector.load %arg2[%c0_94, %c1816] : memref<16x2560xf32, #tpu.memory_space<vmem>>, vector<8x1xf32>
    %cst_95 = arith.constant 0.000000e+00 : f32
    %384 = vector.broadcast %cst_95 : f32 to vector<8x96xf32>
    %385 = arith.cmpf oge, %381, %384 : vector<8x96xf32>
    %cst_96 = arith.constant 1.000000e-01 : f32
    %386 = vector.broadcast %cst_96 : f32 to vector<8x96xf32>
    %387 = arith.mulf %386, %381 : vector<8x96xf32>
    %388 = arith.select %385, %381, %387 : vector<8x96xi1>, vector<8x96xf32>
    %cst_97 = arith.constant 0.000000e+00 : f32
    %389 = vector.broadcast %cst_97 : f32 to vector<8x1xf32>
    %390 = vector.extract_strided_slice %388 {offsets = [0, 0], sizes = [8, 48], strides = [1, 1]} : vector<8x96xf32> to vector<8x48xf32>
    %391 = vector.extract_strided_slice %388 {offsets = [0, 48], sizes = [8, 48], strides = [1, 1]} : vector<8x96xf32> to vector<8x48xf32>
    %392 = tpu.concatenate %389, %390, %389, %389, %391, %389 in 1 : vector<8x1xf32>, vector<8x48xf32>, vector<8x1xf32>, vector<8x1xf32>, vector<8x48xf32>, vector<8x1xf32> -> vector<8x100xf32>
    %393 = vector.extract_strided_slice %392 {offsets = [0, 0], sizes = [8, 48], strides = [1, 1]} : vector<8x100xf32> to vector<8x48xf32>
    %394 = vector.extract_strided_slice %392 {offsets = [0, 50], sizes = [8, 48], strides = [1, 1]} : vector<8x100xf32> to vector<8x48xf32>
    %395 = tpu.concatenate %393, %394 in 1 : vector<8x48xf32>, vector<8x48xf32> -> vector<8x96xf32>
    %396 = vector.extract_strided_slice %392 {offsets = [0, 1], sizes = [8, 48], strides = [1, 1]} : vector<8x100xf32> to vector<8x48xf32>
    %397 = vector.extract_strided_slice %392 {offsets = [0, 51], sizes = [8, 48], strides = [1, 1]} : vector<8x100xf32> to vector<8x48xf32>
    %398 = tpu.concatenate %396, %397 in 1 : vector<8x48xf32>, vector<8x48xf32> -> vector<8x96xf32>
    %399 = vector.extract_strided_slice %392 {offsets = [0, 2], sizes = [8, 48], strides = [1, 1]} : vector<8x100xf32> to vector<8x48xf32>
    %400 = vector.extract_strided_slice %392 {offsets = [0, 52], sizes = [8, 48], strides = [1, 1]} : vector<8x100xf32> to vector<8x48xf32>
    %401 = tpu.concatenate %399, %400 in 1 : vector<8x48xf32>, vector<8x48xf32> -> vector<8x96xf32>
    %402 = tpu.concatenate %395, %398, %401 in 0 : vector<8x96xf32>, vector<8x96xf32>, vector<8x96xf32> -> vector<24x96xf32>
    %cst_98 = arith.constant dense<0.000000e+00> : vector<8x96xf32>
    %403 = tpu.matmul %382, %402, %cst_98 {dimension_numbers = #tpu.dot_dimension_numbers<[1], [0], [0], [1], [0, 0, 1, 1], [], []>} : vector<8x24xf32>, vector<24x96xf32>, vector<8x96xf32> -> vector<8x96xf32>
    %404 = vector.broadcast %383 : vector<8x1xf32> to vector<8x96xf32>
    %405 = arith.addf %403, %404 : vector<8x96xf32>
    %406 = arith.addf %357, %405 : vector<8x96xf32>
    %c0_99 = arith.constant 0 : index
    %c1920 = arith.constant 1920 : index
    %407 = vector.load %arg2[%c0_99, %c1920] : memref<16x2560xf32, #tpu.memory_space<vmem>>, vector<8x40xf32>
    %c0_100 = arith.constant 0 : index
    %c1960 = arith.constant 1960 : index
    %408 = vector.load %arg2[%c0_100, %c1960] : memref<16x2560xf32, #tpu.memory_space<vmem>>, vector<8x1xf32>
    %cst_101 = arith.constant 0.000000e+00 : f32
    %409 = vector.broadcast %cst_101 : f32 to vector<8x96xf32>
    %410 = arith.cmpf oge, %308, %409 : vector<8x96xf32>
    %cst_102 = arith.constant 1.000000e-01 : f32
    %411 = vector.broadcast %cst_102 : f32 to vector<8x96xf32>
    %412 = arith.mulf %411, %308 : vector<8x96xf32>
    %413 = arith.select %410, %308, %412 : vector<8x96xi1>, vector<8x96xf32>
    %cst_103 = arith.constant 0.000000e+00 : f32
    %414 = vector.broadcast %cst_103 : f32 to vector<8x2xf32>
    %415 = vector.extract_strided_slice %413 {offsets = [0, 0], sizes = [8, 48], strides = [1, 1]} : vector<8x96xf32> to vector<8x48xf32>
    %416 = vector.extract_strided_slice %413 {offsets = [0, 48], sizes = [8, 48], strides = [1, 1]} : vector<8x96xf32> to vector<8x48xf32>
    %417 = tpu.concatenate %414, %415, %414, %414, %416, %414 in 1 : vector<8x2xf32>, vector<8x48xf32>, vector<8x2xf32>, vector<8x2xf32>, vector<8x48xf32>, vector<8x2xf32> -> vector<8x104xf32>
    %418 = vector.extract_strided_slice %417 {offsets = [0, 0], sizes = [8, 48], strides = [1, 1]} : vector<8x104xf32> to vector<8x48xf32>
    %419 = vector.extract_strided_slice %417 {offsets = [0, 52], sizes = [8, 48], strides = [1, 1]} : vector<8x104xf32> to vector<8x48xf32>
    %420 = tpu.concatenate %418, %419 in 1 : vector<8x48xf32>, vector<8x48xf32> -> vector<8x96xf32>
    %421 = vector.extract_strided_slice %417 {offsets = [0, 1], sizes = [8, 48], strides = [1, 1]} : vector<8x104xf32> to vector<8x48xf32>
    %422 = vector.extract_strided_slice %417 {offsets = [0, 53], sizes = [8, 48], strides = [1, 1]} : vector<8x104xf32> to vector<8x48xf32>
    %423 = tpu.concatenate %421, %422 in 1 : vector<8x48xf32>, vector<8x48xf32> -> vector<8x96xf32>
    %424 = vector.extract_strided_slice %417 {offsets = [0, 2], sizes = [8, 48], strides = [1, 1]} : vector<8x104xf32> to vector<8x48xf32>
    %425 = vector.extract_strided_slice %417 {offsets = [0, 54], sizes = [8, 48], strides = [1, 1]} : vector<8x104xf32> to vector<8x48xf32>
    %426 = tpu.concatenate %424, %425 in 1 : vector<8x48xf32>, vector<8x48xf32> -> vector<8x96xf32>
    %427 = vector.extract_strided_slice %417 {offsets = [0, 3], sizes = [8, 48], strides = [1, 1]} : vector<8x104xf32> to vector<8x48xf32>
    %428 = vector.extract_strided_slice %417 {offsets = [0, 55], sizes = [8, 48], strides = [1, 1]} : vector<8x104xf32> to vector<8x48xf32>
    %429 = tpu.concatenate %427, %428 in 1 : vector<8x48xf32>, vector<8x48xf32> -> vector<8x96xf32>
    %430 = vector.extract_strided_slice %417 {offsets = [0, 4], sizes = [8, 48], strides = [1, 1]} : vector<8x104xf32> to vector<8x48xf32>
    %431 = vector.extract_strided_slice %417 {offsets = [0, 56], sizes = [8, 48], strides = [1, 1]} : vector<8x104xf32> to vector<8x48xf32>
    %432 = tpu.concatenate %430, %431 in 1 : vector<8x48xf32>, vector<8x48xf32> -> vector<8x96xf32>
    %433 = tpu.concatenate %420, %423, %426, %429, %432 in 0 : vector<8x96xf32>, vector<8x96xf32>, vector<8x96xf32>, vector<8x96xf32>, vector<8x96xf32> -> vector<40x96xf32>
    %cst_104 = arith.constant dense<0.000000e+00> : vector<8x96xf32>
    %434 = tpu.matmul %407, %433, %cst_104 {dimension_numbers = #tpu.dot_dimension_numbers<[1], [0], [0], [1], [0, 0, 1, 1], [], []>} : vector<8x40xf32>, vector<40x96xf32>, vector<8x96xf32> -> vector<8x96xf32>
    %435 = vector.broadcast %408 : vector<8x1xf32> to vector<8x96xf32>
    %436 = arith.addf %434, %435 : vector<8x96xf32>
    %c0_105 = arith.constant 0 : index
    %c2048 = arith.constant 2048 : index
    %437 = vector.load %arg2[%c0_105, %c2048] : memref<16x2560xf32, #tpu.memory_space<vmem>>, vector<8x40xf32>
    %c0_106 = arith.constant 0 : index
    %c2088 = arith.constant 2088 : index
    %438 = vector.load %arg2[%c0_106, %c2088] : memref<16x2560xf32, #tpu.memory_space<vmem>>, vector<8x1xf32>
    %cst_107 = arith.constant 0.000000e+00 : f32
    %439 = vector.broadcast %cst_107 : f32 to vector<8x96xf32>
    %440 = arith.cmpf oge, %436, %439 : vector<8x96xf32>
    %cst_108 = arith.constant 1.000000e-01 : f32
    %441 = vector.broadcast %cst_108 : f32 to vector<8x96xf32>
    %442 = arith.mulf %441, %436 : vector<8x96xf32>
    %443 = arith.select %440, %436, %442 : vector<8x96xi1>, vector<8x96xf32>
    %cst_109 = arith.constant 0.000000e+00 : f32
    %444 = vector.broadcast %cst_109 : f32 to vector<8x2xf32>
    %445 = vector.extract_strided_slice %443 {offsets = [0, 0], sizes = [8, 48], strides = [1, 1]} : vector<8x96xf32> to vector<8x48xf32>
    %446 = vector.extract_strided_slice %443 {offsets = [0, 48], sizes = [8, 48], strides = [1, 1]} : vector<8x96xf32> to vector<8x48xf32>
    %447 = tpu.concatenate %444, %445, %444, %444, %446, %444 in 1 : vector<8x2xf32>, vector<8x48xf32>, vector<8x2xf32>, vector<8x2xf32>, vector<8x48xf32>, vector<8x2xf32> -> vector<8x104xf32>
    %448 = vector.extract_strided_slice %447 {offsets = [0, 0], sizes = [8, 48], strides = [1, 1]} : vector<8x104xf32> to vector<8x48xf32>
    %449 = vector.extract_strided_slice %447 {offsets = [0, 52], sizes = [8, 48], strides = [1, 1]} : vector<8x104xf32> to vector<8x48xf32>
    %450 = tpu.concatenate %448, %449 in 1 : vector<8x48xf32>, vector<8x48xf32> -> vector<8x96xf32>
    %451 = vector.extract_strided_slice %447 {offsets = [0, 1], sizes = [8, 48], strides = [1, 1]} : vector<8x104xf32> to vector<8x48xf32>
    %452 = vector.extract_strided_slice %447 {offsets = [0, 53], sizes = [8, 48], strides = [1, 1]} : vector<8x104xf32> to vector<8x48xf32>
    %453 = tpu.concatenate %451, %452 in 1 : vector<8x48xf32>, vector<8x48xf32> -> vector<8x96xf32>
    %454 = vector.extract_strided_slice %447 {offsets = [0, 2], sizes = [8, 48], strides = [1, 1]} : vector<8x104xf32> to vector<8x48xf32>
    %455 = vector.extract_strided_slice %447 {offsets = [0, 54], sizes = [8, 48], strides = [1, 1]} : vector<8x104xf32> to vector<8x48xf32>
    %456 = tpu.concatenate %454, %455 in 1 : vector<8x48xf32>, vector<8x48xf32> -> vector<8x96xf32>
    %457 = vector.extract_strided_slice %447 {offsets = [0, 3], sizes = [8, 48], strides = [1, 1]} : vector<8x104xf32> to vector<8x48xf32>
    %458 = vector.extract_strided_slice %447 {offsets = [0, 55], sizes = [8, 48], strides = [1, 1]} : vector<8x104xf32> to vector<8x48xf32>
    %459 = tpu.concatenate %457, %458 in 1 : vector<8x48xf32>, vector<8x48xf32> -> vector<8x96xf32>
    %460 = vector.extract_strided_slice %447 {offsets = [0, 4], sizes = [8, 48], strides = [1, 1]} : vector<8x104xf32> to vector<8x48xf32>
    %461 = vector.extract_strided_slice %447 {offsets = [0, 56], sizes = [8, 48], strides = [1, 1]} : vector<8x104xf32> to vector<8x48xf32>
    %462 = tpu.concatenate %460, %461 in 1 : vector<8x48xf32>, vector<8x48xf32> -> vector<8x96xf32>
    %463 = tpu.concatenate %450, %453, %456, %459, %462 in 0 : vector<8x96xf32>, vector<8x96xf32>, vector<8x96xf32>, vector<8x96xf32>, vector<8x96xf32> -> vector<40x96xf32>
    %cst_110 = arith.constant dense<0.000000e+00> : vector<8x96xf32>
    %464 = tpu.matmul %437, %463, %cst_110 {dimension_numbers = #tpu.dot_dimension_numbers<[1], [0], [0], [1], [0, 0, 1, 1], [], []>} : vector<8x40xf32>, vector<40x96xf32>, vector<8x96xf32> -> vector<8x96xf32>
    %465 = vector.broadcast %438 : vector<8x1xf32> to vector<8x96xf32>
    %466 = arith.addf %464, %465 : vector<8x96xf32>
    %467 = arith.addf %308, %466 : vector<8x96xf32>
    %c0_111 = arith.constant 0 : index
    %c2176 = arith.constant 2176 : index
    %468 = vector.load %arg2[%c0_111, %c2176] : memref<16x2560xf32, #tpu.memory_space<vmem>>, vector<8x40xf32>
    %c0_112 = arith.constant 0 : index
    %c2216 = arith.constant 2216 : index
    %469 = vector.load %arg2[%c0_112, %c2216] : memref<16x2560xf32, #tpu.memory_space<vmem>>, vector<8x1xf32>
    %cst_113 = arith.constant 0.000000e+00 : f32
    %470 = vector.broadcast %cst_113 : f32 to vector<8x96xf32>
    %471 = arith.cmpf oge, %467, %470 : vector<8x96xf32>
    %cst_114 = arith.constant 1.000000e-01 : f32
    %472 = vector.broadcast %cst_114 : f32 to vector<8x96xf32>
    %473 = arith.mulf %472, %467 : vector<8x96xf32>
    %474 = arith.select %471, %467, %473 : vector<8x96xi1>, vector<8x96xf32>
    %cst_115 = arith.constant 0.000000e+00 : f32
    %475 = vector.broadcast %cst_115 : f32 to vector<8x6xf32>
    %476 = vector.extract_strided_slice %474 {offsets = [0, 0], sizes = [8, 48], strides = [1, 1]} : vector<8x96xf32> to vector<8x48xf32>
    %477 = vector.extract_strided_slice %474 {offsets = [0, 48], sizes = [8, 48], strides = [1, 1]} : vector<8x96xf32> to vector<8x48xf32>
    %478 = tpu.concatenate %475, %476, %475, %475, %477, %475 in 1 : vector<8x6xf32>, vector<8x48xf32>, vector<8x6xf32>, vector<8x6xf32>, vector<8x48xf32>, vector<8x6xf32> -> vector<8x120xf32>
    %479 = vector.extract_strided_slice %478 {offsets = [0, 0], sizes = [8, 48], strides = [1, 1]} : vector<8x120xf32> to vector<8x48xf32>
    %480 = vector.extract_strided_slice %478 {offsets = [0, 60], sizes = [8, 48], strides = [1, 1]} : vector<8x120xf32> to vector<8x48xf32>
    %481 = tpu.concatenate %479, %480 in 1 : vector<8x48xf32>, vector<8x48xf32> -> vector<8x96xf32>
    %482 = vector.extract_strided_slice %478 {offsets = [0, 3], sizes = [8, 48], strides = [1, 1]} : vector<8x120xf32> to vector<8x48xf32>
    %483 = vector.extract_strided_slice %478 {offsets = [0, 63], sizes = [8, 48], strides = [1, 1]} : vector<8x120xf32> to vector<8x48xf32>
    %484 = tpu.concatenate %482, %483 in 1 : vector<8x48xf32>, vector<8x48xf32> -> vector<8x96xf32>
    %485 = vector.extract_strided_slice %478 {offsets = [0, 6], sizes = [8, 48], strides = [1, 1]} : vector<8x120xf32> to vector<8x48xf32>
    %486 = vector.extract_strided_slice %478 {offsets = [0, 66], sizes = [8, 48], strides = [1, 1]} : vector<8x120xf32> to vector<8x48xf32>
    %487 = tpu.concatenate %485, %486 in 1 : vector<8x48xf32>, vector<8x48xf32> -> vector<8x96xf32>
    %488 = vector.extract_strided_slice %478 {offsets = [0, 9], sizes = [8, 48], strides = [1, 1]} : vector<8x120xf32> to vector<8x48xf32>
    %489 = vector.extract_strided_slice %478 {offsets = [0, 69], sizes = [8, 48], strides = [1, 1]} : vector<8x120xf32> to vector<8x48xf32>
    %490 = tpu.concatenate %488, %489 in 1 : vector<8x48xf32>, vector<8x48xf32> -> vector<8x96xf32>
    %491 = vector.extract_strided_slice %478 {offsets = [0, 12], sizes = [8, 48], strides = [1, 1]} : vector<8x120xf32> to vector<8x48xf32>
    %492 = vector.extract_strided_slice %478 {offsets = [0, 72], sizes = [8, 48], strides = [1, 1]} : vector<8x120xf32> to vector<8x48xf32>
    %493 = tpu.concatenate %491, %492 in 1 : vector<8x48xf32>, vector<8x48xf32> -> vector<8x96xf32>
    %494 = tpu.concatenate %481, %484, %487, %490, %493 in 0 : vector<8x96xf32>, vector<8x96xf32>, vector<8x96xf32>, vector<8x96xf32>, vector<8x96xf32> -> vector<40x96xf32>
    %cst_116 = arith.constant dense<0.000000e+00> : vector<8x96xf32>
    %495 = tpu.matmul %468, %494, %cst_116 {dimension_numbers = #tpu.dot_dimension_numbers<[1], [0], [0], [1], [0, 0, 1, 1], [], []>} : vector<8x40xf32>, vector<40x96xf32>, vector<8x96xf32> -> vector<8x96xf32>
    %496 = vector.broadcast %469 : vector<8x1xf32> to vector<8x96xf32>
    %497 = arith.addf %495, %496 : vector<8x96xf32>
    %c0_117 = arith.constant 0 : index
    %c2304 = arith.constant 2304 : index
    %498 = vector.load %arg2[%c0_117, %c2304] : memref<16x2560xf32, #tpu.memory_space<vmem>>, vector<8x40xf32>
    %c0_118 = arith.constant 0 : index
    %c2344 = arith.constant 2344 : index
    %499 = vector.load %arg2[%c0_118, %c2344] : memref<16x2560xf32, #tpu.memory_space<vmem>>, vector<8x1xf32>
    %cst_119 = arith.constant 0.000000e+00 : f32
    %500 = vector.broadcast %cst_119 : f32 to vector<8x96xf32>
    %501 = arith.cmpf oge, %497, %500 : vector<8x96xf32>
    %cst_120 = arith.constant 1.000000e-01 : f32
    %502 = vector.broadcast %cst_120 : f32 to vector<8x96xf32>
    %503 = arith.mulf %502, %497 : vector<8x96xf32>
    %504 = arith.select %501, %497, %503 : vector<8x96xi1>, vector<8x96xf32>
    %cst_121 = arith.constant 0.000000e+00 : f32
    %505 = vector.broadcast %cst_121 : f32 to vector<8x2xf32>
    %506 = vector.extract_strided_slice %504 {offsets = [0, 0], sizes = [8, 48], strides = [1, 1]} : vector<8x96xf32> to vector<8x48xf32>
    %507 = vector.extract_strided_slice %504 {offsets = [0, 48], sizes = [8, 48], strides = [1, 1]} : vector<8x96xf32> to vector<8x48xf32>
    %508 = tpu.concatenate %505, %506, %505, %505, %507, %505 in 1 : vector<8x2xf32>, vector<8x48xf32>, vector<8x2xf32>, vector<8x2xf32>, vector<8x48xf32>, vector<8x2xf32> -> vector<8x104xf32>
    %509 = vector.extract_strided_slice %508 {offsets = [0, 0], sizes = [8, 48], strides = [1, 1]} : vector<8x104xf32> to vector<8x48xf32>
    %510 = vector.extract_strided_slice %508 {offsets = [0, 52], sizes = [8, 48], strides = [1, 1]} : vector<8x104xf32> to vector<8x48xf32>
    %511 = tpu.concatenate %509, %510 in 1 : vector<8x48xf32>, vector<8x48xf32> -> vector<8x96xf32>
    %512 = vector.extract_strided_slice %508 {offsets = [0, 1], sizes = [8, 48], strides = [1, 1]} : vector<8x104xf32> to vector<8x48xf32>
    %513 = vector.extract_strided_slice %508 {offsets = [0, 53], sizes = [8, 48], strides = [1, 1]} : vector<8x104xf32> to vector<8x48xf32>
    %514 = tpu.concatenate %512, %513 in 1 : vector<8x48xf32>, vector<8x48xf32> -> vector<8x96xf32>
    %515 = vector.extract_strided_slice %508 {offsets = [0, 2], sizes = [8, 48], strides = [1, 1]} : vector<8x104xf32> to vector<8x48xf32>
    %516 = vector.extract_strided_slice %508 {offsets = [0, 54], sizes = [8, 48], strides = [1, 1]} : vector<8x104xf32> to vector<8x48xf32>
    %517 = tpu.concatenate %515, %516 in 1 : vector<8x48xf32>, vector<8x48xf32> -> vector<8x96xf32>
    %518 = vector.extract_strided_slice %508 {offsets = [0, 3], sizes = [8, 48], strides = [1, 1]} : vector<8x104xf32> to vector<8x48xf32>
    %519 = vector.extract_strided_slice %508 {offsets = [0, 55], sizes = [8, 48], strides = [1, 1]} : vector<8x104xf32> to vector<8x48xf32>
    %520 = tpu.concatenate %518, %519 in 1 : vector<8x48xf32>, vector<8x48xf32> -> vector<8x96xf32>
    %521 = vector.extract_strided_slice %508 {offsets = [0, 4], sizes = [8, 48], strides = [1, 1]} : vector<8x104xf32> to vector<8x48xf32>
    %522 = vector.extract_strided_slice %508 {offsets = [0, 56], sizes = [8, 48], strides = [1, 1]} : vector<8x104xf32> to vector<8x48xf32>
    %523 = tpu.concatenate %521, %522 in 1 : vector<8x48xf32>, vector<8x48xf32> -> vector<8x96xf32>
    %524 = tpu.concatenate %511, %514, %517, %520, %523 in 0 : vector<8x96xf32>, vector<8x96xf32>, vector<8x96xf32>, vector<8x96xf32>, vector<8x96xf32> -> vector<40x96xf32>
    %cst_122 = arith.constant dense<0.000000e+00> : vector<8x96xf32>
    %525 = tpu.matmul %498, %524, %cst_122 {dimension_numbers = #tpu.dot_dimension_numbers<[1], [0], [0], [1], [0, 0, 1, 1], [], []>} : vector<8x40xf32>, vector<40x96xf32>, vector<8x96xf32> -> vector<8x96xf32>
    %526 = vector.broadcast %499 : vector<8x1xf32> to vector<8x96xf32>
    %527 = arith.addf %525, %526 : vector<8x96xf32>
    %528 = arith.addf %467, %527 : vector<8x96xf32>
    %529 = arith.addf %406, %528 : vector<8x96xf32>
    %cst_123 = arith.constant 5.000000e-01 : f32
    %530 = vector.broadcast %cst_123 : f32 to vector<8x96xf32>
    %531 = arith.mulf %529, %530 : vector<8x96xf32>
    %cst_124 = arith.constant 0.000000e+00 : f32
    %532 = vector.broadcast %cst_124 : f32 to vector<8x96xf32>
    %533 = arith.cmpf oge, %531, %532 : vector<8x96xf32>
    %cst_125 = arith.constant 1.000000e-01 : f32
    %534 = vector.broadcast %cst_125 : f32 to vector<8x96xf32>
    %535 = arith.mulf %534, %531 : vector<8x96xf32>
    %536 = arith.select %533, %531, %535 : vector<8x96xi1>, vector<8x96xf32>
    %c0_126 = arith.constant 0 : index
    %c2432 = arith.constant 2432 : index
    %537 = vector.load %arg2[%c0_126, %c2432] : memref<16x2560xf32, #tpu.memory_space<vmem>>, vector<8x56xf32>
    %c0_127 = arith.constant 0 : index
    %c2488 = arith.constant 2488 : index
    %538 = vector.load %arg2[%c0_127, %c2488] : memref<16x2560xf32, #tpu.memory_space<vmem>>, vector<8x1xf32>
    %cst_128 = arith.constant 0.000000e+00 : f32
    %539 = vector.broadcast %cst_128 : f32 to vector<8x3xf32>
    %540 = vector.extract_strided_slice %536 {offsets = [0, 0], sizes = [8, 48], strides = [1, 1]} : vector<8x96xf32> to vector<8x48xf32>
    %541 = vector.extract_strided_slice %536 {offsets = [0, 48], sizes = [8, 48], strides = [1, 1]} : vector<8x96xf32> to vector<8x48xf32>
    %542 = tpu.concatenate %539, %540, %539, %539, %541, %539 in 1 : vector<8x3xf32>, vector<8x48xf32>, vector<8x3xf32>, vector<8x3xf32>, vector<8x48xf32>, vector<8x3xf32> -> vector<8x108xf32>
    %543 = vector.extract_strided_slice %542 {offsets = [0, 0], sizes = [8, 48], strides = [1, 1]} : vector<8x108xf32> to vector<8x48xf32>
    %544 = vector.extract_strided_slice %542 {offsets = [0, 54], sizes = [8, 48], strides = [1, 1]} : vector<8x108xf32> to vector<8x48xf32>
    %545 = tpu.concatenate %543, %544 in 1 : vector<8x48xf32>, vector<8x48xf32> -> vector<8x96xf32>
    %546 = vector.extract_strided_slice %542 {offsets = [0, 1], sizes = [8, 48], strides = [1, 1]} : vector<8x108xf32> to vector<8x48xf32>
    %547 = vector.extract_strided_slice %542 {offsets = [0, 55], sizes = [8, 48], strides = [1, 1]} : vector<8x108xf32> to vector<8x48xf32>
    %548 = tpu.concatenate %546, %547 in 1 : vector<8x48xf32>, vector<8x48xf32> -> vector<8x96xf32>
    %549 = vector.extract_strided_slice %542 {offsets = [0, 2], sizes = [8, 48], strides = [1, 1]} : vector<8x108xf32> to vector<8x48xf32>
    %550 = vector.extract_strided_slice %542 {offsets = [0, 56], sizes = [8, 48], strides = [1, 1]} : vector<8x108xf32> to vector<8x48xf32>
    %551 = tpu.concatenate %549, %550 in 1 : vector<8x48xf32>, vector<8x48xf32> -> vector<8x96xf32>
    %552 = vector.extract_strided_slice %542 {offsets = [0, 3], sizes = [8, 48], strides = [1, 1]} : vector<8x108xf32> to vector<8x48xf32>
    %553 = vector.extract_strided_slice %542 {offsets = [0, 57], sizes = [8, 48], strides = [1, 1]} : vector<8x108xf32> to vector<8x48xf32>
    %554 = tpu.concatenate %552, %553 in 1 : vector<8x48xf32>, vector<8x48xf32> -> vector<8x96xf32>
    %555 = vector.extract_strided_slice %542 {offsets = [0, 4], sizes = [8, 48], strides = [1, 1]} : vector<8x108xf32> to vector<8x48xf32>
    %556 = vector.extract_strided_slice %542 {offsets = [0, 58], sizes = [8, 48], strides = [1, 1]} : vector<8x108xf32> to vector<8x48xf32>
    %557 = tpu.concatenate %555, %556 in 1 : vector<8x48xf32>, vector<8x48xf32> -> vector<8x96xf32>
    %558 = vector.extract_strided_slice %542 {offsets = [0, 5], sizes = [8, 48], strides = [1, 1]} : vector<8x108xf32> to vector<8x48xf32>
    %559 = vector.extract_strided_slice %542 {offsets = [0, 59], sizes = [8, 48], strides = [1, 1]} : vector<8x108xf32> to vector<8x48xf32>
    %560 = tpu.concatenate %558, %559 in 1 : vector<8x48xf32>, vector<8x48xf32> -> vector<8x96xf32>
    %561 = vector.extract_strided_slice %542 {offsets = [0, 6], sizes = [8, 48], strides = [1, 1]} : vector<8x108xf32> to vector<8x48xf32>
    %562 = vector.extract_strided_slice %542 {offsets = [0, 60], sizes = [8, 48], strides = [1, 1]} : vector<8x108xf32> to vector<8x48xf32>
    %563 = tpu.concatenate %561, %562 in 1 : vector<8x48xf32>, vector<8x48xf32> -> vector<8x96xf32>
    %564 = tpu.concatenate %545, %548, %551, %554, %557, %560, %563 in 0 : vector<8x96xf32>, vector<8x96xf32>, vector<8x96xf32>, vector<8x96xf32>, vector<8x96xf32>, vector<8x96xf32>, vector<8x96xf32> -> vector<56x96xf32>
    %cst_129 = arith.constant dense<0.000000e+00> : vector<8x96xf32>
    %565 = tpu.matmul %537, %564, %cst_129 {dimension_numbers = #tpu.dot_dimension_numbers<[1], [0], [0], [1], [0, 0, 1, 1], [], []>} : vector<8x56xf32>, vector<56x96xf32>, vector<8x96xf32> -> vector<8x96xf32>
    %566 = vector.broadcast %538 : vector<8x1xf32> to vector<8x96xf32>
    %567 = arith.addf %565, %566 : vector<8x96xf32>
    %568 = math.tanh %567 : vector<8x96xf32>
    %cst_130 = arith.constant 0.000000e+00 : f32
    %569 = vector.broadcast %cst_130 : f32 to vector<8x32xf32>
    %570 = tpu.concatenate %568, %569 in 1 : vector<8x96xf32>, vector<8x32xf32> -> vector<8x128xf32>
    %c0_131 = arith.constant 0 : index
    %c0_132 = arith.constant 0 : index
    %571 = vector.load %arg4[%c0_131, %c0_132] : memref<8x128xf32, #tpu.memory_space<vmem>>, vector<8x128xf32>
    tpu.vector_store %arg4[%c0_131, %c0_132], %570 {strides = array<i32>} : memref<8x128xf32, #tpu.memory_space<vmem>>, vector<8x128xf32>,
    return
  }
  func.func @transform_0(%arg0: i32) -> (i32, i32) {
    %c0_i32 = arith.constant 0 : i32
    %c0_i32_0 = arith.constant 0 : i32
    %c0_i32_1 = arith.constant 0 : i32
    return %c0_i32, %c0_i32_0 : i32, i32
  }
  func.func @transform_1(%arg0: i32) -> (i32, i32) {
    %c0_i32 = arith.constant 0 : i32
    %c0_i32_0 = arith.constant 0 : i32
    %c0_i32_1 = arith.constant 0 : i32
    return %c0_i32, %c0_i32_0 : i32, i32
  }
  func.func @transform_2(%arg0: i32) -> (i32, i32) {
    %c0_i32 = arith.constant 0 : i32
    %c0_i32_0 = arith.constant 0 : i32
    %c0_i32_1 = arith.constant 0 : i32
    return %c0_i32, %c0_i32_0 : i32, i32
  }
  func.func @transform_3(%arg0: i32) -> (i32, i32) {
    %c0_i32 = arith.constant 0 : i32
    %c0_i32_0 = arith.constant 0 : i32
    %c0_i32_1 = arith.constant 0 : i32
    return %c0_i32, %c0_i32_0 : i32, i32
  }
}

</mosaic_0001>

<bundles_post_ra>
// kernel: squeeze.1
= control target key start
LH: loop header
LB: loop body
LE: loop exit
PB: predicated region body
PF: predicated region fallthrough
CT: control target
= control target key end

     0   :  { %s80_s0 = inlined_call_operand.vmem [shape: f32[96], index: 0, kind: input, shape index: {}]   ;;  %s81_s1 = inlined_call_operand.hbm [shape: f32[2,48], index: 1, kind: output, shape index: {}]  }
   0x1   :  { %v5_v0 = vld [vmem:[%s80_s0] sm:$0x1] }
   0x2   :  { %2 = vsyncpa [#allocation1], 0  ;;  %6 = vst [vmem:[#allocation3] sm:$0x1] %v5_v0  ;;  %vm8_vm0 = vcmask 392192   ;;  %s62_s0 = smov 80  }
   0x3   :  { %s63_s8 = smov [#allocation0]   ;;  %s27_s1 = sshll.u32 %s81_s1, 4  ;;  %s28_s1 = int_to_ptr.hbm [resolvable:$true] %s27_s1 }
   0x4   :  { %s25_s9 = sshll.u32 %s63_s8, 4  ;;  %s26_s9 = int_to_ptr.vmem [resolvable:$true] %s25_s9 }
   0x9   :  { %v10_v1 = vld [vmem:[#allocation3] sm:$0x1]  }
   0xa   :  { %v7_v2 = vld [vmem:[#allocation3] sm:$0x1]   ;;  %11 = vrot.lane.b32.xlu0 %v10_v1, %s62_s0 }
   0xb   :  { %9 = vst.msk [vmem:[#allocation2] sm:$0x1] %vm8_vm0, %v7_v2  }
  0x7c   :  { %v12_v3 = vpop.permute.xlu0 %11  }
  0x7d   :  { %15 = vst.msk [vmem:[#allocation2 + $0x1] sm:$0x1] %vm8_vm0, %v12_v3  }
  0x84   :  { %v18_v4 = vld [vmem:[#allocation2] sm:$0x3] }
  0x85   :  { %21 = vst [vmem:[#allocation0] sm:$0x3] %v18_v4 }
  0x86   :  { %30 = dma.vmem_to_hbm [thread:$0]  %s26_s9, 32, %s28_s1, [#allocation1]  }
  0x87   :  { %60 = dma.done.wait [#allocation1], 32  }
  0x88   :  { %61 = vsyncadd [#allocation1], 4294967264 }
  0x89   :  { %33 = vsyncpa [#allocation1], 1 }

// kernel: generator_forward.1
= control target key start
LH: loop header
LB: loop body
LE: loop exit
PB: predicated region body
PF: predicated region fallthrough
CT: control target
= control target key end

     0   :  { %8 = vsyncpa [#allocation3], 0  ;;  %s2488_s0 = inlined_call_operand.vmem [shape: f32[8,24], index: 0, kind: input, shape index: {}]   ;;  %s2489_s1 = inlined_call_operand.hbm [shape: f32[16,2560], index: 1, kind: input, shape index: {}]   ;;  %s2490_s2 = inlined_call_operand.hbm [shape: f32[48,288], index: 2, kind: input, shape index: {}]   ;;  %s2491_s3 = inlined_call_operand.vmem [shape: f32[8,128], index: 3, kind: output, shape index: {}]  }
   0x1   :  { %s16_s14 = sshll.u32 %s2489_s1, 4  ;;  %s17_s14 = int_to_ptr.hbm [resolvable:$true] %s16_s14 }
   0x2   :  { %9 = vsyncpa [#allocation5], 0  ;;  %s1991_s15 = smov [#allocation2]   ;;  %s29_s19 = sshll.u32 %s2490_s2, 4  ;;  %s30_s19 = int_to_ptr.hbm [resolvable:$true] %s29_s19 }
   0x3   :  { %s18_s16 = sshll.u32 %s1991_s15, 4  ;;  %s1992_s20 = smov 2560   ;;  %s19_s16 = int_to_ptr.vmem [resolvable:$true] %s18_s16 }
   0x4   :  { %s1993_s21 = smov 160   ;;  %s1994_s22 = smov [#allocation4]  }
   0x5   :  { %24 = dma.hbm_to_vmem [thread:$0]  %s17_s14, 5120, %s19_s16, [#allocation3], %s1992_s20, %s1992_s20, %s1993_s21  }
   0x6   :  { %s31_s23 = sshll.u32 %s1994_s22, 4  ;;  %s1995_s24 = smov 384   ;;  %s32_s23 = int_to_ptr.vmem [resolvable:$true] %s31_s23 }
   0x7   :  { %s1996_s25 = smov 24  }
   0x8   :  { %37 = dma.hbm_to_vmem [thread:$0]  %s30_s19, 2304, %s32_s23, [#allocation5], %s1995_s24, %s1995_s24, %s1996_s25  }
   0x9   :  { %1987 = dma.done.wait [#allocation3], 5120  }
   0xa   :  { %1988 = vsyncadd [#allocation3], 4294962176 }
   0xb   :  { %1989 = dma.done.wait [#allocation5], 2304  }
   0xc   :  { %1990 = vsyncadd [#allocation5], 4294964992  ;;  %v46_v0 = vld [vmem:[%s2488_s0] sm:$0xff]  ;;  %s1997_s27 = smov 3   ;;  %s1998_s2 = smov 9   ;;  %vm2502_vm0 = vcmask 23552  }
   0xd   :  { %50 = vrot.lane.b32.xlu0 %v46_v0, %s1997_s27  ;;  %vm58_vm1 = vcmask 121856   ;;  %vm60_vm2 = vcmask 146432   ;;  %vm62_vm3 = vcmask 171008   ;;  %vm64_vm4 = vcmask 269312   ;;  %s1999_s0 = smov 124   ;;  %s2000_s28 = smov 123  }
   0xe   :  { %s2001_s29 = smov 122   ;;  %s2002_s30 = smov 119   ;;  %vm70_vm5 = vcmask 97280   ;;  %v47_v16 = vld [vmem:[#allocation2] sm:$0xff]  ;;  %v2011_v18 = vmov 56   ;;  %vm2492_vm6 = vcmask 457728  }
   0xf   :  { %s2003_s4 = smov 117   ;;  %s2004_s5 = smov 116   ;;  %v48_v17 = vld [vmem:[#allocation2 + $0xa0] sm:$0xff]  ;;  %1738 = vset.pattern.permute.xlu0 %v2011_v18  ;;  %1737 = vset.pattern.permute.xlu2 %v2011_v18  ;;  %v2087_v42 = vld [vmem:[#allocation4 + $0x18] sm:$0xff]  ;;  %v2089_v43 = vld [vmem:[#allocation4 + $0x30] sm:$0xff]  ;;  %vm182_vm9 = vcmask 89088  }
  0x10   :  { %s2005_s6 = smov 127   ;;  %s2006_s7 = smov 125   ;;  %v2085_v41 = vld [vmem:[#allocation4] sm:$0xff]  ;;  %v1744_v45 = vpack.i.bf16 %v2087_v42, %v2089_v43  ;;  %vm2494_vm10 = vcmask 187392   ;;  %vm168_vm11 = vcmask 7168   ;;  %vm173_vm12 = vcmask 105472  }
  0x11   :  { %s2007_s8 = smov 118   ;;  %s2008_s9 = smov 120   ;;  %v155_v60 = vld [vmem:[#allocation2 + $0x8] sm:$0xff]  ;;  %vm2493_vm13 = vcmask 392192   ;;  %vm232_vm14 = vcmask 195584  }
  0x12   :  { %s2009_s10 = smov 126   ;;  %s2010_s11 = smov 121   ;;  %v156_v61 = vld [vmem:[#allocation2 + $0xa8] sm:$0xff] }
  0x13   :  { %s2012_s12 = smov 1   ;;  %s2013_s13 = smov 80  }
  0x14   :  { %s2015_s14 = smov 2   ;;  %s2016_s15 = smov 6  }
  0x15   :  { %53 = vrot.lane.b32.xlu0 %v46_v0, %s1998_s2  ;;  %s2019_s16 = smov 18   ;;  %s2020_s17 = smov 107  }
  0x16   :  { %s2021_s18 = smov 104   ;;  %s2022_s19 = smov 113  }
  0x17   :  { %s2023_s20 = smov 110   ;;  %s2024_s21 = smov 32  }
  0x18   :  { %s2025_s22 = smov 64  }
  0x7f   :  { %v51_v1 = vpop.permute.xlu0 %50 }
  0x80   :  { %v57_v2 = vsel %vm2502_vm0, 0.0, %v51_v1 }
  0x81   :  { %v59_v3 = vsel %vm58_vm1, %v57_v2, 0.0  ;;  %v2014_v2 = vmov 48   ;;  %vm296_vm1 = vcmask 203776  }
  0x82   :  { %v61_v4 = vsel %vm60_vm2, %v59_v3, 0.0  ;;  %1749 = vset.pattern.permute.xlu1 %v2014_v2  ;;  %vm298_vm2 = vcmask 211968  }
  0x87   :  { %v54_v5 = vpop.permute.xlu0 %53 }
  0x88   :  { %v63_v6 = vsel %vm62_vm3, %v61_v4, %v54_v5  ;;  %vm535_vm3 = vcmask 15360  }
  0x89   :  { %v65_v7 = vsel %vm64_vm4, %v63_v6, 0.0 }
  0x8a   :  { %93 = vrot.lane.b32.xlu0 %v65_v7, %s1999_s0  ;;  %100 = vrot.lane.b32.xlu2 %v65_v7, %s2000_s28 }
  0x8b   :  { %67 = vrot.lane.b32.xlu1 %v65_v7, %s2001_s29 }
  0x92   :  { %89 = vrot.lane.b32.xlu0 %v65_v7, %s2002_s30  ;;  %103 = vrot.lane.b32.xlu2 %v65_v7, %s2003_s4 }
  0x93   :  { %107 = vrot.lane.b32.xlu1 %v65_v7, %s2004_s5 }
  0x9a   :  { %72 = vrot.lane.b32.xlu0 %v65_v7, %s2005_s6  ;;  %86 = vrot.lane.b32.xlu2 %v65_v7, %s2006_s7 }
  0x9b   :  { %96 = vrot.lane.b32.xlu1 %v65_v7, %s2007_s8 }
  0xa2   :  { %82 = vrot.lane.b32.xlu2 %v65_v7, %s2008_s9  ;;  %113 = vperm.xlu0 %1738, %v47_v16  }
  0xa3   :  { %79 = vrot.lane.b32.xlu1 %v65_v7, %s2009_s10 }
  0xaa   :  { %118 = vperm.xlu2 %1737, %v48_v17   ;;  %223 = vrot.lane.b32.xlu0 %v2085_v41, %s2013_s13 }
  0xab   :  { %75 = vrot.lane.b32.xlu1 %v65_v7, %s2010_s11 }
  0xe4   :  { %v101_v8 = vpop.permute.xlu2 %100 }
  0xec   :  { %v104_v10 = vpop.permute.xlu2 %103 }
  0xed   :  { %v106_v14 = vsel %vm70_vm5, %v101_v8, %v104_v10 }
  0xf4   :  { %v87_v15 = vpop.permute.xlu2 %86 }
  0xfc   :  { %v94_v11 = vpop.permute.xlu0 %93  ;;  %v83_v23 = vpop.permute.xlu2 %82 }
  0xfd   :  { %v68_v9 = vpop.permute.xlu1 %67 }
  0xfe   :  { %v71_v29 = vsel %vm70_vm5, %v65_v7, %v68_v9 }
 0x104   :  { %v90_v19 = vpop.permute.xlu0 %89  ;;  %v119_v35 = vpop.permute.xlu2 %118 }
 0x105   :  { %v108_v12 = vpop.permute.xlu1 %107  ;;  %v92_v22 = vsel %vm70_vm5, %v87_v15, %v90_v19 }
 0x106   :  { %v110_v13 = vsel %vm70_vm5, %v68_v9, %v108_v12 }
 0x107   :  { %135 = vmatpush.msra.mxu0 %v110_v13 }
 0x109   :  { %136 = vmatpush.msra.mxu0 %v106_v14 }
 0x10c   :  { %v73_v26 = vpop.permute.xlu0 %72 }
 0x10d   :  { %v97_v20 = vpop.permute.xlu1 %96 }
 0x10e   :  { %v99_v21 = vsel %vm70_vm5, %v94_v11, %v97_v20 }
 0x10f   :  { %137 = vmatpush.msra.mxu0 %v99_v21 }
 0x111   :  { %138 = vmatpush.msra.mxu0 %v92_v22 }
 0x114   :  { %v114_v30 = vpop.permute.xlu0 %113 }
 0x115   :  { %v80_v24 = vpop.permute.xlu1 %79 }
 0x116   :  { %v85_v25 = vsel %vm70_vm5, %v80_v24, %v83_v23 }
 0x117   :  { %139 = vmatpush.msra.mxu0 %v85_v25 }
 0x11c   :  { %v224_v1 = vpop.permute.xlu0 %223 }
 0x11d   :  { %v76_v27 = vpop.permute.xlu1 %75 }
 0x11e   :  { %v78_v28 = vsel %vm70_vm5, %v73_v26, %v76_v27 }
 0x11f   :  { %140 = vmatpush.msra.mxu0 %v78_v28  ;;  %v284_v28 = vld [vmem:[#allocation2 + $0x10] sm:$0xff] }
 0x121   :  { %141 = vmatpush.msra.mxu0 %v71_v29  ;;  %v528_v29 = vld [vmem:[#allocation2 + $0x30] sm:$0xff] }
 0x122   :  { %1672 = vmatmul.msk.f32.vlgmr.msra.gmra.mxu0 %vm2492_vm6, %v47_v16 }
 0x12a   :  { %1673 = vmatmul.msk.f32.gmra.mxu0 %vm2492_vm6, %v48_v17 }
 0x19f   :  { %v143_v31 = vpop.f32.mrf.mxu0 }
 0x1a0   :  { %v144_v32 = vadd.f32 %v143_v31, %v114_v30  ;;  %v2017_v30 = vmov 24   ;;  %v2018_v31 = vmov 40  }
 0x1a1   :  { %1761 = vset.pattern.permute.xlu2 %v2018_v31  ;;  %1773 = vset.pattern.permute.xlu0 %v2018_v31 }
 0x1a2   :  { %v151_v33 = vmul.f32 0.1, %v144_v32  ;;  %vm149_vm7 = vcmp.ge.f32.partialorder %v144_v32, 0.0 }
 0x1a4   :  { %v153_v34 = vsel %vm149_vm7, %v144_v32, %v151_v33  ;;  %vm302_vm7 = vcmask 416768  }
 0x1a5   :  { %176 = vrot.lane.b32.xlu2 %v153_v34, %s2005_s6 }
 0x1a7   :  { %v146_v36 = vpop.f32.mrf.mxu0 }
 0x1a8   :  { %v147_v37 = vadd.f32 %v146_v36, %v119_v35 }
 0x1aa   :  { %v152_v38 = vmul.f32 0.1, %v147_v37  ;;  %vm150_vm8 = vcmp.ge.f32.partialorder %v147_v37, 0.0 }
 0x1ac   :  { %v154_v39 = vsel %vm150_vm8, %v147_v37, %v152_v38  ;;  %vm2496_vm8 = vcmask 228352  }
 0x1ad   :  { %178 = vrot.lane.b32.xlu1 %v154_v39, %s2005_s6  ;;  %v1739_v40 = vpack.i.bf16 %v153_v34, %v154_v39  ;;  %1745 = vrot.lane.b32.xlu2 %v1744_v45, %s2013_s13 }
 0x1b5   :  { %1740 = vrot.lane.b32.xlu1 %v1739_v40, %s2012_s12 }
 0x1bd   :  { %280 = vperm.xlu1 %1749, %v155_v60  }
 0x1c5   :  { %1760 = vset.pattern.permute.xlu1 %v2017_v30 }
 0x1ff   :  { %v177_v44 = vpop.permute.xlu2 %176 }
 0x200   :  { %v183_v47 = vsel %vm182_vm9, %v177_v44, 0.0 }
 0x201   :  { %v185_v50 = vsel %vm70_vm5, %v183_v47, %v177_v44 }
 0x207   :  { %v1746_v62 = vpop.permute.xlu2 %1745 }
 0x208   :  { %v1747_v63 = vunpack.i.l.bf16 %v1746_v62  ;;  %v1748_v0 = vunpack.i.h.bf16 %v1746_v62 }
 0x20a   :  { %249 = vmatpush.msra.mxu3 %v1747_v63 }
 0x20c   :  { %250 = vmatpush.msra.mxu3 %v1748_v0 }
 0x20e   :  { %251 = vmatpush.msra.mxu3 %v224_v1 }
 0x210   :  { %272 = vmatpush.msrb.mxu3 %v2089_v43 }
 0x212   :  { %273 = vmatpush.msrb.mxu3 %v2087_v42 }
 0x214   :  { %274 = vmatpush.msrb.mxu3 %v2085_v41 }
 0x21f   :  { %v179_v46 = vpop.permute.xlu1 %178 }
 0x220   :  { %v184_v48 = vsel %vm182_vm9, %v179_v46, 0.0  ;;  %vm420_vm9 = vcmask 244736  }
 0x221   :  { %v186_v49 = vsel %vm70_vm5, %v184_v48, %v179_v46 }
 0x222   :  { %1674 = vmatpush.msk.msra.mxu1 %vm2494_vm10, %v186_v49 }
 0x224   :  { %1675 = vmatpush.msk.msra.mxu1 %vm2494_vm10, %v185_v50  ;;  %vm689_vm10 = vcmask 293888  }
 0x227   :  { %v1741_v51 = vpop.permute.xlu1 %1740 }
 0x228   :  { %v1743_v52 = vunpack.i.h.bf16 %v1741_v51  ;;  %v1742_v53 = vunpack.i.l.bf16 %v1741_v51 }
 0x22a   :  { %v170_v54 = vsel %vm168_vm11, 0.0, %v1742_v53  ;;  %v169_v55 = vsel %vm168_vm11, 0.0, %v1743_v52 }
 0x22b   :  { %v172_v56 = vsel %vm70_vm5, %v170_v54, 0.0  ;;  %v171_v57 = vsel %vm70_vm5, %v169_v55, 0.0  ;;  %vm300_vm5 = vcmask 220160  }
 0x22c   :  { %v175_v58 = vsel %vm173_vm12, %v172_v56, %v1742_v53  ;;  %v174_v59 = vsel %vm173_vm12, %v171_v57, %v1743_v52  ;;  %vm2495_vm12 = vcmask 441344  }
 0x22d   :  { %209 = vmatpush.msra.mxu1 %v175_v58 }
 0x22f   :  { %210 = vmatpush.msra.mxu1 %v174_v59  ;;  %v281_v7 = vpop.permute.xlu1 %280 }
 0x231   :  { %211 = vmatpush.msra.mxu1 %v154_v39 }
 0x233   :  { %212 = vmatpush.msra.mxu1 %v153_v34 }
 0x234   :  { %1676 = vmatmul.msk.f32.vlgmr.msra.gmra.mxu1 %vm2493_vm13, %v155_v60 }
 0x23c   :  { %1677 = vmatmul.msk.f32.gmra.mxu1 %vm2493_vm13, %v156_v61 }
 0x2b1   :  { %v214_v3 = vpop.f32.mrf.mxu1 }
 0x2b9   :  { %v217_v4 = vpop.f32.mrf.mxu1 }
 0x2ba   :  { %1678 = vmatmul.msk.f32.vlgmr.msra.gmra.mxu3 %vm232_vm14, %v217_v4 }
 0x2c2   :  { %1679 = vmatmul.msk.f32.vlgmr.msrb.gmra.mxu3 %vm232_vm14, %v214_v3 }
 0x33d   :  { %v253_v5 = vpop.f32.mrf.mxu3 }
 0x345   :  { %v276_v6 = vpop.f32.mrf.mxu3 }
 0x346   :  { %v277_v8 = vadd.f32 %v276_v6, %v253_v5 }
 0x348   :  { %v2109_v9 = vadd.f32 %v281_v7, %v277_v8 }
 0x34a   :  { %vm285_vm15 = vcmp.ge.f32.partialorder %v2109_v9, 0.0  ;;  %v286_v10 = vmul.f32 0.1, %v2109_v9 }
 0x34c   :  { %v287_v11 = vsel %vm285_vm15, %v2109_v9, %v286_v10  ;;  %vm578_vm15 = vcmask 326656  }
 0x34d   :  { %529 = vrot.lane.b32.xlu1 %v287_v11, %s2015_s14  ;;  %292 = vrot.lane.b32.xlu0 %v287_v11, %s1997_s27 }
 0x34e   :  { %289 = vrot.lane.b32.xlu2 %v287_v11, %s2012_s12 }
 0x356   :  { %532 = vrot.lane.b32.xlu2 %v287_v11, %s2016_s15 }
 0x3a8   :  { %v290_v12 = vpop.permute.xlu2 %289 }
 0x3a9   :  { %v295_v13 = vsel %vm168_vm11, 0.0, %v290_v12 }
 0x3aa   :  { %v297_v14 = vsel %vm296_vm1, %v295_v13, 0.0 }
 0x3ab   :  { %v299_v15 = vsel %vm298_vm2, %v297_v14, 0.0 }
 0x3b0   :  { %v533_v23 = vpop.permute.xlu2 %532 }
 0x3bf   :  { %v530_v16 = vpop.permute.xlu1 %529  ;;  %v293_v17 = vpop.permute.xlu0 %292 }
 0x3c0   :  { %v536_v19 = vsel %vm535_vm3, 0.0, %v530_v16  ;;  %v301_v20 = vsel %vm300_vm5, %v299_v15, %v293_v17 }
 0x3c1   :  { %v537_v21 = vsel %vm298_vm2, %v536_v19, 0.0  ;;  %v303_v22 = vsel %vm302_vm7, %v301_v20, 0.0  ;;  %v347_v20 = vld [vmem:[#allocation2 + $0x18] sm:$0xff] }
 0x3c2   :  { %v539_v24 = vsel %vm2496_vm8, %v537_v21, 0.0  ;;  %309 = vrot.lane.b32.xlu2 %v303_v22, %s2005_s6  ;;  %305 = vrot.lane.b32.xlu0 %v303_v22, %s2009_s10 }
 0x3c3   :  { %v540_v25 = vsel %vm420_vm9, %v539_v24, %v533_v23 }
 0x3c4   :  { %v542_v26 = vsel %vm2495_vm12, %v540_v25, 0.0  ;;  %v601_v25 = vld [vmem:[#allocation2 + $0x38] sm:$0xff] }
 0x3c5   :  { %v1750_v27 = vpack.i.bf16 %v542_v26, %v303_v22 }
 0x3c7   :  { %1751 = vrot.lane.b32.xlu1 %v1750_v27, %s1999_s0 }
 0x3ca   :  { %565 = vrot.lane.b32.xlu2 %v542_v26, %s2010_s11  ;;  %1756 = vrot.lane.b32.xlu0 %v1750_v27, %s2006_s7 }
 0x3cf   :  { %569 = vrot.lane.b32.xlu1 %v542_v26, %s2008_s9 }
 0x3d2   :  { %548 = vrot.lane.b32.xlu2 %v542_v26, %s2005_s6  ;;  %555 = vrot.lane.b32.xlu0 %v542_v26, %s2009_s10 }
 0x3d7   :  { %558 = vrot.lane.b32.xlu1 %v542_v26, %s2001_s29 }
 0x3da   :  { %551 = vrot.lane.b32.xlu0 %v542_v26, %s2000_s28  ;;  %575 = vperm.xlu2 %1761, %v528_v29  }
 0x3df   :  { %322 = vperm.xlu1 %1760, %v284_v28  }
 0x3e2   :  { %1772 = vset.pattern.permute.xlu2 %v2017_v30 }
 0x3e7   :  { %1790 = vset.pattern.permute.xlu1 %v2018_v31 }
 0x41c   :  { %v310_v33 = vpop.permute.xlu2 %309 }
 0x424   :  { %v566_v47 = vpop.permute.xlu2 %565 }
 0x42c   :  { %v549_v53 = vpop.permute.xlu2 %548 }
 0x434   :  { %v306_v32 = vpop.permute.xlu0 %305  ;;  %v576_v62 = vpop.permute.xlu2 %575 }
 0x435   :  { %v308_v46 = vsel %vm232_vm14, %v303_v22, %v306_v32 }
 0x439   :  { %v1752_v34 = vpop.permute.xlu1 %1751 }
 0x43a   :  { %v1753_v35 = vunpack.i.l.bf16 %v1752_v34  ;;  %v1754_v40 = vunpack.i.h.bf16 %v1752_v34 }
 0x43c   :  { %v1757_v36 = vpop.permute.xlu0 %1756  ;;  %v319_v37 = vsel %vm232_vm14, %v306_v32, %v1753_v35  ;;  %v547_v56 = vsel %vm232_vm14, %v542_v26, %v1754_v40 }
 0x43d   :  { %v1758_v38 = vunpack.i.l.bf16 %v1757_v36  ;;  %340 = vmatpush.msra.mxu2 %v319_v37  ;;  %v1759_v44 = vunpack.i.h.bf16 %v1757_v36 }
 0x43f   :  { %v315_v39 = vsel %vm232_vm14, %v310_v33, %v1758_v38  ;;  %v568_v50 = vsel %vm232_vm14, %v1759_v44, %v566_v47 }
 0x440   :  { %341 = vmatpush.msra.mxu2 %v315_v39 }
 0x441   :  { %v570_v45 = vpop.permute.xlu1 %569 }
 0x442   :  { %342 = vmatpush.msra.mxu2 %v308_v46  ;;  %v572_v48 = vsel %vm232_vm14, %v1754_v40, %v570_v45 }
 0x443   :  { %1680 = vmatmul.msk.f32.vlgmr.msra.gmra.mxu2 %vm232_vm14, %v284_v28  ;;  %592 = vmatpush.msrb.mxu1 %v572_v48 }
 0x444   :  { %v556_v49 = vpop.permute.xlu0 %555 }
 0x445   :  { %593 = vmatpush.msrb.mxu1 %v568_v50 }
 0x449   :  { %v559_v51 = vpop.permute.xlu1 %558 }
 0x44a   :  { %v561_v52 = vsel %vm232_vm14, %v556_v49, %v559_v51 }
 0x44b   :  { %594 = vmatpush.msrb.mxu1 %v561_v52 }
 0x44c   :  { %v552_v54 = vpop.permute.xlu0 %551 }
 0x44d   :  { %v554_v55 = vsel %vm232_vm14, %v549_v53, %v552_v54 }
 0x44e   :  { %595 = vmatpush.msrb.mxu1 %v554_v55 }
 0x450   :  { %596 = vmatpush.msrb.mxu1 %v547_v56 }
 0x451   :  { %1684 = vmatmul.msk.f32.vlgmr.msrb.gmra.mxu1 %vm578_vm15, %v528_v29  ;;  %v323_v57 = vpop.permute.xlu1 %322 }
 0x4c6   :  { %v344_v58 = vpop.f32.mrf.mxu2 }
 0x4c7   :  { %v345_v59 = vadd.f32 %v344_v58, %v323_v57 }
 0x4c9   :  { %v349_v60 = vmul.f32 0.1, %v345_v59  ;;  %vm348_vm6 = vcmp.ge.f32.partialorder %v345_v59, 0.0 }
 0x4cb   :  { %v350_v61 = vsel %vm348_vm6, %v345_v59, %v349_v60 }
 0x4cc   :  { %355 = vrot.lane.b32.xlu1 %v350_v61, %s1997_s27  ;;  %352 = vrot.lane.b32.xlu0 %v350_v61, %s2012_s12 }
 0x4ce   :  { %v598_v63 = vpop.f32.mrf.mxu1 }
 0x4cf   :  { %v599_v0 = vadd.f32 %v598_v63, %v576_v62 }
 0x4d1   :  { %v603_v1 = vmul.f32 0.1, %v599_v0  ;;  %vm602_vm13 = vcmp.ge.f32.partialorder %v599_v0, 0.0 }
 0x4d3   :  { %v604_v2 = vsel %vm602_vm13, %v599_v0, %v603_v1 }
 0x4d4   :  { %609 = vrot.lane.b32.xlu0 %v604_v2, %s2016_s15  ;;  %606 = vrot.lane.b32.xlu2 %v604_v2, %s2015_s14 }
 0x52e   :  { %v607_v3 = vpop.permute.xlu2 %606 }
 0x52f   :  { %v612_v6 = vsel %vm535_vm3, 0.0, %v607_v3 }
 0x530   :  { %v613_v12 = vsel %vm298_vm2, %v612_v6, 0.0 }
 0x531   :  { %v614_v14 = vsel %vm2496_vm8, %v613_v12, 0.0  ;;  %vm2497_vm8 = vcmask 539648   ;;  %v407_v12 = vld [vmem:[#allocation2 + $0x20] sm:$0xff] }
 0x53e   :  { %v353_v4 = vpop.permute.xlu0 %352  ;;  %v356_v8 = vpop.permute.xlu1 %355 }
 0x53f   :  { %v358_v5 = vsel %vm168_vm11, 0.0, %v353_v4 }
 0x540   :  { %v359_v7 = vsel %vm296_vm1, %v358_v5, 0.0 }
 0x541   :  { %v360_v10 = vsel %vm298_vm2, %v359_v7, 0.0 }
 0x542   :  { %v361_v11 = vsel %vm300_vm5, %v360_v10, %v356_v8 }
 0x543   :  { %v362_v13 = vsel %vm302_vm7, %v361_v11, 0.0 }
 0x544   :  { %364 = vrot.lane.b32.xlu1 %v362_v13, %s2009_s10  ;;  %368 = vrot.lane.b32.xlu0 %v362_v13, %s2005_s6 }
 0x546   :  { %v610_v15 = vpop.permute.xlu0 %609 }
 0x547   :  { %v615_v16 = vsel %vm420_vm9, %v614_v14, %v610_v15 }
 0x548   :  { %v616_v17 = vsel %vm2495_vm12, %v615_v16, 0.0  ;;  %vm691_vm12 = vcmask 343040  }
 0x549   :  { %v1762_v19 = vpack.i.bf16 %v616_v17, %v362_v13 }
 0x54b   :  { %1763 = vrot.lane.b32.xlu2 %v1762_v19, %s1999_s0 }
 0x54c   :  { %1768 = vrot.lane.b32.xlu1 %v1762_v19, %s2006_s7  ;;  %639 = vrot.lane.b32.xlu0 %v616_v17, %s2010_s11 }
 0x553   :  { %643 = vrot.lane.b32.xlu2 %v616_v17, %s2008_s9 }
 0x554   :  { %629 = vrot.lane.b32.xlu1 %v616_v17, %s2009_s10  ;;  %622 = vrot.lane.b32.xlu0 %v616_v17, %s2005_s6 }
 0x55b   :  { %632 = vrot.lane.b32.xlu2 %v616_v17, %s2001_s29 }
 0x55c   :  { %625 = vrot.lane.b32.xlu1 %v616_v17, %s2000_s28  ;;  %649 = vperm.xlu0 %1773, %v601_v25  }
 0x563   :  { %381 = vperm.xlu2 %1772, %v347_v20  }
 0x564   :  { %1789 = vset.pattern.permute.xlu0 %v2017_v30 }
 0x56b   :  { %1807 = vset.pattern.permute.xlu2 %v2018_v31 }
 0x5a5   :  { %v1764_v21 = vpop.permute.xlu2 %1763 }
 0x5a6   :  { %v1766_v22 = vunpack.i.h.bf16 %v1764_v21  ;;  %v1765_v26 = vunpack.i.l.bf16 %v1764_v21 }
 0x5a8   :  { %v621_v48 = vsel %vm232_vm14, %v616_v17, %v1766_v22 }
 0x5ad   :  { %v644_v23 = vpop.permute.xlu2 %643 }
 0x5ae   :  { %v646_v24 = vsel %vm232_vm14, %v1766_v22, %v644_v23 }
 0x5af   :  { %665 = vmatpush.msrb.mxu0 %v646_v24 }
 0x5b5   :  { %v633_v39 = vpop.permute.xlu2 %632 }
 0x5b6   :  { %v365_v27 = vpop.permute.xlu1 %364  ;;  %v369_v28 = vpop.permute.xlu0 %368 }
 0x5b7   :  { %v378_v29 = vsel %vm232_vm14, %v365_v27, %v1765_v26  ;;  %v367_v38 = vsel %vm232_vm14, %v362_v13, %v365_v27  ;;  %v675_v13 = vld [vmem:[#allocation2 + $0x40] sm:$0xff] }
 0x5b8   :  { %399 = vmatpush.msra.mxu3 %v378_v29 }
 0x5bd   :  { %v382_v49 = vpop.permute.xlu2 %381 }
 0x5be   :  { %v1769_v32 = vpop.permute.xlu1 %1768  ;;  %v640_v35 = vpop.permute.xlu0 %639 }
 0x5bf   :  { %v1771_v33 = vunpack.i.h.bf16 %v1769_v32  ;;  %v1770_v34 = vunpack.i.l.bf16 %v1769_v32 }
 0x5c1   :  { %v374_v36 = vsel %vm232_vm14, %v369_v28, %v1770_v34  ;;  %v642_v37 = vsel %vm232_vm14, %v1771_v33, %v640_v35 }
 0x5c2   :  { %400 = vmatpush.msra.mxu3 %v374_v36  ;;  %666 = vmatpush.msrb.mxu0 %v642_v37 }
 0x5c4   :  { %401 = vmatpush.msra.mxu3 %v367_v38 }
 0x5c5   :  { %1681 = vmatmul.msk.f32.vlgmr.msra.gmra.mxu3 %vm232_vm14, %v347_v20 }
 0x5c6   :  { %v630_v40 = vpop.permute.xlu1 %629  ;;  %v623_v45 = vpop.permute.xlu0 %622 }
 0x5c7   :  { %v635_v44 = vsel %vm232_vm14, %v630_v40, %v633_v39 }
 0x5c8   :  { %667 = vmatpush.msrb.mxu0 %v635_v44 }
 0x5ce   :  { %v626_v46 = vpop.permute.xlu1 %625  ;;  %v650_v54 = vpop.permute.xlu0 %649 }
 0x5cf   :  { %v628_v47 = vsel %vm232_vm14, %v623_v45, %v626_v46 }
 0x5d0   :  { %668 = vmatpush.msrb.mxu0 %v628_v47 }
 0x5d2   :  { %669 = vmatpush.msrb.mxu0 %v621_v48 }
 0x5d3   :  { %1685 = vmatmul.msk.f32.vlgmr.msrb.gmra.mxu0 %vm578_vm15, %v601_v25 }
 0x648   :  { %v403_v50 = vpop.f32.mrf.mxu3 }
 0x649   :  { %v404_v51 = vadd.f32 %v403_v50, %v382_v49 }
 0x64b   :  { %v2190_v52 = vadd.f32 %v404_v51, %v2109_v9 }
 0x64d   :  { %vm408_vm6 = vcmp.ge.f32.partialorder %v2190_v52, 0.0  ;;  %v409_v53 = vmul.f32 0.1, %v2190_v52 }
 0x64f   :  { %v410_v55 = vsel %vm408_vm6, %v2190_v52, %v409_v53  ;;  %vm2498_vm6 = vcmask 48128  }
 0x650   :  { %v671_v56 = vpop.f32.mrf.mxu0  ;;  %415 = vrot.lane.b32.xlu2 %v410_v55, %s1998_s2  ;;  %412 = vrot.lane.b32.xlu1 %v410_v55, %s1997_s27 }
 0x651   :  { %v672_v57 = vadd.f32 %v671_v56, %v650_v54 }
 0x653   :  { %v2198_v58 = vadd.f32 %v672_v57, %v2109_v9 }
 0x655   :  { %vm676_vm13 = vcmp.ge.f32.partialorder %v2198_v58, 0.0  ;;  %v677_v59 = vmul.f32 0.1, %v2198_v58 }
 0x657   :  { %v678_v60 = vsel %vm676_vm13, %v2198_v58, %v677_v59  ;;  %vm2499_vm13 = vcmask 465920  }
 0x658   :  { %683 = vrot.lane.b32.xlu2 %v678_v60, %s2019_s16  ;;  %680 = vrot.lane.b32.xlu1 %v678_v60, %s2016_s15 }
 0x6aa   :  { %v416_v62 = vpop.permute.xlu2 %415 }
 0x6b2   :  { %v684_v5 = vpop.permute.xlu2 %683 }
 0x6c2   :  { %v413_v61 = vpop.permute.xlu1 %412 }
 0x6c3   :  { %v418_v63 = vsel %vm2502_vm0, 0.0, %v413_v61 }
 0x6c4   :  { %v419_v0 = vsel %vm300_vm5, %v418_v63, 0.0 }
 0x6c5   :  { %v421_v9 = vsel %vm420_vm9, %v419_v0, 0.0 }
 0x6c6   :  { %v422_v3 = vsel %vm64_vm4, %v421_v9, %v416_v62 }
 0x6c7   :  { %v424_v8 = vsel %vm2499_vm13, %v422_v3, 0.0 }
 0x6ca   :  { %v681_v1 = vpop.permute.xlu1 %680 }
 0x6cb   :  { %v687_v2 = vsel %vm2498_vm6, 0.0, %v681_v1 }
 0x6cc   :  { %v688_v4 = vsel %vm420_vm9, %v687_v2, 0.0 }
 0x6cd   :  { %v690_v6 = vsel %vm689_vm10, %v688_v4, 0.0 }
 0x6ce   :  { %v692_v7 = vsel %vm691_vm12, %v690_v6, %v684_v5  ;;  %vm2503_vm12 = vcmask 228352   ;;  %v468_v5 = vld [vmem:[#allocation2 + $0x28] sm:$0xff] }
 0x6cf   :  { %v694_v10 = vsel %vm2497_vm8, %v692_v7, 0.0  ;;  %v752_v6 = vld [vmem:[#allocation2 + $0x48] sm:$0xff] }
 0x6d0   :  { %717 = vrot.lane.b32.xlu2 %v694_v10, %s2020_s17  ;;  %v1779_v11 = vpack.i.bf16 %v694_v10, %v424_v8 }
 0x6d2   :  { %1780 = vrot.lane.b32.xlu1 %v1779_v11, %s2004_s5  ;;  %1775 = vrot.lane.b32.xlu0 %v1779_v11, %s2001_s29 }
 0x6d8   :  { %430 = vrot.lane.b32.xlu2 %v424_v8, %s2006_s7 }
 0x6da   :  { %721 = vrot.lane.b32.xlu1 %v694_v10, %s2021_s18  ;;  %1785 = vrot.lane.b32.xlu0 %v1779_v11, %s2002_s30 }
 0x6e0   :  { %703 = vrot.lane.b32.xlu2 %v694_v10, %s2022_s19 }
 0x6e2   :  { %700 = vrot.lane.b32.xlu1 %v694_v10, %s2006_s7  ;;  %710 = vrot.lane.b32.xlu0 %v694_v10, %s2023_s20 }
 0x6ea   :  { %443 = vperm.xlu0 %1789, %v407_v12   ;;  %727 = vperm.xlu1 %1790, %v675_v13  }
 0x6f2   :  { %1806 = vset.pattern.permute.xlu1 %v2017_v30 }
 0x72a   :  { %v718_v14 = vpop.permute.xlu2 %717 }
 0x732   :  { %v431_v24 = vpop.permute.xlu2 %430 }
 0x73a   :  { %v704_v37 = vpop.permute.xlu2 %703 }
 0x744   :  { %v1781_v15 = vpop.permute.xlu1 %1780  ;;  %v1776_v16 = vpop.permute.xlu0 %1775 }
 0x745   :  { %v1782_v17 = vunpack.i.l.bf16 %v1781_v15  ;;  %v1777_v19 = vunpack.i.l.bf16 %v1776_v16  ;;  %v1783_v26 = vunpack.i.h.bf16 %v1781_v15  ;;  %v1778_v29 = vunpack.i.h.bf16 %v1776_v16 }
 0x747   :  { %v440_v20 = vsel %vm232_vm14, %v1777_v19, %v1782_v17  ;;  %v429_v28 = vsel %vm232_vm14, %v424_v8, %v1777_v19  ;;  %v699_v39 = vsel %vm232_vm14, %v694_v10, %v1783_v26 }
 0x748   :  { %461 = vmatpush.msrb.mxu2 %v440_v20 }
 0x74c   :  { %v722_v21 = vpop.permute.xlu1 %721  ;;  %v1786_v22 = vpop.permute.xlu0 %1785 }
 0x74d   :  { %v1787_v23 = vunpack.i.l.bf16 %v1786_v22  ;;  %v1788_v27 = vunpack.i.h.bf16 %v1786_v22  ;;  %v724_v32 = vsel %vm232_vm14, %v1783_v26, %v722_v21 }
 0x74f   :  { %v436_v25 = vsel %vm232_vm14, %v431_v24, %v1787_v23  ;;  %v720_v34 = vsel %vm232_vm14, %v1788_v27, %v718_v14 }
 0x750   :  { %462 = vmatpush.msrb.mxu2 %v436_v25 }
 0x752   :  { %463 = vmatpush.msrb.mxu2 %v429_v28 }
 0x753   :  { %1682 = vmatmul.msk.f32.vlgmr.msrb.gmra.mxu2 %vm232_vm14, %v407_v12 }
 0x754   :  { %743 = vmatpush.msra.mxu2 %v724_v32  ;;  %v711_v33 = vpop.permute.xlu0 %710  ;;  %v701_v36 = vpop.permute.xlu1 %700 }
 0x755   :  { %v713_v35 = vsel %vm232_vm14, %v1778_v29, %v711_v33  ;;  %v706_v38 = vsel %vm232_vm14, %v701_v36, %v704_v37 }
 0x756   :  { %744 = vmatpush.msra.mxu2 %v720_v34 }
 0x758   :  { %745 = vmatpush.msra.mxu2 %v713_v35 }
 0x75a   :  { %746 = vmatpush.msra.mxu2 %v706_v38 }
 0x75c   :  { %747 = vmatpush.msra.mxu2 %v699_v39  ;;  %v444_v40 = vpop.permute.xlu0 %443  ;;  %v728_v48 = vpop.permute.xlu1 %727 }
 0x75d   :  { %1686 = vmatmul.msk.f32.vlgmr.msra.gmra.mxu2 %vm578_vm15, %v675_v13 }
 0x7d6   :  { %v465_v44 = vpop.f32.mrf.mxu2 }
 0x7d7   :  { %v466_v45 = vadd.f32 %v465_v44, %v444_v40 }
 0x7d9   :  { %v470_v46 = vmul.f32 0.1, %v466_v45  ;;  %vm469_vm4 = vcmp.ge.f32.partialorder %v466_v45, 0.0 }
 0x7db   :  { %v471_v47 = vsel %vm469_vm4, %v466_v45, %v470_v46  ;;  %vm2504_vm4 = vcmask 441344  }
 0x7dc   :  { %476 = vrot.lane.b32.xlu1 %v471_v47, %s1997_s27  ;;  %473 = vrot.lane.b32.xlu2 %v471_v47, %s2012_s12  ;;  %v841_v47 = vld [vmem:[#allocation4 + $0x60] sm:$0xff] }
 0x7e0   :  { %v749_v49 = vpop.f32.mrf.mxu2 }
 0x7e1   :  { %v750_v50 = vadd.f32 %v749_v49, %v728_v48  ;;  %v842_v48 = vld [vmem:[#allocation4 + $0x68] sm:$0xff] }
 0x7e2   :  { %v839_v49 = vld [vmem:[#allocation4 + $0x48] sm:$0xff] }
 0x7e3   :  { %v754_v51 = vmul.f32 0.1, %v750_v50  ;;  %vm753_vm10 = vcmp.ge.f32.partialorder %v750_v50, 0.0 }
 0x7e5   :  { %v755_v53 = vsel %vm753_vm10, %v750_v50, %v754_v51  ;;  %v840_v50 = vld [vmem:[#allocation4 + $0x50] sm:$0xff]  ;;  %v1813_v51 = vpack.i.bf16 %v842_v48, %v841_v47  ;;  %vm930_vm10 = vcmask 523264  }
 0x7e6   :  { %760 = vrot.lane.b32.xlu0 %v755_v53, %s2016_s15  ;;  %757 = vrot.lane.b32.xlu2 %v755_v53, %s2015_s14  ;;  %v1818_v53 = vpack.i.bf16 %v840_v50, %v839_v49 }
 0x836   :  { %v474_v54 = vpop.permute.xlu2 %473 }
 0x837   :  { %v479_v55 = vsel %vm168_vm11, 0.0, %v474_v54  ;;  %v849_v54 = vld [vmem:[#allocation4 + $0x70] sm:$0xff] }
 0x838   :  { %v480_v56 = vsel %vm296_vm1, %v479_v55, 0.0  ;;  %v1833_v55 = vpack.i.bf16 %v849_v54, %v842_v48 }
 0x839   :  { %v481_v57 = vsel %vm298_vm2, %v480_v56, 0.0  ;;  %v848_v56 = vld [vmem:[#allocation4 + $0x58] sm:$0xff] }
 0x840   :  { %v758_v60 = vpop.permute.xlu2 %757 }
 0x841   :  { %v763_v63 = vsel %vm535_vm3, 0.0, %v758_v60 }
 0x842   :  { %v764_v0 = vsel %vm298_vm2, %v763_v63, 0.0  ;;  %v836_v63 = vld [vmem:[#allocation4 + $0x20] sm:$0xff] }
 0x843   :  { %v765_v9 = vsel %vm2503_vm12, %v764_v0, 0.0  ;;  %v846_v0 = vld [vmem:[#allocation4 + $0x28] sm:$0xff]  ;;  %vm2506_vm12 = vcmask 392192  }
 0x84e   :  { %v477_v59 = vpop.permute.xlu1 %476 }
 0x84f   :  { %v482_v61 = vsel %vm300_vm5, %v481_v57, %v477_v59  ;;  %v834_v57 = vld [vmem:[#allocation4 + $0x8] sm:$0xff]  ;;  %v1843_v59 = vpack.i.bf16 %v848_v56, %v840_v50  ;;  %vm863_vm5 = vcmask 384000  }
 0x850   :  { %v483_v62 = vsel %vm302_vm7, %v482_v61, 0.0  ;;  %v1848_v60 = vpack.i.bf16 %v834_v57, %v2085_v41  ;;  %v843_v61 = vld [vmem:[#allocation4 + $0x78] sm:$0xff] }
 0x851   :  { %489 = vrot.lane.b32.xlu0 %v483_v62, %s2005_s6 }
 0x858   :  { %v761_v1 = vpop.permute.xlu0 %760 }
 0x859   :  { %v766_v2 = vsel %vm420_vm9, %v765_v9, %v761_v1  ;;  %v845_v9 = vld [vmem:[#allocation4 + $0x10] sm:$0xff]  ;;  %v1858_v1 = vpack.i.bf16 %v846_v0, %v836_v63  ;;  %vm2505_vm9 = vcmask 187392  }
 0x85a   :  { %v767_v3 = vsel %vm2504_vm4, %v766_v2, 0.0  ;;  %v1863_v2 = vpack.i.bf16 %v845_v9, %v834_v57  ;;  %vm2507_vm4 = vmmov %vm2506_vm12 }
 0x85b   :  { %790 = vrot.lane.b32.xlu0 %v767_v3, %s2010_s11  ;;  %v1796_v4 = vpack.i.bf16 %v767_v3, %v483_v62 }
 0x85d   :  { %1797 = vrot.lane.b32.xlu2 %v1796_v4, %s1999_s0  ;;  %1792 = vrot.lane.b32.xlu1 %v1796_v4, %s2009_s10 }
 0x863   :  { %776 = vrot.lane.b32.xlu0 %v767_v3, %s2000_s28 }
 0x865   :  { %794 = vrot.lane.b32.xlu2 %v767_v3, %s2008_s9  ;;  %1802 = vrot.lane.b32.xlu1 %v1796_v4, %s2006_s7  ;;  %v1838_v4 = vpack.i.bf16 %v836_v63, %v2087_v42 }
 0x86d   :  { %773 = vrot.lane.b32.xlu2 %v767_v3, %s2005_s6  ;;  %783 = vrot.lane.b32.xlu1 %v767_v3, %s2001_s29 }
 0x875   :  { %502 = vperm.xlu1 %1806, %v468_v5   ;;  %800 = vperm.xlu2 %1807, %v752_v6  }
 0x87d   :  { %1889 = vset.pattern.permute.xlu1 %v2018_v31  ;;  %1868 = vset.pattern.permute.xlu2 %v2017_v30 }
 0x8b7   :  { %v1798_v7 = vpop.permute.xlu2 %1797 }
 0x8b8   :  { %v1799_v11 = vunpack.i.l.bf16 %v1798_v7  ;;  %v1800_v31 = vunpack.i.h.bf16 %v1798_v7 }
 0x8ba   :  { %v772_v29 = vsel %vm232_vm14, %v767_v3, %v1800_v31  ;;  %v850_v3 = vld [vmem:[#allocation4 + $0x88] sm:$0xff] }
 0x8bf   :  { %v795_v17 = vpop.permute.xlu2 %794 }
 0x8c0   :  { %v797_v22 = vsel %vm232_vm14, %v1800_v31, %v795_v17 }
 0x8c3   :  { %v490_v8 = vpop.permute.xlu0 %489 }
 0x8c7   :  { %v774_v27 = vpop.permute.xlu2 %773 }
 0x8cd   :  { %v791_v14 = vpop.permute.xlu0 %790 }
 0x8cf   :  { %v1793_v10 = vpop.permute.xlu1 %1792  ;;  %v801_v34 = vpop.permute.xlu2 %800 }
 0x8d0   :  { %v1794_v12 = vunpack.i.l.bf16 %v1793_v10  ;;  %v1795_v23 = vunpack.i.h.bf16 %v1793_v10 }
 0x8d2   :  { %v499_v13 = vsel %vm232_vm14, %v1794_v12, %v1799_v11  ;;  %v488_v21 = vsel %vm232_vm14, %v483_v62, %v1794_v12  ;;  %v844_v62 = vld [vmem:[#allocation4 + $0x80] sm:$0xff] }
 0x8d3   :  { %520 = vmatpush.msrb.mxu3 %v499_v13  ;;  %v1823_v41 = vpack.i.bf16 %v850_v3, %v844_v62  ;;  %v847_v13 = vld [vmem:[#allocation4 + $0x40] sm:$0xff] }
 0x8d5   :  { %v777_v26 = vpop.permute.xlu0 %776 }
 0x8d6   :  { %v779_v28 = vsel %vm232_vm14, %v774_v27, %v777_v26 }
 0x8d7   :  { %v1803_v15 = vpop.permute.xlu1 %1802 }
 0x8d8   :  { %v1804_v16 = vunpack.i.l.bf16 %v1803_v15  ;;  %v1805_v20 = vunpack.i.h.bf16 %v1803_v15  ;;  %v832_v15 = vld [vmem:[#allocation2 + $0xf0] sm:$0xff] }
 0x8da   :  { %v495_v19 = vsel %vm232_vm14, %v490_v8, %v1804_v16  ;;  %v793_v24 = vsel %vm232_vm14, %v1805_v20, %v791_v14  ;;  %v831_v14 = vld [vmem:[#allocation2 + $0x50] sm:$0xff] }
 0x8db   :  { %521 = vmatpush.msrb.mxu3 %v495_v19 }
 0x8dd   :  { %522 = vmatpush.msrb.mxu3 %v488_v21 }
 0x8de   :  { %1683 = vmatmul.msk.f32.vlgmr.msrb.gmra.mxu3 %vm232_vm14, %v468_v5 }
 0x8df   :  { %816 = vmatpush.msra.mxu3 %v797_v22  ;;  %v784_v30 = vpop.permute.xlu1 %783 }
 0x8e0   :  { %v786_v25 = vsel %vm232_vm14, %v1795_v23, %v784_v30 }
 0x8e1   :  { %817 = vmatpush.msra.mxu3 %v793_v24 }
 0x8e3   :  { %818 = vmatpush.msra.mxu3 %v786_v25 }
 0x8e5   :  { %819 = vmatpush.msra.mxu3 %v779_v28 }
 0x8e7   :  { %820 = vmatpush.msra.mxu3 %v772_v29  ;;  %v503_v33 = vpop.permute.xlu1 %502 }
 0x8e8   :  { %1687 = vmatmul.msk.f32.vlgmr.msra.gmra.mxu3 %vm578_vm15, %v752_v6 }
 0x961   :  { %v524_v32 = vpop.f32.mrf.mxu3 }
 0x962   :  { %v525_v35 = vadd.f32 %v524_v32, %v503_v33 }
 0x964   :  { %v527_v38 = vadd.f32 %v525_v35, %v2190_v52  ;;  %v838_v52 = vld [vmem:[#allocation4 + $0x38] sm:$0xff] }
 0x965   :  { %v1853_v42 = vpack.i.bf16 %v847_v13, %v838_v52 }
 0x96b   :  { %v822_v36 = vpop.f32.mrf.mxu3 }
 0x96c   :  { %v823_v37 = vadd.f32 %v822_v36, %v801_v34 }
 0x96e   :  { %v825_v39 = vadd.f32 %v823_v37, %v2198_v58  ;;  %v1828_v58 = vpack.i.bf16 %v838_v52, %v2089_v43  ;;  %v1808_v43 = vpack.i.bf16 %v844_v62, %v843_v61 }
 0x970   :  { %v826_v40 = vadd.f32 %v825_v39, %v527_v38  ;;  %1809 = vrot.lane.b32.xlu2 %v1808_v43, %s2024_s21 }
 0x972   :  { %v827_v44 = vmul.f32 0.5, %v826_v40 }
 0x974   :  { %vm828_vm2 = vcmp.ge.f32.partialorder %v827_v44, 0.0  ;;  %v829_v45 = vmul.f32 0.1, %v827_v44 }
 0x976   :  { %v830_v46 = vsel %vm828_vm2, %v827_v44, %v829_v45 }
 0x977   :  { %852 = vrot.lane.b32.xlu1 %v830_v46, %s2012_s12  ;;  %858 = vrot.lane.b32.xlu0 %v830_v46, %s2005_s6 }
 0x978   :  { %1824 = vrot.lane.b32.xlu2 %v1823_v41, %s2025_s22 }
 0x97f   :  { %1814 = vrot.lane.b32.xlu0 %v1813_v51, %s2024_s21  ;;  %1819 = vrot.lane.b32.xlu1 %v1818_v53, %s2024_s21 }
 0x980   :  { %1839 = vrot.lane.b32.xlu2 %v1838_v4, %s2024_s21 }
 0x987   :  { %1829 = vrot.lane.b32.xlu0 %v1828_v58, %s2024_s21  ;;  %1834 = vrot.lane.b32.xlu1 %v1833_v55, %s2025_s22 }
 0x988   :  { %1854 = vrot.lane.b32.xlu2 %v1853_v42, %s2025_s22 }
 0x98f   :  { %1844 = vrot.lane.b32.xlu0 %v1843_v59, %s2025_s22  ;;  %1849 = vrot.lane.b32.xlu1 %v1848_v60, %s2024_s21 }
 0x990   :  { %1033 = vperm.xlu2 %1868, %v831_v14  }
 0x997   :  { %1859 = vrot.lane.b32.xlu0 %v1858_v1, %s2025_s22  ;;  %1864 = vrot.lane.b32.xlu1 %v1863_v2, %s2025_s22 }
 0x9ca   :  { %v1810_v20 = vpop.permute.xlu2 %1809 }
 0x9cb   :  { %v1812_v21 = vunpack.i.h.bf16 %v1810_v20  ;;  %v1811_v22 = vunpack.i.l.bf16 %v1810_v20 }
 0x9d2   :  { %v1825_v27 = vpop.permute.xlu2 %1824 }
 0x9d3   :  { %v1827_v28 = vunpack.i.h.bf16 %v1825_v27  ;;  %v1826_v29 = vunpack.i.l.bf16 %v1825_v27 }
 0x9d5   :  { %v936_v35 = vsel %vm930_vm10, %v1826_v29, %v1827_v28 }
 0x9d6   :  { %956 = vmatpush.msra.mxu0 %v936_v35 }
 0x9da   :  { %v1840_v44 = vpop.permute.xlu2 %1839 }
 0x9db   :  { %v1842_v45 = vunpack.i.h.bf16 %v1840_v44 }
 0x9e2   :  { %v1855_v55 = vpop.permute.xlu2 %1854 }
 0x9e3   :  { %v1857_v56 = vunpack.i.h.bf16 %v1855_v55  ;;  %v1856_v57 = vunpack.i.l.bf16 %v1855_v55 }
 0x9e5   :  { %v933_v62 = vsel %vm930_vm10, %v1856_v57, %v1857_v56 }
 0x9e9   :  { %v853_v5 = vpop.permute.xlu1 %852  ;;  %v859_v6 = vpop.permute.xlu0 %858 }
 0x9ea   :  { %v855_v7 = vsel %vm168_vm11, 0.0, %v853_v5  ;;  %v861_v8 = vsel %vm2505_vm9, %v859_v6, 0.0  ;;  %v1034_v41 = vpop.permute.xlu2 %1033  ;;  %vm1051_vm9 = vcmask 408576  }
 0x9eb   :  { %v856_v10 = vsel %vm232_vm14, %v855_v7, 0.0  ;;  %v862_v11 = vsel %vm232_vm14, %v861_v8, %v859_v6 }
 0x9ec   :  { %1688 = vmatpush.msk.msra.mxu1 %vm863_vm5, %v862_v11  ;;  %v857_v12 = vsel %vm296_vm1, %v856_v10, %v853_v5  ;;  %vm996_vm1 = vcmask 261120   ;;  %vm1049_vm5 = vcmask 400384  }
 0x9ed   :  { %v1002_v24 = vsel %vm996_vm1, %v1811_v22, %v1812_v21 }
 0x9ee   :  { %885 = vmatpush.msra.mxu1 %v857_v12  ;;  %1022 = vmatpush.msrb.mxu2 %v1002_v24  ;;  %v1037_v24 = vld [vmem:[#allocation2 + $0x58] sm:$0xff] }
 0x9f0   :  { %886 = vmatpush.msra.mxu1 %v830_v46  ;;  %v1841_v46 = vunpack.i.l.bf16 %v1840_v44 }
 0x9f1   :  { %1689 = vmatmul.msk.f32.vlgmr.msra.gmra.mxu1 %vm232_vm14, %v831_v14  ;;  %v1815_v16 = vpop.permute.xlu0 %1814  ;;  %v1820_v17 = vpop.permute.xlu1 %1819 }
 0x9f2   :  { %v1817_v19 = vunpack.i.h.bf16 %v1815_v16  ;;  %v1816_v31 = vunpack.i.l.bf16 %v1815_v16  ;;  %v1822_v23 = vunpack.i.h.bf16 %v1820_v17  ;;  %v1821_v30 = vunpack.i.l.bf16 %v1820_v17 }
 0x9f3   :  { %v998_v50 = vsel %vm996_vm1, %v1841_v46, %v1842_v45 }
 0x9f4   :  { %v1001_v25 = vsel %vm996_vm1, %v1816_v31, %v1817_v19  ;;  %v1000_v26 = vsel %vm996_vm1, %v1821_v30, %v1822_v23 }
 0x9f5   :  { %1023 = vmatpush.msrb.mxu2 %v1001_v25  ;;  %v1279_v25 = vld [vmem:[#allocation2 + $0x78] sm:$0xff] }
 0x9f7   :  { %1024 = vmatpush.msrb.mxu2 %v1000_v26 }
 0x9f9   :  { %1690 = vmatmul.msk.f32.gmra.mxu1 %vm232_vm14, %v832_v15  ;;  %v1830_v32 = vpop.permute.xlu0 %1829  ;;  %v1835_v36 = vpop.permute.xlu1 %1834 }
 0x9fa   :  { %v1832_v33 = vunpack.i.h.bf16 %v1830_v32  ;;  %v1831_v34 = vunpack.i.l.bf16 %v1830_v32  ;;  %v1837_v37 = vunpack.i.h.bf16 %v1835_v36  ;;  %v1836_v38 = vunpack.i.l.bf16 %v1835_v36 }
 0x9fc   :  { %v999_v39 = vsel %vm996_vm1, %v1831_v34, %v1832_v33  ;;  %v935_v40 = vsel %vm930_vm10, %v1836_v38, %v1837_v37 }
 0x9fd   :  { %1025 = vmatpush.msrb.mxu2 %v999_v39  ;;  %957 = vmatpush.msra.mxu0 %v935_v40 }
 0x9ff   :  { %1026 = vmatpush.msrb.mxu2 %v998_v50 }
 0xa01   :  { %v1845_v47 = vpop.permute.xlu0 %1844  ;;  %v1850_v51 = vpop.permute.xlu1 %1849 }
 0xa02   :  { %v1847_v48 = vunpack.i.h.bf16 %v1845_v47  ;;  %v1846_v49 = vunpack.i.l.bf16 %v1845_v47  ;;  %v1852_v53 = vunpack.i.h.bf16 %v1850_v51  ;;  %v1851_v52 = vunpack.i.l.bf16 %v1850_v51 }
 0xa04   :  { %v934_v58 = vsel %vm930_vm10, %v1846_v49, %v1847_v48  ;;  %v997_v54 = vsel %vm996_vm1, %v1851_v52, %v1852_v53  ;;  %vm2501_vm1 = vcmask 424960  }
 0xa05   :  { %958 = vmatpush.msra.mxu0 %v934_v58  ;;  %1027 = vmatpush.msrb.mxu2 %v997_v54 }
 0xa07   :  { %959 = vmatpush.msra.mxu0 %v933_v62 }
 0xa09   :  { %v1860_v59 = vpop.permute.xlu0 %1859  ;;  %v1865_v63 = vpop.permute.xlu1 %1864 }
 0xa0a   :  { %v1862_v60 = vunpack.i.h.bf16 %v1860_v59  ;;  %v1861_v61 = vunpack.i.l.bf16 %v1860_v59  ;;  %v1867_v43 = vunpack.i.h.bf16 %v1865_v63  ;;  %v1866_v0 = vunpack.i.l.bf16 %v1865_v63 }
 0xa0c   :  { %v932_v9 = vsel %vm930_vm10, %v1861_v61, %v1862_v60  ;;  %v931_v1 = vsel %vm930_vm10, %v1866_v0, %v1867_v43  ;;  %vm1054_vm10 = vcmask 809984  }
 0xa0d   :  { %960 = vmatpush.msra.mxu0 %v932_v9 }
 0xa0f   :  { %961 = vmatpush.msra.mxu0 %v931_v1 }
 0xa6e   :  { %v888_v2 = vpop.f32.mrf.mxu1 }
 0xa6f   :  { %1692 = vmatmul.msk.f32.vlgmr.msrb.gmra.mxu2 %vm2506_vm12, %v888_v2  ;;  %vm2500_vm12 = vcmask 834560  }
 0xa76   :  { %v891_v3 = vpop.f32.mrf.mxu1 }
 0xa77   :  { %1691 = vmatmul.msk.f32.vlgmr.msra.gmra.mxu0 %vm2507_vm4, %v891_v3  ;;  %vm2508_vm4 = vcmask 441344  }
 0xaf2   :  { %v1029_v4 = vpop.f32.mrf.mxu2 }
 0xaf4   :  { %v963_v5 = vpop.f32.mrf.mxu0 }
 0xaf5   :  { %v1030_v6 = vadd.f32 %v1029_v4, %v963_v5 }
 0xaf7   :  { %v2308_v7 = vadd.f32 %v1034_v41, %v1030_v6 }
 0xaf9   :  { %vm1038_vm2 = vcmp.ge.f32.partialorder %v2308_v7, 0.0  ;;  %v1039_v8 = vmul.f32 0.1, %v2308_v7 }
 0xafb   :  { %v1040_v10 = vsel %vm1038_vm2, %v2308_v7, %v1039_v8  ;;  %vm2509_vm2 = vcmask 392192  }
 0xafc   :  { %1045 = vrot.lane.b32.xlu2 %v1040_v10, %s1997_s27  ;;  %1280 = vrot.lane.b32.xlu1 %v1040_v10, %s2015_s14  ;;  %vm2511_vm8 = vmmov %vm2509_vm2 }
 0xafd   :  { %1042 = vrot.lane.b32.xlu0 %v1040_v10, %s2012_s12  ;;  %vm2512_vm6 = vmmov %vm2509_vm2 }
 0xafe   :  { %vm2515_vm13 = vmmov %vm2509_vm2 }
 0xb05   :  { %1283 = vrot.lane.b32.xlu0 %v1040_v10, %s2016_s15 }
 0xb56   :  { %v1046_v17 = vpop.permute.xlu2 %1045 }
 0xb6e   :  { %v1281_v11 = vpop.permute.xlu1 %1280 }
 0xb6f   :  { %v1043_v12 = vpop.permute.xlu0 %1042  ;;  %v1286_v14 = vsel %vm535_vm3, 0.0, %v1281_v11 }
 0xb70   :  { %v1048_v13 = vsel %vm168_vm11, 0.0, %v1043_v12  ;;  %v1287_v16 = vsel %vm1051_vm9, %v1286_v14, 0.0 }
 0xb71   :  { %v1050_v42 = vsel %vm1049_vm5, %v1048_v13, 0.0  ;;  %v1289_v31 = vsel %vm2501_vm1, %v1287_v16, 0.0 }
 0xb72   :  { %v1052_v15 = vsel %vm1051_vm9, %v1050_v42, 0.0  ;;  %v1350_v42 = vld [vmem:[#allocation2 + $0x80] sm:$0xff] }
 0xb73   :  { %v1053_v19 = vsel %vm302_vm7, %v1052_v15, %v1046_v17  ;;  %v1099_v15 = vld [vmem:[#allocation2 + $0x60] sm:$0xff] }
 0xb74   :  { %v1055_v22 = vsel %vm1054_vm10, %v1053_v19, 0.0 }
 0xb77   :  { %v1284_v20 = vpop.permute.xlu0 %1283 }
 0xb78   :  { %v1290_v21 = vsel %vm2508_vm4, %v1289_v31, %v1284_v20  ;;  %vm2510_vm4 = vmmov %vm2509_vm2 }
 0xb79   :  { %v1292_v23 = vsel %vm2500_vm12, %v1290_v21, 0.0 }
 0xb7a   :  { %1319 = vrot.lane.b32.xlu0 %v1292_v23, %s2008_s9  ;;  %v1874_v30 = vpack.i.bf16 %v1292_v23, %v1055_v22 }
 0xb7c   :  { %1875 = vrot.lane.b32.xlu2 %v1874_v30, %s1999_s0  ;;  %1870 = vrot.lane.b32.xlu1 %v1874_v30, %s2009_s10 }
 0xb82   :  { %1315 = vrot.lane.b32.xlu0 %v1292_v23, %s2010_s11 }
 0xb84   :  { %1885 = vrot.lane.b32.xlu2 %v1874_v30, %s2006_s7  ;;  %1880 = vrot.lane.b32.xlu1 %v1874_v30, %s2005_s6 }
 0xb8a   :  { %1074 = vperm.xlu0 %1789, %v1037_v24  }
 0xb8c   :  { %1301 = vrot.lane.b32.xlu2 %v1292_v23, %s2000_s28  ;;  %1308 = vrot.lane.b32.xlu1 %v1292_v23, %s2001_s29 }
 0xb94   :  { %1325 = vperm.xlu1 %1889, %v1279_v25  }
 0xbd6   :  { %v1876_v26 = vpop.permute.xlu2 %1875 }
 0xbd7   :  { %v1878_v27 = vunpack.i.h.bf16 %v1876_v26  ;;  %v1877_v33 = vunpack.i.l.bf16 %v1876_v26 }
 0xbd9   :  { %v1297_v58 = vsel %vm2515_vm13, %v1292_v23, %v1878_v27  ;;  %vm2516_vm13 = vcmask 441344  }
 0xbde   :  { %v1886_v35 = vpop.permute.xlu2 %1885 }
 0xbdf   :  { %v1888_v37 = vunpack.i.h.bf16 %v1886_v35  ;;  %v1887_v44 = vunpack.i.l.bf16 %v1886_v35 }
 0xbe6   :  { %v1302_v53 = vpop.permute.xlu2 %1301 }
 0xbec   :  { %v1320_v28 = vpop.permute.xlu0 %1319 }
 0xbed   :  { %v1322_v29 = vsel %vm2509_vm2, %v1878_v27, %v1320_v28 }
 0xbee   :  { %1341 = vmatpush.msra.mxu2 %v1322_v29  ;;  %v1871_v32 = vpop.permute.xlu1 %1870 }
 0xbef   :  { %v1872_v34 = vunpack.i.l.bf16 %v1871_v32  ;;  %v1873_v48 = vunpack.i.h.bf16 %v1871_v32 }
 0xbf1   :  { %v1071_v36 = vsel %vm2510_vm4, %v1872_v34, %v1877_v33  ;;  %v1060_v47 = vsel %vm2509_vm2, %v1055_v22, %v1872_v34  ;;  %vm2513_vm4 = vmmov %vm2509_vm2 }
 0xbf2   :  { %1092 = vmatpush.msrb.mxu3 %v1071_v36 }
 0xbf4   :  { %v1316_v38 = vpop.permute.xlu0 %1315 }
 0xbf5   :  { %v1318_v39 = vsel %vm2511_vm8, %v1888_v37, %v1316_v38  ;;  %vm2514_vm8 = vmmov %vm2509_vm2 }
 0xbf6   :  { %1342 = vmatpush.msra.mxu2 %v1318_v39  ;;  %v1881_v40 = vpop.permute.xlu1 %1880 }
 0xbf7   :  { %v1882_v45 = vunpack.i.l.bf16 %v1881_v40  ;;  %v1883_v49 = vunpack.i.h.bf16 %v1881_v40 }
 0xbf9   :  { %v1067_v46 = vsel %vm2512_vm6, %v1882_v45, %v1887_v44  ;;  %v1304_v52 = vsel %vm2514_vm8, %v1883_v49, %v1302_v53  ;;  %vm2517_vm8 = vmmov %vm2513_vm4 }
 0xbfa   :  { %1093 = vmatpush.msrb.mxu3 %v1067_v46 }
 0xbfc   :  { %1094 = vmatpush.msrb.mxu3 %v1060_v47  ;;  %v1075_v54 = vpop.permute.xlu0 %1074 }
 0xbfd   :  { %1693 = vmatmul.msk.f32.vlgmr.msrb.gmra.mxu3 %vm232_vm14, %v1037_v24 }
 0xbfe   :  { %v1309_v50 = vpop.permute.xlu1 %1308 }
 0xbff   :  { %v1311_v51 = vsel %vm2513_vm4, %v1873_v48, %v1309_v50 }
 0xc00   :  { %1343 = vmatpush.msra.mxu2 %v1311_v51 }
 0xc02   :  { %1344 = vmatpush.msra.mxu2 %v1304_v52 }
 0xc04   :  { %1345 = vmatpush.msra.mxu2 %v1297_v58 }
 0xc05   :  { %1697 = vmatmul.msk.f32.vlgmr.msra.gmra.mxu2 %vm578_vm15, %v1279_v25 }
 0xc06   :  { %v1326_v60 = vpop.permute.xlu1 %1325 }
 0xc80   :  { %v1096_v55 = vpop.f32.mrf.mxu3 }
 0xc81   :  { %v1097_v56 = vadd.f32 %v1096_v55, %v1075_v54 }
 0xc83   :  { %v1101_v57 = vmul.f32 0.1, %v1097_v56  ;;  %vm1100_vm6 = vcmp.ge.f32.partialorder %v1097_v56, 0.0 }
 0xc85   :  { %v1102_v59 = vsel %vm1100_vm6, %v1097_v56, %v1101_v57  ;;  %vm2518_vm6 = vmmov %vm2513_vm4 }
 0xc86   :  { %1107 = vrot.lane.b32.xlu0 %v1102_v59, %s1997_s27  ;;  %1104 = vrot.lane.b32.xlu2 %v1102_v59, %s2012_s12 }
 0xc88   :  { %v1347_v61 = vpop.f32.mrf.mxu2 }
 0xc89   :  { %v1348_v62 = vadd.f32 %v1347_v61, %v1326_v60 }
 0xc8b   :  { %v1352_v63 = vmul.f32 0.1, %v1348_v62  ;;  %vm1351_vm2 = vcmp.ge.f32.partialorder %v1348_v62, 0.0 }
 0xc8d   :  { %v1353_v43 = vsel %vm1351_vm2, %v1348_v62, %v1352_v63  ;;  %vm2519_vm2 = vmmov %vm2513_vm4 }
 0xc8e   :  { %1355 = vrot.lane.b32.xlu1 %v1353_v43, %s2015_s14  ;;  %1358 = vrot.lane.b32.xlu2 %v1353_v43, %s2016_s15 }
 0xce0   :  { %v1105_v0 = vpop.permute.xlu2 %1104 }
 0xce1   :  { %v1110_v9 = vsel %vm168_vm11, 0.0, %v1105_v0 }
 0xce2   :  { %v1111_v1 = vsel %vm1049_vm5, %v1110_v9, 0.0 }
 0xce3   :  { %v1112_v2 = vsel %vm1051_vm9, %v1111_v1, 0.0 }
 0xce8   :  { %v1359_v10 = vpop.permute.xlu2 %1358 }
 0xcf8   :  { %v1108_v3 = vpop.permute.xlu0 %1107 }
 0xcf9   :  { %v1113_v41 = vsel %vm302_vm7, %v1112_v2, %v1108_v3  ;;  %v1424_v3 = vld [vmem:[#allocation2 + $0x88] sm:$0xff] }
 0xcfa   :  { %v1114_v4 = vsel %vm1054_vm10, %v1113_v41, 0.0  ;;  %v1159_v41 = vld [vmem:[#allocation2 + $0x68] sm:$0xff] }
 0xcfb   :  { %1120 = vrot.lane.b32.xlu2 %v1114_v4, %s2005_s6 }
 0xd00   :  { %v1356_v5 = vpop.permute.xlu1 %1355 }
 0xd01   :  { %v1361_v6 = vsel %vm535_vm3, 0.0, %v1356_v5 }
 0xd02   :  { %v1362_v8 = vsel %vm1051_vm9, %v1361_v6, 0.0 }
 0xd03   :  { %v1363_v11 = vsel %vm2501_vm1, %v1362_v8, 0.0 }
 0xd04   :  { %v1364_v12 = vsel %vm2516_vm13, %v1363_v11, %v1359_v10  ;;  %vm2520_vm13 = vmmov %vm2519_vm2 }
 0xd05   :  { %v1365_v13 = vsel %vm2500_vm12, %v1364_v12, 0.0  ;;  %vm1440_vm12 = vcmask 932864  }
 0xd06   :  { %1388 = vrot.lane.b32.xlu2 %v1365_v13, %s2010_s11  ;;  %v1895_v14 = vpack.i.bf16 %v1365_v13, %v1114_v4 }
 0xd08   :  { %1896 = vrot.lane.b32.xlu1 %v1895_v14, %s1999_s0  ;;  %1891 = vrot.lane.b32.xlu0 %v1895_v14, %s2009_s10 }
 0xd0e   :  { %1374 = vrot.lane.b32.xlu2 %v1365_v13, %s2000_s28 }
 0xd10   :  { %1392 = vrot.lane.b32.xlu1 %v1365_v13, %s2008_s9  ;;  %1901 = vrot.lane.b32.xlu0 %v1895_v14, %s2006_s7 }
 0xd18   :  { %1371 = vrot.lane.b32.xlu1 %v1365_v13, %s2005_s6  ;;  %1381 = vrot.lane.b32.xlu0 %v1365_v13, %s2001_s29 }
 0xd20   :  { %1398 = vperm.xlu1 %1889, %v1350_v42   ;;  %1133 = vperm.xlu0 %1789, %v1099_v15  }
 0xd55   :  { %v1121_v20 = vpop.permute.xlu2 %1120 }
 0xd60   :  { %v1389_v24 = vpop.permute.xlu2 %1388 }
 0xd68   :  { %v1375_v37 = vpop.permute.xlu2 %1374 }
 0xd7a   :  { %v1897_v16 = vpop.permute.xlu1 %1896  ;;  %v1892_v17 = vpop.permute.xlu0 %1891 }
 0xd7b   :  { %v1898_v19 = vunpack.i.l.bf16 %v1897_v16  ;;  %v1893_v31 = vunpack.i.l.bf16 %v1892_v17  ;;  %v1899_v26 = vunpack.i.h.bf16 %v1897_v16  ;;  %v1894_v29 = vunpack.i.h.bf16 %v1892_v17 }
 0xd7d   :  { %v1130_v21 = vsel %vm2513_vm4, %v1893_v31, %v1898_v19  ;;  %v1119_v28 = vsel %vm2518_vm6, %v1114_v4, %v1893_v31  ;;  %vm2521_vm4 = vmmov %vm2519_vm2 }
 0xd7e   :  { %1151 = vmatpush.msra.mxu3 %v1130_v21  ;;  %vm2523_vm6 = vmmov %vm2519_vm2 }
 0xd7f   :  { %v1370_v39 = vsel %vm2523_vm6, %v1365_v13, %v1899_v26  ;;  %vm2525_vm6 = vcmask 465920  }
 0xd82   :  { %v1393_v22 = vpop.permute.xlu1 %1392  ;;  %v1902_v23 = vpop.permute.xlu0 %1901 }
 0xd83   :  { %v1903_v30 = vunpack.i.l.bf16 %v1902_v23  ;;  %v1904_v27 = vunpack.i.h.bf16 %v1902_v23  ;;  %v1395_v32 = vsel %vm2519_vm2, %v1899_v26, %v1393_v22 }
 0xd85   :  { %v1126_v25 = vsel %vm2517_vm8, %v1121_v20, %v1903_v30  ;;  %v1391_v34 = vsel %vm2520_vm13, %v1904_v27, %v1389_v24  ;;  %vm2522_vm8 = vmmov %vm2519_vm2 }
 0xd86   :  { %1152 = vmatpush.msra.mxu3 %v1126_v25 }
 0xd88   :  { %1153 = vmatpush.msra.mxu3 %v1119_v28 }
 0xd89   :  { %1694 = vmatmul.msk.f32.vlgmr.msra.gmra.mxu3 %vm232_vm14, %v1099_v15 }
 0xd8a   :  { %1414 = vmatpush.msrb.mxu3 %v1395_v32  ;;  %v1382_v33 = vpop.permute.xlu0 %1381  ;;  %v1372_v36 = vpop.permute.xlu1 %1371 }
 0xd8b   :  { %v1384_v35 = vsel %vm2521_vm4, %v1894_v29, %v1382_v33  ;;  %v1377_v38 = vsel %vm2522_vm8, %v1372_v36, %v1375_v37  ;;  %vm1174_vm4 = vcmask 859136   ;;  %vm2524_vm8 = vcmask 441344  }
 0xd8c   :  { %1415 = vmatpush.msrb.mxu3 %v1391_v34  ;;  %vm2527_vm1 = vmmov %vm2524_vm8 }
 0xd8e   :  { %1416 = vmatpush.msrb.mxu3 %v1384_v35 }
 0xd90   :  { %1417 = vmatpush.msrb.mxu3 %v1377_v38 }
 0xd92   :  { %1418 = vmatpush.msrb.mxu3 %v1370_v39  ;;  %v1134_v40 = vpop.permute.xlu0 %1133  ;;  %v1399_v49 = vpop.permute.xlu1 %1398 }
 0xd93   :  { %1698 = vmatmul.msk.f32.vlgmr.msrb.gmra.mxu3 %vm578_vm15, %v1350_v42 }
 0xe0c   :  { %v1155_v44 = vpop.f32.mrf.mxu3 }
 0xe0d   :  { %v1156_v45 = vadd.f32 %v1155_v44, %v1134_v40 }
 0xe0f   :  { %v2379_v46 = vadd.f32 %v1156_v45, %v2308_v7 }
 0xe11   :  { %vm1160_vm2 = vcmp.ge.f32.partialorder %v2379_v46, 0.0  ;;  %v1161_v47 = vmul.f32 0.1, %v2379_v46 }
 0xe13   :  { %v1162_v48 = vsel %vm1160_vm2, %v2379_v46, %v1161_v47  ;;  %vm1437_vm2 = vcmask 490496  }
 0xe14   :  { %1167 = vrot.lane.b32.xlu0 %v1162_v48, %s1998_s2  ;;  %1164 = vrot.lane.b32.xlu2 %v1162_v48, %s1997_s27 }
 0xe16   :  { %v1420_v50 = vpop.f32.mrf.mxu3 }
 0xe17   :  { %v1421_v51 = vadd.f32 %v1420_v50, %v1399_v49 }
 0xe19   :  { %v2387_v53 = vadd.f32 %v1421_v51, %v2308_v7 }
 0xe1b   :  { %vm1425_vm13 = vcmp.ge.f32.partialorder %v2387_v53, 0.0  ;;  %v1426_v52 = vmul.f32 0.1, %v2387_v53 }
 0xe1d   :  { %v1427_v58 = vsel %vm1425_vm13, %v2387_v53, %v1426_v52  ;;  %vm2526_vm13 = vcmask 48128  }
 0xe1e   :  { %1432 = vrot.lane.b32.xlu2 %v1427_v58, %s2019_s16  ;;  %1429 = vrot.lane.b32.xlu1 %v1427_v58, %s2016_s15 }
 0xe6e   :  { %v1165_v54 = vpop.permute.xlu2 %1164 }
 0xe6f   :  { %v1170_v55 = vsel %vm2502_vm0, 0.0, %v1165_v54  ;;  %vm2528_vm0 = vcmask 539648  }
 0xe70   :  { %v1171_v56 = vsel %vm302_vm7, %v1170_v55, 0.0 }
 0xe71   :  { %v1172_v57 = vsel %vm2524_vm8, %v1171_v56, 0.0 }
 0xe78   :  { %v1433_v43 = vpop.permute.xlu2 %1432 }
 0xe86   :  { %v1168_v7 = vpop.permute.xlu0 %1167 }
 0xe87   :  { %v1173_v59 = vsel %vm2525_vm6, %v1172_v57, %v1168_v7  ;;  %v1499_v7 = vld [vmem:[#allocation2 + $0x90] sm:$0xff] }
 0xe88   :  { %v1175_v60 = vsel %vm1174_vm4, %v1173_v59, 0.0  ;;  %v1219_v59 = vld [vmem:[#allocation2 + $0x70] sm:$0xff] }
 0xe89   :  { %1181 = vrot.lane.b32.xlu2 %v1175_v60, %s2006_s7 }
 0xe90   :  { %v1430_v61 = vpop.permute.xlu1 %1429 }
 0xe91   :  { %v1435_v62 = vsel %vm2526_vm13, 0.0, %v1430_v61 }
 0xe92   :  { %v1436_v63 = vsel %vm2527_vm1, %v1435_v62, 0.0 }
 0xe93   :  { %v1438_v0 = vsel %vm1437_vm2, %v1436_v63, 0.0 }
 0xe94   :  { %v1439_v9 = vsel %vm2528_vm0, %v1438_v0, %v1433_v43  ;;  %vm2529_vm0 = vcmask 392192  }
 0xe95   :  { %v1441_v1 = vsel %vm1440_vm12, %v1439_v9, 0.0  ;;  %vm2530_vm1 = vmmov %vm2529_vm0 }
 0xe96   :  { %1464 = vrot.lane.b32.xlu2 %v1441_v1, %s2020_s17  ;;  %v1910_v2 = vpack.i.bf16 %v1441_v1, %v1175_v60  ;;  %vm2531_vm12 = vmmov %vm2529_vm0 }
 0xe97   :  { %vm2532_vm8 = vmmov %vm2529_vm0 }
 0xe98   :  { %1911 = vrot.lane.b32.xlu1 %v1910_v2, %s2004_s5  ;;  %1906 = vrot.lane.b32.xlu0 %v1910_v2, %s2001_s29  ;;  %vm2533_vm6 = vmmov %vm2529_vm0 }
 0xe99   :  { %vm2534_vm2 = vmmov %vm2529_vm0 }
 0xe9a   :  { %vm2535_vm13 = vmmov %vm2529_vm0 }
 0xe9e   :  { %1450 = vrot.lane.b32.xlu2 %v1441_v1, %s2022_s19 }
 0xea0   :  { %1468 = vrot.lane.b32.xlu1 %v1441_v1, %s2021_s18  ;;  %1916 = vrot.lane.b32.xlu0 %v1910_v2, %s2002_s30 }
 0xea8   :  { %1447 = vrot.lane.b32.xlu1 %v1441_v1, %s2006_s7  ;;  %1457 = vrot.lane.b32.xlu0 %v1441_v1, %s2023_s20 }
 0xeb0   :  { %1474 = vperm.xlu1 %1889, %v1424_v3   ;;  %1194 = vperm.xlu0 %1789, %v1159_v41  }
 0xee3   :  { %v1182_v10 = vpop.permute.xlu2 %1181 }
 0xef0   :  { %v1465_v42 = vpop.permute.xlu2 %1464 }
 0xef8   :  { %v1451_v24 = vpop.permute.xlu2 %1450 }
 0xf0a   :  { %v1912_v4 = vpop.permute.xlu1 %1911  ;;  %v1907_v5 = vpop.permute.xlu0 %1906 }
 0xf0b   :  { %v1913_v6 = vunpack.i.l.bf16 %v1912_v4  ;;  %v1908_v8 = vunpack.i.l.bf16 %v1907_v5  ;;  %v1914_v16 = vunpack.i.h.bf16 %v1912_v4  ;;  %v1909_v31 = vunpack.i.h.bf16 %v1907_v5 }
 0xf0d   :  { %v1191_v11 = vsel %vm2529_vm0, %v1908_v8, %v1913_v6  ;;  %v1180_v19 = vsel %vm2531_vm12, %v1175_v60, %v1908_v8  ;;  %v1446_v26 = vsel %vm2529_vm0, %v1441_v1, %v1914_v16 }
 0xf0e   :  { %1212 = vmatpush.msrb.mxu0 %v1191_v11 }
 0xf12   :  { %v1469_v12 = vpop.permute.xlu1 %1468  ;;  %v1917_v13 = vpop.permute.xlu0 %1916 }
 0xf13   :  { %v1918_v14 = vunpack.i.l.bf16 %v1917_v13  ;;  %v1919_v17 = vunpack.i.h.bf16 %v1917_v13  ;;  %v1471_v20 = vsel %vm2532_vm8, %v1914_v16, %v1469_v12  ;;  %vm2536_vm8 = vcmask 424960  }
 0xf15   :  { %v1187_v15 = vsel %vm2530_vm1, %v1182_v10, %v1918_v14  ;;  %v1467_v22 = vsel %vm2533_vm6, %v1919_v17, %v1465_v42  ;;  %vm2542_vm6 = vmmov %vm2529_vm0 }
 0xf16   :  { %1213 = vmatpush.msrb.mxu0 %v1187_v15 }
 0xf18   :  { %1214 = vmatpush.msrb.mxu0 %v1180_v19 }
 0xf19   :  { %1695 = vmatmul.msk.f32.vlgmr.msrb.gmra.mxu0 %vm232_vm14, %v1159_v41 }
 0xf1a   :  { %1490 = vmatpush.msra.mxu0 %v1471_v20  ;;  %v1458_v21 = vpop.permute.xlu0 %1457  ;;  %v1448_v30 = vpop.permute.xlu1 %1447 }
 0xf1b   :  { %v1460_v23 = vsel %vm2534_vm2, %v1909_v31, %v1458_v21  ;;  %v1453_v25 = vsel %vm2535_vm13, %v1448_v30, %v1451_v24  ;;  %vm2543_vm2 = vmmov %vm2529_vm0 }
 0xf1c   :  { %1491 = vmatpush.msra.mxu0 %v1467_v22  ;;  %vm2544_vm13 = vmmov %vm2529_vm0 }
 0xf1e   :  { %1492 = vmatpush.msra.mxu0 %v1460_v23 }
 0xf20   :  { %1493 = vmatpush.msra.mxu0 %v1453_v25 }
 0xf22   :  { %1494 = vmatpush.msra.mxu0 %v1446_v26  ;;  %v1195_v27 = vpop.permute.xlu0 %1194  ;;  %v1475_v34 = vpop.permute.xlu1 %1474 }
 0xf23   :  { %1699 = vmatmul.msk.f32.vlgmr.msra.gmra.mxu0 %vm578_vm15, %v1424_v3 }
 0xf96   :  { %v1216_v28 = vpop.f32.mrf.mxu0 }
 0xf97   :  { %v1217_v29 = vadd.f32 %v1216_v28, %v1195_v27 }
 0xf99   :  { %v1221_v32 = vmul.f32 0.1, %v1217_v29  ;;  %vm1220_vm1 = vcmp.ge.f32.partialorder %v1217_v29, 0.0 }
 0xf9b   :  { %v1222_v33 = vsel %vm1220_vm1, %v1217_v29, %v1221_v32  ;;  %vm2545_vm1 = vmmov %vm2529_vm0 }
 0xf9c   :  { %1227 = vrot.lane.b32.xlu0 %v1222_v33, %s1997_s27  ;;  %1224 = vrot.lane.b32.xlu2 %v1222_v33, %s2012_s12 }
 0xfa0   :  { %v1496_v35 = vpop.f32.mrf.mxu0 }
 0xfa1   :  { %v1497_v36 = vadd.f32 %v1496_v35, %v1475_v34  ;;  %v1578_v35 = vld [vmem:[#allocation2 + $0x98] sm:$0xff] }
 0xfa3   :  { %vm1500_vm12 = vcmp.ge.f32.partialorder %v1497_v36, 0.0  ;;  %v1501_v37 = vmul.f32 0.1, %v1497_v36 }
 0xfa5   :  { %v1502_v38 = vsel %vm1500_vm12, %v1497_v36, %v1501_v37 }
 0xfa6   :  { %1507 = vrot.lane.b32.xlu2 %v1502_v38, %s2016_s15  ;;  %1504 = vrot.lane.b32.xlu1 %v1502_v38, %s2015_s14 }
 0xff6   :  { %v1225_v39 = vpop.permute.xlu2 %1224 }
 0xff7   :  { %v1230_v40 = vsel %vm168_vm11, 0.0, %v1225_v39  ;;  %vm2537_vm11 = vcmask 441344  }
 0xff8   :  { %v1231_v44 = vsel %vm1049_vm5, %v1230_v40, 0.0  ;;  %vm2538_vm5 = vcmask 834560   ;;  %vm2547_vm12 = vmmov %vm2537_vm11 }
 0xff9   :  { %v1232_v45 = vsel %vm1051_vm9, %v1231_v44, 0.0 }
0x1000   :  { %v1508_v58 = vpop.permute.xlu2 %1507 }
0x100e   :  { %v1228_v47 = vpop.permute.xlu0 %1227 }
0x100f   :  { %v1233_v48 = vsel %vm302_vm7, %v1232_v45, %v1228_v47 }
0x1010   :  { %v1234_v49 = vsel %vm1054_vm10, %v1233_v48, 0.0  ;;  %vm2541_vm10 = vmmov %vm2529_vm0 }
0x1011   :  { %1240 = vrot.lane.b32.xlu2 %v1234_v49, %s2005_s6 }
0x1018   :  { %v1505_v50 = vpop.permute.xlu1 %1504 }
0x1019   :  { %v1510_v51 = vsel %vm535_vm3, 0.0, %v1505_v50  ;;  %vm2539_vm3 = vmmov %vm2529_vm0 }
0x101a   :  { %v1511_v52 = vsel %vm1051_vm9, %v1510_v51, 0.0  ;;  %vm2540_vm9 = vmmov %vm2529_vm0 }
0x101b   :  { %v1512_v54 = vsel %vm2536_vm8, %v1511_v52, 0.0  ;;  %vm2548_vm8 = vcmask 465920  }
0x101c   :  { %v1513_v55 = vsel %vm2537_vm11, %v1512_v54, %v1508_v58  ;;  %vm2551_vm11 = vmmov %vm2529_vm0 }
0x101d   :  { %v1514_v56 = vsel %vm2538_vm5, %v1513_v55, 0.0  ;;  %vm2552_vm5 = vmmov %vm2529_vm0 }
0x101e   :  { %1537 = vrot.lane.b32.xlu2 %v1514_v56, %s2010_s11  ;;  %v1925_v57 = vpack.i.bf16 %v1514_v56, %v1234_v49 }
0x1020   :  { %1926 = vrot.lane.b32.xlu1 %v1925_v57, %s1999_s0  ;;  %1921 = vrot.lane.b32.xlu0 %v1925_v57, %s2009_s10 }
0x1026   :  { %1523 = vrot.lane.b32.xlu2 %v1514_v56, %s2000_s28 }
0x1028   :  { %1541 = vrot.lane.b32.xlu1 %v1514_v56, %s2008_s9  ;;  %1931 = vrot.lane.b32.xlu0 %v1925_v57, %s2006_s7 }
0x1030   :  { %1520 = vrot.lane.b32.xlu1 %v1514_v56, %s2005_s6  ;;  %1530 = vrot.lane.b32.xlu0 %v1514_v56, %s2001_s29 }
0x1038   :  { %1547 = vperm.xlu1 %1889, %v1499_v7   ;;  %1253 = vperm.xlu0 %1789, %v1219_v59  }
0x1040   :  { %1935 = vset.pattern.permute.xlu1 %v2011_v18  ;;  %1936 = vset.pattern.permute.xlu0 %v2011_v18 }
0x106b   :  { %v1241_v43 = vpop.permute.xlu2 %1240 }
0x1078   :  { %v1538_v3 = vpop.permute.xlu2 %1537 }
0x1080   :  { %v1524_v14 = vpop.permute.xlu2 %1523 }
0x1092   :  { %v1927_v60 = vpop.permute.xlu1 %1926  ;;  %v1922_v61 = vpop.permute.xlu0 %1921 }
0x1093   :  { %v1928_v62 = vunpack.i.l.bf16 %v1927_v60  ;;  %v1923_v63 = vunpack.i.l.bf16 %v1922_v61  ;;  %v1929_v4 = vunpack.i.h.bf16 %v1927_v60  ;;  %v1924_v18 = vunpack.i.h.bf16 %v1922_v61 }
0x1095   :  { %v1250_v0 = vsel %vm2539_vm3, %v1923_v63, %v1928_v62  ;;  %v1239_v6 = vsel %vm2541_vm10, %v1234_v49, %v1923_v63  ;;  %v1519_v15 = vsel %vm2545_vm1, %v1514_v56, %v1929_v4  ;;  %vm2553_vm3 = vmmov %vm2529_vm0 }
0x1096   :  { %1271 = vmatpush.msrb.mxu1 %v1250_v0  ;;  %vm2555_vm10 = vmmov %vm2529_vm0 }
0x109a   :  { %v1542_v9 = vpop.permute.xlu1 %1541  ;;  %v1932_v1 = vpop.permute.xlu0 %1931 }
0x109b   :  { %v1933_v2 = vunpack.i.l.bf16 %v1932_v1  ;;  %v1934_v5 = vunpack.i.h.bf16 %v1932_v1  ;;  %v1544_v8 = vsel %vm2542_vm6, %v1929_v4, %v1542_v9  ;;  %vm2556_vm6 = vcmask 457728  }
0x109d   :  { %v1246_v41 = vsel %vm2540_vm9, %v1241_v43, %v1933_v2  ;;  %v1540_v11 = vsel %vm2543_vm2, %v1934_v5, %v1538_v3  ;;  %vm2554_vm9 = vmmov %vm2529_vm0  ;;  %vm1663_vm2 = vcmask 785408  }
0x109e   :  { %1272 = vmatpush.msrb.mxu1 %v1246_v41 }
0x10a0   :  { %1273 = vmatpush.msrb.mxu1 %v1239_v6 }
0x10a1   :  { %1696 = vmatmul.msk.f32.vlgmr.msrb.gmra.mxu1 %vm232_vm14, %v1219_v59 }
0x10a2   :  { %1563 = vmatpush.msra.mxu1 %v1544_v8  ;;  %v1531_v10 = vpop.permute.xlu0 %1530  ;;  %v1521_v13 = vpop.permute.xlu1 %1520 }
0x10a3   :  { %v1533_v12 = vsel %vm2544_vm13, %v1924_v18, %v1531_v10  ;;  %v1526_v42 = vsel %vm2529_vm0, %v1521_v13, %v1524_v14 }
0x10a4   :  { %1564 = vmatpush.msra.mxu1 %v1540_v11 }
0x10a6   :  { %1565 = vmatpush.msra.mxu1 %v1533_v12 }
0x10a8   :  { %1566 = vmatpush.msra.mxu1 %v1526_v42 }
0x10aa   :  { %1567 = vmatpush.msra.mxu1 %v1519_v15  ;;  %v1254_v17 = vpop.permute.xlu0 %1253  ;;  %v1548_v31 = vpop.permute.xlu1 %1547 }
0x10ab   :  { %1700 = vmatmul.msk.f32.vlgmr.msra.gmra.mxu1 %vm578_vm15, %v1499_v7  ;;  %vm2546_vm15 = vcmask 23552  }
0x111e   :  { %v1275_v16 = vpop.f32.mrf.mxu1 }
0x111f   :  { %v1276_v19 = vadd.f32 %v1275_v16, %v1254_v17 }
0x1121   :  { %v1278_v22 = vadd.f32 %v1276_v19, %v2379_v46 }
0x1128   :  { %v1569_v20 = vpop.f32.mrf.mxu1 }
0x1129   :  { %v1570_v21 = vadd.f32 %v1569_v20, %v1548_v31 }
0x112b   :  { %v1572_v23 = vadd.f32 %v1570_v21, %v2387_v53 }
0x112d   :  { %v1573_v30 = vadd.f32 %v1572_v23, %v1278_v22 }
0x112f   :  { %v1574_v24 = vmul.f32 0.5, %v1573_v30 }
0x1131   :  { %vm1575_vm14 = vcmp.ge.f32.partialorder %v1574_v24, 0.0  ;;  %v1576_v25 = vmul.f32 0.1, %v1574_v24 }
0x1133   :  { %v1577_v26 = vsel %vm1575_vm14, %v1574_v24, %v1576_v25 }
0x1134   :  { %1583 = vrot.lane.b32.xlu0 %v1577_v26, %s1998_s2  ;;  %1580 = vrot.lane.b32.xlu2 %v1577_v26, %s1997_s27 }
0x118e   :  { %v1581_v27 = vpop.permute.xlu2 %1580 }
0x118f   :  { %v1586_v28 = vsel %vm2546_vm15, 0.0, %v1581_v27 }
0x1190   :  { %v1587_v29 = vsel %vm302_vm7, %v1586_v28, 0.0  ;;  %vm2549_vm7 = vmmov %vm2529_vm0 }
0x1191   :  { %v1588_v32 = vsel %vm2547_vm12, %v1587_v29, 0.0 }
0x11a6   :  { %v1584_v33 = vpop.permute.xlu0 %1583 }
0x11a7   :  { %v1589_v46 = vsel %vm2548_vm8, %v1588_v32, %v1584_v33 }
0x11a8   :  { %v1590_v53 = vsel %vm1174_vm4, %v1589_v46, 0.0  ;;  %vm2550_vm4 = vmmov %vm2529_vm0 }
0x11a9   :  { %1624 = vrot.lane.b32.xlu0 %v1590_v53, %s2000_s28  ;;  %1631 = vrot.lane.b32.xlu2 %v1590_v53, %s2004_s5 }
0x11aa   :  { %1592 = vrot.lane.b32.xlu1 %v1590_v53, %s2001_s29 }
0x11b1   :  { %1620 = vrot.lane.b32.xlu0 %v1590_v53, %s2007_s8  ;;  %1617 = vrot.lane.b32.xlu2 %v1590_v53, %s1999_s0 }
0x11b2   :  { %1627 = vrot.lane.b32.xlu1 %v1590_v53, %s2003_s4 }
0x11b9   :  { %1603 = vrot.lane.b32.xlu0 %v1590_v53, %s2009_s10  ;;  %1613 = vrot.lane.b32.xlu2 %v1590_v53, %s2002_s30 }
0x11ba   :  { %1610 = vrot.lane.b32.xlu1 %v1590_v53, %s2006_s7 }
0x11c1   :  { %1599 = vrot.lane.b32.xlu0 %v1590_v53, %s2010_s11  ;;  %1596 = vrot.lane.b32.xlu2 %v1590_v53, %s2005_s6 }
0x11c2   :  { %1606 = vrot.lane.b32.xlu1 %v1590_v53, %s2008_s9 }
0x11ca   :  { %1637 = vperm.xlu1 %1935, %v1578_v35  }
0x1203   :  { %v1632_v34 = vpop.permute.xlu2 %1631 }
0x120b   :  { %v1618_v39 = vpop.permute.xlu2 %1617 }
0x1213   :  { %v1614_v49 = vpop.permute.xlu2 %1613 }
0x121b   :  { %v1625_v36 = vpop.permute.xlu0 %1624  ;;  %v1597_v55 = vpop.permute.xlu2 %1596 }
0x121c   :  { %v1593_v37 = vpop.permute.xlu1 %1592 }
0x121d   :  { %v1634_v38 = vsel %vm2549_vm7, %v1593_v37, %v1632_v34  ;;  %v1595_v57 = vsel %vm2555_vm10, %v1590_v53, %v1593_v37 }
0x121e   :  { %1651 = vmatpush.msrb.mxu2 %v1634_v38 }
0x1223   :  { %v1621_v40 = vpop.permute.xlu0 %1620 }
0x1224   :  { %v1628_v44 = vpop.permute.xlu1 %1627  ;;  %v1623_v47 = vsel %vm2551_vm11, %v1618_v39, %v1621_v40 }
0x1225   :  { %v1630_v45 = vsel %vm2550_vm4, %v1625_v36, %v1628_v44 }
0x1226   :  { %1652 = vmatpush.msrb.mxu2 %v1630_v45 }
0x1228   :  { %1653 = vmatpush.msrb.mxu2 %v1623_v47 }
0x122b   :  { %v1604_v48 = vpop.permute.xlu0 %1603 }
0x122c   :  { %v1611_v50 = vpop.permute.xlu1 %1610 }
0x122d   :  { %v1616_v51 = vsel %vm2552_vm5, %v1611_v50, %v1614_v49 }
0x122e   :  { %1654 = vmatpush.msrb.mxu2 %v1616_v51 }
0x1233   :  { %v1600_v52 = vpop.permute.xlu0 %1599 }
0x1234   :  { %v1607_v58 = vpop.permute.xlu1 %1606  ;;  %v1602_v56 = vsel %vm2554_vm9, %v1597_v55, %v1600_v52 }
0x1235   :  { %v1609_v54 = vsel %vm2553_vm3, %v1604_v48, %v1607_v58 }
0x1236   :  { %1655 = vmatpush.msrb.mxu2 %v1609_v54 }
0x1238   :  { %1656 = vmatpush.msrb.mxu2 %v1602_v56 }
0x123a   :  { %1657 = vmatpush.msrb.mxu2 %v1595_v57 }
0x123b   :  { %1701 = vmatmul.msk.f32.vlgmr.msrb.gmra.mxu2 %vm2556_vm6, %v1578_v35 }
0x123c   :  { %v1638_v7 = vpop.permute.xlu1 %1637 }
0x12be   :  { %v1659_v59 = vpop.f32.mrf.mxu2 }
0x12bf   :  { %v1660_v60 = vadd.f32 %v1659_v59, %v1638_v7 }
0x12c1   :  { %1937 = vtanh.f32 %v1660_v60 }
0x12c7   :  { %v1938_v61 = vpop.eup %1937 }
0x12c8   :  { %v1664_v62 = vsel %vm1663_vm2, %v1938_v61, 0.0 }
0x12c9   :  { %1665 = vst [vmem:[%s2491_s3] sm:$0xff] %v1664_v62 }
0x12ca   :  { %1670 = vsyncpa [#allocation3], 1 }
0x12cb   :  { %1671 = vsyncpa [#allocation5], 1 }

</bundles_post_ra>
